<compile_context>
chip_gen: v5e
topology: v5e:2x2
jax: 0.10.0
libtpu: 0.0.40
codegen_flags: <defaults>
</compile_context>

<pallas_src>
import jax
import jax.numpy as jnp
from jax.experimental import pallas as pl
from jax.experimental.pallas import tpu as pltpu


def _fold_conv_weight(w):
    """HWIO [3,3,Cin,Cout] -> dense K-folded [9*Cin, Cout] bf16.

    Row index = (kh*3 + kw)*Cin + ci, matching the in-kernel tap order."""
    kh, kw, cin, cout = w.shape
    return w.reshape(kh * kw * cin, cout).astype(jnp.bfloat16)


# ----------------------------- Pallas kernel -----------------------------

def basic_cnn_kernel(x_ref, w1_ref, b1_ref, w2_ref, b2_ref, w3_ref, b3_ref,
                     wfc_ref, bfc_ref, wh_ref, bh_ref, out_ref):
    def conv_relu_pool(src, w_ref, b_ref):
        """3x3 SAME conv + bias + ReLU + 2x2 maxpool, fully in registers.

        src: [H, W, Cin] f32 value.  Returns [H/2, W/2, Cout] f32 value.
        One dense K-folded bf16 MXU matmul: taps [H*W, 9*Cin] @ w [9*Cin, Cout].
        """
        h, w, c = src.shape
        cout = w_ref.shape[1]
        zrow = jnp.zeros((1, w, c), src.dtype)
        zcol = jnp.zeros((h, 1, c), src.dtype)

        # W-direction (sublane axis) shifts with zero 'SAME' boundary — only 2
        # relayout concats per stage (shared by all three H variants).
        w_m = jnp.concatenate([zcol, src[:, :w - 1, :]], axis=1)   # reads x[., w-1]
        w_p = jnp.concatenate([src[:, 1:, :], zcol], axis=1)       # reads x[., w+1]

        # H-direction shifts are leading-dim concats (vreg-level, cheap).
        taps = []
        for kh in range(3):                     # tap order matches the weight fold:
            for wv in (w_m, src, w_p):          # tap t = kh*3 + kw
                if kh == 0:
                    t = jnp.concatenate([zrow, wv[:h - 1]], axis=0)   # reads x[h-1, .]
                elif kh == 2:
                    t = jnp.concatenate([wv[1:], zrow], axis=0)       # reads x[h+1, .]
                else:
                    t = wv
                taps.append(t)
        tap_mat = jnp.concatenate(taps, axis=-1).reshape(h * w, 9 * c)

        # Dense-K matmul on the MXU (bf16 inputs, f32 accumulate) + bias + ReLU.
        y = jnp.dot(tap_mat.astype(jnp.bfloat16), w_ref[...],
                    preferred_element_type=jnp.float32)
        y = jnp.maximum(y + b_ref[...], 0.0)                       # [H*W, Cout] f32

        # Fused 2x2 maxpool, both directions in registers.
        y = y.reshape(h * w // 2, 2, cout)
        y = jnp.maximum(y[:, 0, :], y[:, 1, :])                    # W pairs
        y = y.reshape(h // 2, 2, w // 2, cout)
        y = jnp.maximum(y[:, 0, :, :], y[:, 1, :, :])              # H pairs
        return y                                                   # [H/2, W/2, Cout]

    a = x_ref[0]                                        # this batch elem: [H, W, Cin]
    a = conv_relu_pool(a, w1_ref, b1_ref)
    a = conv_relu_pool(a, w2_ref, b2_ref)
    a = conv_relu_pool(a, w3_ref, b3_ref)               # [H/8, W/8, C3]

    # Global average pool over the remaining spatial grid.
    hh, ww, c3 = a.shape
    feat = jnp.sum(a.reshape(hh * ww, c3), axis=0, keepdims=True) * (1.0 / (hh * ww))

    # Shared FC + ReLU.  Dropout(0.5) is identity at inference time.
    hid = jnp.dot(feat.astype(jnp.bfloat16), wfc_ref[...],
                  preferred_element_type=jnp.float32)
    hid = jnp.maximum(hid + bfc_ref[...], 0.0)                     # [1, FC]

    # Fused heads: single matmul against the concatenated [FC, 5+4] weight.
    logits = jnp.dot(hid.astype(jnp.bfloat16), wh_ref[...],
                     preferred_element_type=jnp.float32)
    out_ref[...] = (logits + bh_ref[...]).reshape(out_ref.shape).astype(out_ref.dtype)


# ----------------------------- JAX wrapper -----------------------------

def basic_cnn_forward(x_nchw, p):
    x = jnp.transpose(x_nchw, (0, 2, 3, 1)).astype(jnp.float32)    # NCHW -> NHWC
    bsz, h0, w0, cin = x.shape
    assert h0 % 8 == 0 and w0 % 8 == 0, "three 2x max-pools need H, W divisible by 8"
    nb, nd = p["w_bir"].shape[1], p["w_den"].shape[1]

    # Dense-K folded conv weights + fused heads, bf16 at the MXU boundary.
    w1k = _fold_conv_weight(p["w1"])
    w2k = _fold_conv_weight(p["w2"])
    w3k = _fold_conv_weight(p["w3"])
    wfc = p["w_fc"].astype(jnp.bfloat16)
    wh = jnp.concatenate([p["w_bir"], p["w_den"]], axis=1).astype(jnp.bfloat16)
    bh = jnp.concatenate([p["b_bir"], p["b_den"]], axis=1)          # [1, 5+4] f32

    def full_spec(arr):
        nd_ = arr.ndim
        return pl.BlockSpec(arr.shape, lambda b, _n=nd_: (0,) * _n)

    out = pl.pallas_call(
        basic_cnn_kernel,
        out_shape=jax.ShapeDtypeStruct((bsz, 1, nb + nd), jnp.float32),
        grid=(bsz,),
        in_specs=[
            pl.BlockSpec((1, h0, w0, cin), lambda b: (b, 0, 0, 0)),
            full_spec(w1k), full_spec(p["b1"]),
            full_spec(w2k), full_spec(p["b2"]),
            full_spec(w3k), full_spec(p["b3"]),
            full_spec(wfc), full_spec(p["b_fc"]),
            full_spec(wh), full_spec(bh),
        ],
        out_specs=pl.BlockSpec((1, 1, nb + nd), lambda b: (b, 0, 0)),
        compiler_params=pltpu.CompilerParams(
            dimension_semantics=("parallel",)),
    )(x, w1k, p["b1"], w2k, p["b2"], w3k, p["b3"], wfc, p["b_fc"], wh, bh)

    out = out.reshape(bsz, nb + nd)
    return out[:, :nb], out[:, nb:]


# ----------------------------- params / reference -----------------------------

def init_params(key, in_ch=3, base=16, fc_units=128, n_birads=5, n_density=4):
    ks = jax.random.split(key, 12)

    def wconv(k, cin, cout):
        return jax.random.normal(k, (3, 3, cin, cout), jnp.float32) * (2.0 / (9 * cin)) ** 0.5

    def wlin(k, fin, fout):
        return jax.random.normal(k, (fin, fout), jnp.float32) * (2.0 / fin) ** 0.5

    def bias(k, n):
        return jax.random.normal(k, (1, n), jnp.float32) * 0.01

    return {
        "w1": wconv(ks[0], in_ch, base),        "b1": bias(ks[1], base),
        "w2": wconv(ks[2], base, base * 2),     "b2": bias(ks[3], base * 2),
        "w3": wconv(ks[4], base * 2, base * 4), "b3": bias(ks[5], base * 4),
        "w_fc": wlin(ks[6], base * 4, fc_units),  "b_fc": bias(ks[7], fc_units),
        "w_bir": wlin(ks[8], fc_units, n_birads), "b_bir": bias(ks[9], n_birads),
        "w_den": wlin(ks[10], fc_units, n_density), "b_den": bias(ks[11], n_density),
    }


def reference_forward(x_nchw, p):
    """Pure-JAX f32 reference (matches PyTorch eval-mode semantics)."""
    x = jnp.transpose(x_nchw, (0, 2, 3, 1))

    def conv(x, w, b):
        y = jax.lax.conv_general_dilated(
            x, w, window_strides=(1, 1), padding="SAME",
            dimension_numbers=("NHWC", "HWIO", "NHWC"),
            precision=jax.lax.Precision.HIGHEST)
        return jax.nn.relu(y + b.reshape(1, 1, 1, -1))

    def pool(x):
        return jax.lax.reduce_window(x, -jnp.inf, jax.lax.max,
                                     (1, 2, 2, 1), (1, 2, 2, 1), "VALID")

    x = pool(conv(x, p["w1"], p["b1"]))
    x = pool(conv(x, p["w2"], p["b2"]))
    x = pool(conv(x, p["w3"], p["b3"]))
    feat = jnp.mean(x, axis=(1, 2))
    hid = jax.nn.relu(feat @ p["w_fc"] + p["b_fc"])
    return hid @ p["w_bir"] + p["b_bir"], hid @ p["w_den"] + p["b_den"]


# ----------------------------- main -----------------------------

if __name__ == "__main__":
    key = jax.random.PRNGKey(0)
    kx, kp = jax.random.split(key)

    # Small shapes consistent with the module: batch=2, 3 input channels,
    # 16x16 spatial (divisible by the three 2x max-pools: 16 -> 8 -> 4 -> 2).
    x = jax.random.normal(kx, (2, 3, 16, 16), jnp.float32)   # NCHW like PyTorch
    params = init_params(kp)

    fwd = jax.jit(basic_cnn_forward)
    birads_logits, density_logits = fwd(x, params)
    jax.block_until_ready((birads_logits, density_logits))

    assert birads_logits.shape == (2, 5) and density_logits.shape == (2, 4)

    # Tolerance covers the bf16 MXU-boundary cast (f32 accumulate) vs f32 reference.
    ref_b, ref_d = reference_forward(x, params)
    err_b = float(jnp.max(jnp.abs(birads_logits - ref_b)))
    err_d = float(jnp.max(jnp.abs(density_logits - ref_d)))
    assert jnp.allclose(birads_logits, ref_b, rtol=5e-2, atol=5e-2), ("birads", err_b)
    assert jnp.allclose(density_logits, ref_d, rtol=5e-2, atol=5e-2), ("density", err_d)

    print("KERNEL_OK")
</pallas_src>

<mosaic_0001>
module attributes {stable_mosaic.version = 11 : i64} {
  func.func @basic_cnn_kernel(%arg0: i32, %arg1: memref<1x16x16x3xf32, #tpu.memory_space<vmem>>, %arg2: memref<27x16xbf16, #tpu.memory_space<vmem>>, %arg3: memref<1x16xf32, #tpu.memory_space<vmem>>, %arg4: memref<144x32xbf16, #tpu.memory_space<vmem>>, %arg5: memref<1x32xf32, #tpu.memory_space<vmem>>, %arg6: memref<288x64xbf16, #tpu.memory_space<vmem>>, %arg7: memref<1x64xf32, #tpu.memory_space<vmem>>, %arg8: memref<64x128xbf16, #tpu.memory_space<vmem>>, %arg9: memref<1x128xf32, #tpu.memory_space<vmem>>, %arg10: memref<128x9xbf16, #tpu.memory_space<vmem>>, %arg11: memref<1x9xf32, #tpu.memory_space<vmem>>, %arg12: memref<1x1x9xf32, #tpu.memory_space<vmem>>) attributes {dimension_semantics = [#tpu.dimension_semantics<parallel>], iteration_bounds = array<i64: 2>, scalar_prefetch = 0 : i64, scratch_operands = 0 : i64, tpu.core_type = #tpu.core_type<tc>, window_params = [{transform_indices = @transform_0, window_bounds = array<i64: 1, 16, 16, 3>}, {pipeline_mode = #tpu.pipeline_mode<synchronous>, transform_indices = @transform_1, window_bounds = array<i64: 27, 16>}, {pipeline_mode = #tpu.pipeline_mode<synchronous>, transform_indices = @transform_2, window_bounds = array<i64: 1, 16>}, {pipeline_mode = #tpu.pipeline_mode<synchronous>, transform_indices = @transform_3, window_bounds = array<i64: 144, 32>}, {pipeline_mode = #tpu.pipeline_mode<synchronous>, transform_indices = @transform_4, window_bounds = array<i64: 1, 32>}, {pipeline_mode = #tpu.pipeline_mode<synchronous>, transform_indices = @transform_5, window_bounds = array<i64: 288, 64>}, {pipeline_mode = #tpu.pipeline_mode<synchronous>, transform_indices = @transform_6, window_bounds = array<i64: 1, 64>}, {pipeline_mode = #tpu.pipeline_mode<synchronous>, transform_indices = @transform_7, window_bounds = array<i64: 64, 128>}, {pipeline_mode = #tpu.pipeline_mode<synchronous>, transform_indices = @transform_8, window_bounds = array<i64: 1, 128>}, {pipeline_mode = #tpu.pipeline_mode<synchronous>, transform_indices = @transform_9, window_bounds = array<i64: 128, 9>}, {pipeline_mode = #tpu.pipeline_mode<synchronous>, transform_indices = @transform_10, window_bounds = array<i64: 1, 9>}, {transform_indices = @transform_11, window_bounds = array<i64: 1, 1, 9>}]} {
    %c0 = arith.constant 0 : index
    %c0_0 = arith.constant 0 : index
    %c0_1 = arith.constant 0 : index
    %c0_2 = arith.constant 0 : index
    %0 = vector.load %arg1[%c0, %c0_0, %c0_1, %c0_2] : memref<1x16x16x3xf32, #tpu.memory_space<vmem>>, vector<1x16x16x3xf32>
    %1 = vector.shape_cast %0 : vector<1x16x16x3xf32> to vector<16x16x3xf32>
    %cst = arith.constant 0.000000e+00 : f32
    %2 = vector.broadcast %cst : f32 to vector<1x16x3xf32>
    %cst_3 = arith.constant 0.000000e+00 : f32
    %3 = vector.broadcast %cst_3 : f32 to vector<16x1x3xf32>
    %4 = vector.extract_strided_slice %1 {offsets = [0, 0, 0], sizes = [16, 15, 3], strides = [1, 1, 1]} : vector<16x16x3xf32> to vector<16x15x3xf32>
    %5 = tpu.concatenate %3, %4 in 1 : vector<16x1x3xf32>, vector<16x15x3xf32> -> vector<16x16x3xf32>
    %6 = vector.extract_strided_slice %1 {offsets = [0, 1, 0], sizes = [16, 15, 3], strides = [1, 1, 1]} : vector<16x16x3xf32> to vector<16x15x3xf32>
    %7 = tpu.concatenate %6, %3 in 1 : vector<16x15x3xf32>, vector<16x1x3xf32> -> vector<16x16x3xf32>
    %8 = vector.extract_strided_slice %5 {offsets = [0, 0, 0], sizes = [15, 16, 3], strides = [1, 1, 1]} : vector<16x16x3xf32> to vector<15x16x3xf32>
    %9 = tpu.concatenate %2, %8 in 0 : vector<1x16x3xf32>, vector<15x16x3xf32> -> vector<16x16x3xf32>
    %10 = vector.extract_strided_slice %1 {offsets = [0, 0, 0], sizes = [15, 16, 3], strides = [1, 1, 1]} : vector<16x16x3xf32> to vector<15x16x3xf32>
    %11 = tpu.concatenate %2, %10 in 0 : vector<1x16x3xf32>, vector<15x16x3xf32> -> vector<16x16x3xf32>
    %12 = vector.extract_strided_slice %7 {offsets = [0, 0, 0], sizes = [15, 16, 3], strides = [1, 1, 1]} : vector<16x16x3xf32> to vector<15x16x3xf32>
    %13 = tpu.concatenate %2, %12 in 0 : vector<1x16x3xf32>, vector<15x16x3xf32> -> vector<16x16x3xf32>
    %14 = vector.extract_strided_slice %5 {offsets = [1, 0, 0], sizes = [15, 16, 3], strides = [1, 1, 1]} : vector<16x16x3xf32> to vector<15x16x3xf32>
    %15 = tpu.concatenate %14, %2 in 0 : vector<15x16x3xf32>, vector<1x16x3xf32> -> vector<16x16x3xf32>
    %16 = vector.extract_strided_slice %1 {offsets = [1, 0, 0], sizes = [15, 16, 3], strides = [1, 1, 1]} : vector<16x16x3xf32> to vector<15x16x3xf32>
    %17 = tpu.concatenate %16, %2 in 0 : vector<15x16x3xf32>, vector<1x16x3xf32> -> vector<16x16x3xf32>
    %18 = vector.extract_strided_slice %7 {offsets = [1, 0, 0], sizes = [15, 16, 3], strides = [1, 1, 1]} : vector<16x16x3xf32> to vector<15x16x3xf32>
    %19 = tpu.concatenate %18, %2 in 0 : vector<15x16x3xf32>, vector<1x16x3xf32> -> vector<16x16x3xf32>
    %20 = tpu.concatenate %9, %11, %13, %5, %1, %7, %15, %17, %19 in 2 : vector<16x16x3xf32>, vector<16x16x3xf32>, vector<16x16x3xf32>, vector<16x16x3xf32>, vector<16x16x3xf32>, vector<16x16x3xf32>, vector<16x16x3xf32>, vector<16x16x3xf32>, vector<16x16x3xf32> -> vector<16x16x27xf32>
    %21 = vector.shape_cast %20 : vector<16x16x27xf32> to vector<256x27xf32>
    %22 = arith.truncf %21 : vector<256x27xf32> to vector<256x27xbf16>
    %c0_4 = arith.constant 0 : index
    %c0_5 = arith.constant 0 : index
    %23 = vector.load %arg2[%c0_4, %c0_5] : memref<27x16xbf16, #tpu.memory_space<vmem>>, vector<27x16xbf16>
    %cst_6 = arith.constant dense<0.000000e+00> : vector<256x16xf32>
    %24 = tpu.matmul %22, %23, %cst_6 {dimension_numbers = #tpu.dot_dimension_numbers<[1], [0], [0], [1], [0, 0, 1, 1], [], []>} : vector<256x27xbf16>, vector<27x16xbf16>, vector<256x16xf32> -> vector<256x16xf32>
    %c0_7 = arith.constant 0 : index
    %c0_8 = arith.constant 0 : index
    %25 = vector.load %arg3[%c0_7, %c0_8] : memref<1x16xf32, #tpu.memory_space<vmem>>, vector<1x16xf32>
    %26 = vector.broadcast %25 : vector<1x16xf32> to vector<256x16xf32>
    %27 = arith.addf %24, %26 : vector<256x16xf32>
    %cst_9 = arith.constant 0.000000e+00 : f32
    %28 = vector.broadcast %cst_9 : f32 to vector<256x16xf32>
    %29 = arith.maximumf %27, %28 : vector<256x16xf32>
    %30 = vector.shape_cast %29 : vector<256x16xf32> to vector<128x2x16xf32>
    %31 = vector.extract_strided_slice %30 {offsets = [0, 0, 0], sizes = [128, 1, 16], strides = [1, 1, 1]} : vector<128x2x16xf32> to vector<128x1x16xf32>
    %32 = vector.shape_cast %31 : vector<128x1x16xf32> to vector<128x16xf32>
    %33 = vector.extract_strided_slice %30 {offsets = [0, 1, 0], sizes = [128, 1, 16], strides = [1, 1, 1]} : vector<128x2x16xf32> to vector<128x1x16xf32>
    %34 = vector.shape_cast %33 : vector<128x1x16xf32> to vector<128x16xf32>
    %35 = arith.maximumf %32, %34 : vector<128x16xf32>
    %36 = vector.shape_cast %35 : vector<128x16xf32> to vector<8x2x8x16xf32>
    %37 = vector.extract_strided_slice %36 {offsets = [0, 0, 0, 0], sizes = [8, 1, 8, 16], strides = [1, 1, 1, 1]} : vector<8x2x8x16xf32> to vector<8x1x8x16xf32>
    %38 = vector.shape_cast %37 : vector<8x1x8x16xf32> to vector<8x8x16xf32>
    %39 = vector.extract_strided_slice %36 {offsets = [0, 1, 0, 0], sizes = [8, 1, 8, 16], strides = [1, 1, 1, 1]} : vector<8x2x8x16xf32> to vector<8x1x8x16xf32>
    %40 = vector.shape_cast %39 : vector<8x1x8x16xf32> to vector<8x8x16xf32>
    %41 = arith.maximumf %38, %40 : vector<8x8x16xf32>
    %cst_10 = arith.constant 0.000000e+00 : f32
    %42 = vector.broadcast %cst_10 : f32 to vector<1x8x16xf32>
    %cst_11 = arith.constant 0.000000e+00 : f32
    %43 = vector.broadcast %cst_11 : f32 to vector<8x1x16xf32>
    %44 = vector.extract_strided_slice %41 {offsets = [0, 0, 0], sizes = [8, 7, 16], strides = [1, 1, 1]} : vector<8x8x16xf32> to vector<8x7x16xf32>
    %45 = tpu.concatenate %43, %44 in 1 : vector<8x1x16xf32>, vector<8x7x16xf32> -> vector<8x8x16xf32>
    %46 = vector.extract_strided_slice %41 {offsets = [0, 1, 0], sizes = [8, 7, 16], strides = [1, 1, 1]} : vector<8x8x16xf32> to vector<8x7x16xf32>
    %47 = tpu.concatenate %46, %43 in 1 : vector<8x7x16xf32>, vector<8x1x16xf32> -> vector<8x8x16xf32>
    %48 = vector.extract_strided_slice %45 {offsets = [0, 0, 0], sizes = [7, 8, 16], strides = [1, 1, 1]} : vector<8x8x16xf32> to vector<7x8x16xf32>
    %49 = tpu.concatenate %42, %48 in 0 : vector<1x8x16xf32>, vector<7x8x16xf32> -> vector<8x8x16xf32>
    %50 = vector.extract_strided_slice %41 {offsets = [0, 0, 0], sizes = [7, 8, 16], strides = [1, 1, 1]} : vector<8x8x16xf32> to vector<7x8x16xf32>
    %51 = tpu.concatenate %42, %50 in 0 : vector<1x8x16xf32>, vector<7x8x16xf32> -> vector<8x8x16xf32>
    %52 = vector.extract_strided_slice %47 {offsets = [0, 0, 0], sizes = [7, 8, 16], strides = [1, 1, 1]} : vector<8x8x16xf32> to vector<7x8x16xf32>
    %53 = tpu.concatenate %42, %52 in 0 : vector<1x8x16xf32>, vector<7x8x16xf32> -> vector<8x8x16xf32>
    %54 = vector.extract_strided_slice %45 {offsets = [1, 0, 0], sizes = [7, 8, 16], strides = [1, 1, 1]} : vector<8x8x16xf32> to vector<7x8x16xf32>
    %55 = tpu.concatenate %54, %42 in 0 : vector<7x8x16xf32>, vector<1x8x16xf32> -> vector<8x8x16xf32>
    %56 = vector.extract_strided_slice %41 {offsets = [1, 0, 0], sizes = [7, 8, 16], strides = [1, 1, 1]} : vector<8x8x16xf32> to vector<7x8x16xf32>
    %57 = tpu.concatenate %56, %42 in 0 : vector<7x8x16xf32>, vector<1x8x16xf32> -> vector<8x8x16xf32>
    %58 = vector.extract_strided_slice %47 {offsets = [1, 0, 0], sizes = [7, 8, 16], strides = [1, 1, 1]} : vector<8x8x16xf32> to vector<7x8x16xf32>
    %59 = tpu.concatenate %58, %42 in 0 : vector<7x8x16xf32>, vector<1x8x16xf32> -> vector<8x8x16xf32>
    %60 = tpu.concatenate %49, %51, %53, %45, %41, %47, %55, %57, %59 in 2 : vector<8x8x16xf32>, vector<8x8x16xf32>, vector<8x8x16xf32>, vector<8x8x16xf32>, vector<8x8x16xf32>, vector<8x8x16xf32>, vector<8x8x16xf32>, vector<8x8x16xf32>, vector<8x8x16xf32> -> vector<8x8x144xf32>
    %61 = vector.shape_cast %60 : vector<8x8x144xf32> to vector<64x144xf32>
    %62 = arith.truncf %61 : vector<64x144xf32> to vector<64x144xbf16>
    %c0_12 = arith.constant 0 : index
    %c0_13 = arith.constant 0 : index
    %63 = vector.load %arg4[%c0_12, %c0_13] : memref<144x32xbf16, #tpu.memory_space<vmem>>, vector<144x32xbf16>
    %cst_14 = arith.constant dense<0.000000e+00> : vector<64x32xf32>
    %64 = tpu.matmul %62, %63, %cst_14 {dimension_numbers = #tpu.dot_dimension_numbers<[1], [0], [0], [1], [0, 0, 1, 1], [], []>} : vector<64x144xbf16>, vector<144x32xbf16>, vector<64x32xf32> -> vector<64x32xf32>
    %c0_15 = arith.constant 0 : index
    %c0_16 = arith.constant 0 : index
    %65 = vector.load %arg5[%c0_15, %c0_16] : memref<1x32xf32, #tpu.memory_space<vmem>>, vector<1x32xf32>
    %66 = vector.broadcast %65 : vector<1x32xf32> to vector<64x32xf32>
    %67 = arith.addf %64, %66 : vector<64x32xf32>
    %cst_17 = arith.constant 0.000000e+00 : f32
    %68 = vector.broadcast %cst_17 : f32 to vector<64x32xf32>
    %69 = arith.maximumf %67, %68 : vector<64x32xf32>
    %70 = vector.shape_cast %69 : vector<64x32xf32> to vector<32x2x32xf32>
    %71 = vector.extract_strided_slice %70 {offsets = [0, 0, 0], sizes = [32, 1, 32], strides = [1, 1, 1]} : vector<32x2x32xf32> to vector<32x1x32xf32>
    %72 = vector.shape_cast %71 : vector<32x1x32xf32> to vector<32x32xf32>
    %73 = vector.extract_strided_slice %70 {offsets = [0, 1, 0], sizes = [32, 1, 32], strides = [1, 1, 1]} : vector<32x2x32xf32> to vector<32x1x32xf32>
    %74 = vector.shape_cast %73 : vector<32x1x32xf32> to vector<32x32xf32>
    %75 = arith.maximumf %72, %74 : vector<32x32xf32>
    %76 = vector.shape_cast %75 : vector<32x32xf32> to vector<4x2x4x32xf32>
    %77 = vector.extract_strided_slice %76 {offsets = [0, 0, 0, 0], sizes = [4, 1, 4, 32], strides = [1, 1, 1, 1]} : vector<4x2x4x32xf32> to vector<4x1x4x32xf32>
    %78 = vector.shape_cast %77 : vector<4x1x4x32xf32> to vector<4x4x32xf32>
    %79 = vector.extract_strided_slice %76 {offsets = [0, 1, 0, 0], sizes = [4, 1, 4, 32], strides = [1, 1, 1, 1]} : vector<4x2x4x32xf32> to vector<4x1x4x32xf32>
    %80 = vector.shape_cast %79 : vector<4x1x4x32xf32> to vector<4x4x32xf32>
    %81 = arith.maximumf %78, %80 : vector<4x4x32xf32>
    %cst_18 = arith.constant 0.000000e+00 : f32
    %82 = vector.broadcast %cst_18 : f32 to vector<1x4x32xf32>
    %cst_19 = arith.constant 0.000000e+00 : f32
    %83 = vector.broadcast %cst_19 : f32 to vector<4x1x32xf32>
    %84 = vector.extract_strided_slice %81 {offsets = [0, 0, 0], sizes = [4, 3, 32], strides = [1, 1, 1]} : vector<4x4x32xf32> to vector<4x3x32xf32>
    %85 = tpu.concatenate %83, %84 in 1 : vector<4x1x32xf32>, vector<4x3x32xf32> -> vector<4x4x32xf32>
    %86 = vector.extract_strided_slice %81 {offsets = [0, 1, 0], sizes = [4, 3, 32], strides = [1, 1, 1]} : vector<4x4x32xf32> to vector<4x3x32xf32>
    %87 = tpu.concatenate %86, %83 in 1 : vector<4x3x32xf32>, vector<4x1x32xf32> -> vector<4x4x32xf32>
    %88 = vector.extract_strided_slice %85 {offsets = [0, 0, 0], sizes = [3, 4, 32], strides = [1, 1, 1]} : vector<4x4x32xf32> to vector<3x4x32xf32>
    %89 = tpu.concatenate %82, %88 in 0 : vector<1x4x32xf32>, vector<3x4x32xf32> -> vector<4x4x32xf32>
    %90 = vector.extract_strided_slice %81 {offsets = [0, 0, 0], sizes = [3, 4, 32], strides = [1, 1, 1]} : vector<4x4x32xf32> to vector<3x4x32xf32>
    %91 = tpu.concatenate %82, %90 in 0 : vector<1x4x32xf32>, vector<3x4x32xf32> -> vector<4x4x32xf32>
    %92 = vector.extract_strided_slice %87 {offsets = [0, 0, 0], sizes = [3, 4, 32], strides = [1, 1, 1]} : vector<4x4x32xf32> to vector<3x4x32xf32>
    %93 = tpu.concatenate %82, %92 in 0 : vector<1x4x32xf32>, vector<3x4x32xf32> -> vector<4x4x32xf32>
    %94 = vector.extract_strided_slice %85 {offsets = [1, 0, 0], sizes = [3, 4, 32], strides = [1, 1, 1]} : vector<4x4x32xf32> to vector<3x4x32xf32>
    %95 = tpu.concatenate %94, %82 in 0 : vector<3x4x32xf32>, vector<1x4x32xf32> -> vector<4x4x32xf32>
    %96 = vector.extract_strided_slice %81 {offsets = [1, 0, 0], sizes = [3, 4, 32], strides = [1, 1, 1]} : vector<4x4x32xf32> to vector<3x4x32xf32>
    %97 = tpu.concatenate %96, %82 in 0 : vector<3x4x32xf32>, vector<1x4x32xf32> -> vector<4x4x32xf32>
    %98 = vector.extract_strided_slice %87 {offsets = [1, 0, 0], sizes = [3, 4, 32], strides = [1, 1, 1]} : vector<4x4x32xf32> to vector<3x4x32xf32>
    %99 = tpu.concatenate %98, %82 in 0 : vector<3x4x32xf32>, vector<1x4x32xf32> -> vector<4x4x32xf32>
    %100 = tpu.concatenate %89, %91, %93, %85, %81, %87, %95, %97, %99 in 2 : vector<4x4x32xf32>, vector<4x4x32xf32>, vector<4x4x32xf32>, vector<4x4x32xf32>, vector<4x4x32xf32>, vector<4x4x32xf32>, vector<4x4x32xf32>, vector<4x4x32xf32>, vector<4x4x32xf32> -> vector<4x4x288xf32>
    %101 = vector.shape_cast %100 : vector<4x4x288xf32> to vector<16x288xf32>
    %102 = arith.truncf %101 : vector<16x288xf32> to vector<16x288xbf16>
    %c0_20 = arith.constant 0 : index
    %c0_21 = arith.constant 0 : index
    %103 = vector.load %arg6[%c0_20, %c0_21] : memref<288x64xbf16, #tpu.memory_space<vmem>>, vector<288x64xbf16>
    %cst_22 = arith.constant dense<0.000000e+00> : vector<16x64xf32>
    %104 = tpu.matmul %102, %103, %cst_22 {dimension_numbers = #tpu.dot_dimension_numbers<[1], [0], [0], [1], [0, 0, 1, 1], [], []>} : vector<16x288xbf16>, vector<288x64xbf16>, vector<16x64xf32> -> vector<16x64xf32>
    %c0_23 = arith.constant 0 : index
    %c0_24 = arith.constant 0 : index
    %105 = vector.load %arg7[%c0_23, %c0_24] : memref<1x64xf32, #tpu.memory_space<vmem>>, vector<1x64xf32>
    %106 = vector.broadcast %105 : vector<1x64xf32> to vector<16x64xf32>
    %107 = arith.addf %104, %106 : vector<16x64xf32>
    %cst_25 = arith.constant 0.000000e+00 : f32
    %108 = vector.broadcast %cst_25 : f32 to vector<16x64xf32>
    %109 = arith.maximumf %107, %108 : vector<16x64xf32>
    %110 = vector.shape_cast %109 : vector<16x64xf32> to vector<8x2x64xf32>
    %111 = vector.extract_strided_slice %110 {offsets = [0, 0, 0], sizes = [8, 1, 64], strides = [1, 1, 1]} : vector<8x2x64xf32> to vector<8x1x64xf32>
    %112 = vector.shape_cast %111 : vector<8x1x64xf32> to vector<8x64xf32>
    %113 = vector.extract_strided_slice %110 {offsets = [0, 1, 0], sizes = [8, 1, 64], strides = [1, 1, 1]} : vector<8x2x64xf32> to vector<8x1x64xf32>
    %114 = vector.shape_cast %113 : vector<8x1x64xf32> to vector<8x64xf32>
    %115 = arith.maximumf %112, %114 : vector<8x64xf32>
    %116 = vector.shape_cast %115 : vector<8x64xf32> to vector<2x2x2x64xf32>
    %117 = vector.extract_strided_slice %116 {offsets = [0, 0, 0, 0], sizes = [2, 1, 2, 64], strides = [1, 1, 1, 1]} : vector<2x2x2x64xf32> to vector<2x1x2x64xf32>
    %118 = vector.shape_cast %117 : vector<2x1x2x64xf32> to vector<2x2x64xf32>
    %119 = vector.extract_strided_slice %116 {offsets = [0, 1, 0, 0], sizes = [2, 1, 2, 64], strides = [1, 1, 1, 1]} : vector<2x2x2x64xf32> to vector<2x1x2x64xf32>
    %120 = vector.shape_cast %119 : vector<2x1x2x64xf32> to vector<2x2x64xf32>
    %121 = arith.maximumf %118, %120 : vector<2x2x64xf32>
    %122 = vector.shape_cast %121 : vector<2x2x64xf32> to vector<4x64xf32>
    %cst_26 = arith.constant dense<0.000000e+00> : vector<64xf32>
    %123 = vector.multi_reduction <add>, %122, %cst_26 [0] : vector<4x64xf32> to vector<64xf32>
    %124 = vector.shape_cast %123 : vector<64xf32> to vector<1x64xf32>
    %cst_27 = arith.constant 2.500000e-01 : f32
    %125 = vector.broadcast %cst_27 : f32 to vector<1x64xf32>
    %126 = arith.mulf %124, %125 : vector<1x64xf32>
    %127 = arith.truncf %126 : vector<1x64xf32> to vector<1x64xbf16>
    %c0_28 = arith.constant 0 : index
    %c0_29 = arith.constant 0 : index
    %128 = vector.load %arg8[%c0_28, %c0_29] : memref<64x128xbf16, #tpu.memory_space<vmem>>, vector<64x128xbf16>
    %cst_30 = arith.constant dense<0.000000e+00> : vector<1x128xf32>
    %129 = tpu.matmul %127, %128, %cst_30 {dimension_numbers = #tpu.dot_dimension_numbers<[1], [0], [0], [1], [0, 0, 1, 1], [], []>} : vector<1x64xbf16>, vector<64x128xbf16>, vector<1x128xf32> -> vector<1x128xf32>
    %c0_31 = arith.constant 0 : index
    %c0_32 = arith.constant 0 : index
    %130 = vector.load %arg9[%c0_31, %c0_32] : memref<1x128xf32, #tpu.memory_space<vmem>>, vector<1x128xf32>
    %131 = arith.addf %129, %130 : vector<1x128xf32>
    %cst_33 = arith.constant 0.000000e+00 : f32
    %132 = vector.broadcast %cst_33 : f32 to vector<1x128xf32>
    %133 = arith.maximumf %131, %132 : vector<1x128xf32>
    %134 = arith.truncf %133 : vector<1x128xf32> to vector<1x128xbf16>
    %c0_34 = arith.constant 0 : index
    %c0_35 = arith.constant 0 : index
    %135 = vector.load %arg10[%c0_34, %c0_35] : memref<128x9xbf16, #tpu.memory_space<vmem>>, vector<128x9xbf16>
    %cst_36 = arith.constant dense<0.000000e+00> : vector<1x9xf32>
    %136 = tpu.matmul %134, %135, %cst_36 {dimension_numbers = #tpu.dot_dimension_numbers<[1], [0], [0], [1], [0, 0, 1, 1], [], []>} : vector<1x128xbf16>, vector<128x9xbf16>, vector<1x9xf32> -> vector<1x9xf32>
    %c0_37 = arith.constant 0 : index
    %c0_38 = arith.constant 0 : index
    %137 = vector.load %arg11[%c0_37, %c0_38] : memref<1x9xf32, #tpu.memory_space<vmem>>, vector<1x9xf32>
    %138 = arith.addf %136, %137 : vector<1x9xf32>
    %139 = vector.shape_cast %138 : vector<1x9xf32> to vector<1x1x9xf32>
    %c0_39 = arith.constant 0 : index
    %c0_40 = arith.constant 0 : index
    %c0_41 = arith.constant 0 : index
    %140 = vector.load %arg12[%c0_39, %c0_40, %c0_41] : memref<1x1x9xf32, #tpu.memory_space<vmem>>, vector<1x1x9xf32>
    tpu.vector_store %arg12[%c0_39, %c0_40, %c0_41], %139 {strides = array<i32>} : memref<1x1x9xf32, #tpu.memory_space<vmem>>, vector<1x1x9xf32>,
    return
  }
  func.func @transform_0(%arg0: i32) -> (i32, i32, i32, i32) {
    %c0_i32 = arith.constant 0 : i32
    %c0_i32_0 = arith.constant 0 : i32
    %c0_i32_1 = arith.constant 0 : i32
    %c0_i32_2 = arith.constant 0 : i32
    return %arg0, %c0_i32, %c0_i32_0, %c0_i32_1 : i32, i32, i32, i32
  }
  func.func @transform_1(%arg0: i32) -> (i32, i32) {
    %c0_i32 = arith.constant 0 : i32
    %c0_i32_0 = arith.constant 0 : i32
    %c0_i32_1 = arith.constant 0 : i32
    return %c0_i32, %c0_i32_0 : i32, i32
  }
  func.func @transform_2(%arg0: i32) -> (i32, i32) {
    %c0_i32 = arith.constant 0 : i32
    %c0_i32_0 = arith.constant 0 : i32
    %c0_i32_1 = arith.constant 0 : i32
    return %c0_i32, %c0_i32_0 : i32, i32
  }
  func.func @transform_3(%arg0: i32) -> (i32, i32) {
    %c0_i32 = arith.constant 0 : i32
    %c0_i32_0 = arith.constant 0 : i32
    %c0_i32_1 = arith.constant 0 : i32
    return %c0_i32, %c0_i32_0 : i32, i32
  }
  func.func @transform_4(%arg0: i32) -> (i32, i32) {
    %c0_i32 = arith.constant 0 : i32
    %c0_i32_0 = arith.constant 0 : i32
    %c0_i32_1 = arith.constant 0 : i32
    return %c0_i32, %c0_i32_0 : i32, i32
  }
  func.func @transform_5(%arg0: i32) -> (i32, i32) {
    %c0_i32 = arith.constant 0 : i32
    %c0_i32_0 = arith.constant 0 : i32
    %c0_i32_1 = arith.constant 0 : i32
    return %c0_i32, %c0_i32_0 : i32, i32
  }
  func.func @transform_6(%arg0: i32) -> (i32, i32) {
    %c0_i32 = arith.constant 0 : i32
    %c0_i32_0 = arith.constant 0 : i32
    %c0_i32_1 = arith.constant 0 : i32
    return %c0_i32, %c0_i32_0 : i32, i32
  }
  func.func @transform_7(%arg0: i32) -> (i32, i32) {
    %c0_i32 = arith.constant 0 : i32
    %c0_i32_0 = arith.constant 0 : i32
    %c0_i32_1 = arith.constant 0 : i32
    return %c0_i32, %c0_i32_0 : i32, i32
  }
  func.func @transform_8(%arg0: i32) -> (i32, i32) {
    %c0_i32 = arith.constant 0 : i32
    %c0_i32_0 = arith.constant 0 : i32
    %c0_i32_1 = arith.constant 0 : i32
    return %c0_i32, %c0_i32_0 : i32, i32
  }
  func.func @transform_9(%arg0: i32) -> (i32, i32) {
    %c0_i32 = arith.constant 0 : i32
    %c0_i32_0 = arith.constant 0 : i32
    %c0_i32_1 = arith.constant 0 : i32
    return %c0_i32, %c0_i32_0 : i32, i32
  }
  func.func @transform_10(%arg0: i32) -> (i32, i32) {
    %c0_i32 = arith.constant 0 : i32
    %c0_i32_0 = arith.constant 0 : i32
    %c0_i32_1 = arith.constant 0 : i32
    return %c0_i32, %c0_i32_0 : i32, i32
  }
  func.func @transform_11(%arg0: i32) -> (i32, i32, i32) {
    %c0_i32 = arith.constant 0 : i32
    %c0_i32_0 = arith.constant 0 : i32
    %c0_i32_1 = arith.constant 0 : i32
    return %arg0, %c0_i32, %c0_i32_0 : i32, i32, i32
  }
}

</mosaic_0001>

<bundles_post_ra>
// kernel: basic_cnn_forward.1
= control target key start
LH: loop header
LB: loop body
LE: loop exit
PB: predicated region body
PF: predicated region fallthrough
CT: control target
= control target key end

     0   :  { %s5570_s17 = smov 0   ;;  %s7773_s0 = inlined_call_operand.vmem [shape: f32[2,16,16,3], index: 0, kind: input, shape index: {}]   ;;  %s7774_s1 = inlined_call_operand.vmem [shape: bf16[27,16], index: 1, kind: input, shape index: {}]   ;;  %s7775_s2 = inlined_call_operand.vmem [shape: f32[1,16], index: 2, kind: input, shape index: {}]   ;;  %s7776_s3 = inlined_call_operand.vmem [shape: bf16[144,32], index: 3, kind: input, shape index: {}]   ;;  %s7777_s4 = inlined_call_operand.vmem [shape: f32[1,32], index: 4, kind: input, shape index: {}]   ;;  %s7778_s5 = inlined_call_operand.vmem [shape: bf16[288,64], index: 5, kind: input, shape index: {}]   ;;  %s7779_s6 = inlined_call_operand.vmem [shape: f32[1,64], index: 6, kind: input, shape index: {}]   ;;  %s7780_s7 = inlined_call_operand.vmem [shape: bf16[64,128], index: 7, kind: input, shape index: {}]   ;;  %s7781_s8 = inlined_call_operand.vmem [shape: f32[1,128], index: 8, kind: input, shape index: {}]   ;;  %s7782_s9 = inlined_call_operand.vmem [shape: bf16[128,9], index: 9, kind: input, shape index: {}]   ;;  %s7783_s10 = inlined_call_operand.vmem [shape: f32[1,9], index: 10, kind: input, shape index: {}]   ;;  %s7784_s11 = inlined_call_operand.vmem [shape: f32[2,1,9], index: 11, kind: output, shape index: {}]  }
   0x1 LB: > { %s4291_s18 = sadd.s32 4294967295, %s5491_s17   ;;  %p4295_p0 = scmp.ge.s32.totalorder %s5491_s17, 1  ;;  %s5491_s17 = sphi %s5570_s17, %s21_s17  }
   0x2   : > { %p337_p1 = scmp.lt.s32.totalorder %s5491_s17, 3 }
   0x4   : > { %p338_p2 = pnand %p4295_p0, %p337_p1 }
   0x6   : > { %341 = sbr.rel (%p338_p2) target bundleno = 1526 (0x5f6), region = 64 }
   0xb   : > { %p375_p3 = scmp.lt.s32.totalorder %s4291_s18, 1  ;;  %v7785_v0 = vmov 0.0   ;;  %vm7812_vm0 = vcmask 1046528   ;;  %vm7809_vm1 = vcmask 1040384   ;;  %s5494_s23 = smov 12   ;;  %vm1757_vm2 = vcmask 1044480  }
   0xc   : > { %3830 = vst [vmem:[#allocation1 + $0x31] ss:$2 sm:$0xff] %v7785_v0  ;;  %s5495_s24 = smov 3   ;;  %s5496_s25 = smov 15   ;;  %vm1758_vm3 = vcmask 1045504   ;;  %vm7810_vm4 = vcmask 23552  }
   0xd   : > { %s7930_s18 = smov (!%p375_p3, %s4291_s18), 1  ;;  %s5497_s26 = smov 6   ;;  %vm1443_vm5 = vcmask 48128   ;;  %vm1475_vm6 = vcmask 72704   ;;  %vm1508_vm7 = vcmask 97280   ;;  %vm1541_vm8 = vcmask 121856  }
   0xe   : > { %s4654_s19 = sshll.u32 %s7930_s18, 8  ;;  %s5498_s27 = smov 9   ;;  %vm1574_vm9 = vcmask 146432   ;;  %vm1607_vm10 = vcmask 171008   ;;  %vm1640_vm11 = vcmask 195584   ;;  %vm7811_vm12 = vcmask 220160  }
   0xf   : > { %s5585_s22 = scalar_lea.vmem %s7773_s0, %s4654_s19  ;;  %s5499_s28 = smov 18   ;;  %vm2883_vm13 = vcmask 1041409   ;;  %vm7816_vm14 = vcmask 1042434   ;;  %vm2799_vm15 = vcmask 1043459  }
  0x10   : > { %v384_v1 = vld [vmem:[%s5585_s22] sm:$0xff]  ;;  %v385_v2 = vld [vmem:[%s5585_s22 + $0x8] sm:$0xff]  ;;  %v386_v3 = vld [vmem:[%s5585_s22 + $0x10] sm:$0xff]  ;;  %s5500_s29 = smov 21   ;;  %s5501_s30 = smov 24  }
  0x11   : > { %v4730_v4 = vpack.i.bf16 %v385_v2, %v384_v1  ;;  %v4725_v5 = vpack.i.bf16 %v384_v1, %v7785_v0  ;;  %v5592_v6 = vld [vmem:[%s5585_s22 + $0x18] sm:$0xff]  ;;  %v546_v7 = vrot.slane %v385_v2, 1  ;;  %v545_v8 = vrot.slane %v384_v1, 1  ;;  %v388_v30 = vld [vmem:[%s5585_s22 + $0x20] sm:$0xff]  ;;  %v389_v31 = vld [vmem:[%s5585_s22 + $0x28] sm:$0xff] }
  0x12   : > { %v449_v9 = vrot.slane %v384_v1, 7  ;;  %v450_v10 = vrot.slane %v385_v2, 7  ;;  %v452_v12 = vrot.slane %v386_v3, 7  ;;  %v453_v16 = vrot.slane %v5592_v6, 7  ;;  %v390_v46 = vld [vmem:[%s5585_s22 + $0x30] sm:$0xff]  ;;  %v391_v47 = vld [vmem:[%s5585_s22 + $0x38] sm:$0xff] }
  0x13   : > { %4731 = vrot.lane.b32.xlu1 %v4730_v4, %s5494_s23  ;;  %4726 = vrot.lane.b32.xlu0 %v4725_v5, %s5495_s24  ;;  %v609_v11 = vsel %vm7812_vm0, %v546_v7, 0.0  ;;  %v547_v13 = vsel %vm7812_vm0, %v545_v8, %v546_v7  ;;  %v548_v20 = vrot.slane %v386_v3, 1  ;;  %v549_v21 = vrot.slane %v5592_v6, 1  ;;  %v392_v61 = vld [vmem:[%s5585_s22 + $0x40] sm:$0xff]  ;;  %v393_v62 = vld [vmem:[%s5585_s22 + $0x48] sm:$0xff] }
  0x14   : > { %v5599_v14 = vsel %vm7809_vm1, %v449_v9, %v450_v10  ;;  %v5602_v15 = vsel %vm7809_vm1, 0.0, %v449_v9  ;;  %v4750_v17 = vpack.i.bf16 %v609_v11, %v547_v13  ;;  %v4735_v18 = vpack.i.bf16 %v547_v13, %v7785_v0  ;;  %v5689_v13 = vld [vmem:[%s5585_s22 + $0x58] sm:$0xff] }
  0x15   : > { %v4745_v19 = vpack.i.bf16 %v5599_v14, %v5602_v15  ;;  %v5611_v22 = vsel %vm7809_vm1, %v452_v12, %v453_v16  ;;  %v5614_v23 = vsel %vm7809_vm1, 0.0, %v452_v12  ;;  %v550_v25 = vsel %vm7812_vm0, %v548_v20, %v549_v21  ;;  %v394_v12 = vld [vmem:[%s5585_s22 + $0x50] sm:$0xff] }
  0x16   : > { %4751 = vrot.lane.b32.xlu2 %v4750_v17, %s5496_s25  ;;  %v4755_v24 = vpack.i.bf16 %v5611_v22, %v5614_v23  ;;  %v610_v26 = vsel %vm7812_vm0, %v549_v21, 0.0  ;;  %v4740_v27 = vpack.i.bf16 %v5592_v6, %v386_v3  ;;  %v4765_v29 = vpack.i.bf16 %v386_v3, %v385_v2 }
  0x17   : > { %v4760_v28 = vpack.i.bf16 %v610_v26, %v550_v25  ;;  %v4770_v32 = vpack.i.bf16 %v550_v25, %v609_v11  ;;  %v455_v33 = vrot.slane %v388_v30, 7  ;;  %v456_v34 = vrot.slane %v389_v31, 7 }
  0x18   : > { %v551_v38 = vrot.slane %v388_v30, 1  ;;  %v552_v39 = vrot.slane %v389_v31, 1  ;;  %v4795_v40 = vpack.i.bf16 %v389_v31, %v388_v30  ;;  %v4805_v44 = vpack.i.bf16 %v388_v30, %v5592_v6 }
  0x19   : > { %v5632_v35 = vsel %vm7809_vm1, %v455_v33, %v456_v34  ;;  %v5635_v36 = vsel %vm7809_vm1, 0.0, %v455_v33  ;;  %v458_v48 = vrot.slane %v390_v46, 7  ;;  %v459_v49 = vrot.slane %v391_v47, 7 }
  0x1a   : > { %v4790_v37 = vpack.i.bf16 %v5632_v35, %v5635_v36  ;;  %v553_v41 = vsel %vm7812_vm0, %v551_v38, %v552_v39  ;;  %v611_v42 = vsel %vm7812_vm0, %v552_v39, 0.0  ;;  %v554_v52 = vrot.slane %v390_v46, 1 }
  0x1b   : > { %4736 = vrot.lane.b32.xlu0 %v4735_v18, %s5497_s26  ;;  %4746 = vrot.lane.b32.xlu1 %v4745_v19, %s5498_s27  ;;  %v4800_v43 = vpack.i.bf16 %v611_v42, %v553_v41  ;;  %v4810_v45 = vpack.i.bf16 %v553_v41, %v610_v26  ;;  %v5654_v50 = vsel %vm7809_vm1, %v458_v48, %v459_v49  ;;  %v5657_v51 = vsel %vm7809_vm1, 0.0, %v458_v48  ;;  %v4655_v41 = vld [vmem:[%s7774_s1] sm:$0xff] }
  0x1c   : > { %v555_v53 = vrot.slane %v391_v47, 1  ;;  %v4830_v54 = vpack.i.bf16 %v5654_v50, %v5657_v51  ;;  %v4835_v55 = vpack.i.bf16 %v391_v47, %v390_v46  ;;  %v4845_v59 = vpack.i.bf16 %v390_v46, %v389_v31 }
  0x1d   : > { %v461_v63 = vrot.slane %v392_v61, 7  ;;  %v462_v1 = vrot.slane %v393_v62, 7  ;;  %v557_v4 = vrot.slane %v392_v61, 1  ;;  %v558_v5 = vrot.slane %v393_v62, 1 }
  0x1e   : > { %4756 = vrot.lane.b32.xlu2 %v4755_v24, %s5499_s28  ;;  %v556_v56 = vsel %vm7812_vm0, %v554_v52, %v555_v53  ;;  %v612_v57 = vsel %vm7812_vm0, %v555_v53, 0.0  ;;  %v4875_v9 = vpack.i.bf16 %v393_v62, %v392_v61  ;;  %v4885_v11 = vpack.i.bf16 %v392_v61, %v391_v47 }
  0x1f   : > { %v4840_v58 = vpack.i.bf16 %v612_v57, %v556_v56  ;;  %v4850_v60 = vpack.i.bf16 %v556_v56, %v611_v42  ;;  %v5673_v2 = vsel %vm7809_vm1, %v461_v63, %v462_v1  ;;  %v5676_v3 = vsel %vm7809_vm1, 0.0, %v461_v63 }
  0x20   : > { %v4870_v6 = vpack.i.bf16 %v5673_v2, %v5676_v3  ;;  %v559_v7 = vsel %vm7812_vm0, %v557_v4, %v558_v5  ;;  %v613_v8 = vsel %vm7812_vm0, %v558_v5, 0.0  ;;  %v464_v17 = vrot.slane %v394_v12, 7 }
  0x21   : > { %v4880_v10 = vpack.i.bf16 %v613_v8, %v559_v7  ;;  %v4890_v16 = vpack.i.bf16 %v559_v7, %v612_v57  ;;  %v465_v18 = vrot.slane %v5689_v13, 7  ;;  %v561_v25 = vrot.slane %v5689_v13, 1  ;;  %v5753_v57 = vld [vmem:[%s5585_s22 + $0x80] sm:$0xff] }
  0x22   : > { %v5699_v20 = vsel %vm7809_vm1, 0.0, %v464_v17  ;;  %v5502_v31 = vmov 65535   ;;  %v569_v63 = vrot.slane %v5753_v57, 1 }
  0x23   : > { %4741 = vrot.lane.b32.xlu0 %v4740_v27, %s5500_s29  ;;  %4761 = vrot.lane.b32.xlu1 %v4760_v28, %s5501_s30  ;;  %v5696_v19 = vsel %vm7809_vm1, %v464_v17, %v465_v18  ;;  %v5718_v34 = vsel %vm7812_vm0, %v561_v25, 0.0  ;;  %v4965_v17 = vpack.i.bf16 %v5753_v57, %v5689_v13 }
  0x24   : > { %7817 = vst [vmem:[#allocation2_spill] sm:$0xff] %v5696_v19  ;;  %v4910_v21 = vpack.i.bf16 %v5696_v19, %v5699_v20 }
  0x26   : > { %4766 = vrot.lane.b32.xlu2 %v4765_v29, %s5495_s24  ;;  %v4915_v29 = vpack.i.bf16 %v5689_v13, %v394_v12 }
  0x2b   : > { %4771 = vrot.lane.b32.xlu0 %v4770_v32, %s5497_s26  ;;  %4776 = vrot.lane.b32.xlu1 %v4755_v24, %s5498_s27  ;;  %v560_v24 = vrot.slane %v394_v12, 1  ;;  %v1759_v32 = vsel %vm1757_vm2, 4294967295, %v5502_v31  ;;  %v5804_v31 = vld [vmem:[%s5585_s22 + $0x78] sm:$0xff]  ;;  %vm2801_vm2 = vcmask 1044484  }
  0x2d   : > { %v562_v33 = vsel %vm7812_vm0, %v560_v24, %v561_v25 }
  0x2e   : > { %4781 = vrot.lane.b32.xlu2 %v4740_v27, %s5494_s23  ;;  %v4304_v27 = vld [vmem:[%s7774_s1 + $0x8] sm:$0xf]  ;;  %v4920_v39 = vpack.i.bf16 %v5718_v34, %v562_v33 }
  0x33   : > { %4786 = vrot.lane.b32.xlu0 %v4760_v28, %s5496_s25  ;;  %4791 = vrot.lane.b32.xlu1 %v4790_v37, %s5499_s28  ;;  %v4656_v28 = vld [vmem:[%s7774_s1 + $0x8] sm:$0x30] }
  0x34   : > { %v4305_v30 = vor.u32 %v4656_v28, %v4304_v27 }
  0x36   : > { %4796 = vrot.lane.b32.xlu2 %v4795_v40, %s5500_s29 }
  0x3b   : > { %4801 = vrot.lane.b32.xlu0 %v4800_v43, %s5501_s30  ;;  %4806 = vrot.lane.b32.xlu1 %v4805_v44, %s5495_s24  ;;  %v5730_v44 = vld [vmem:[%s5585_s22 + $0x60] sm:$0xff] }
  0x3c   : > { %v467_v46 = vrot.slane %v5730_v44, 7  ;;  %v563_v53 = vrot.slane %v5730_v44, 1 }
  0x3e   : > { %4811 = vrot.lane.b32.xlu2 %v4810_v45, %s5497_s26  ;;  %v5733_v45 = vld [vmem:[%s5585_s22 + $0x68] sm:$0xff]  ;;  %v5746_v52 = vsel %vm7809_vm1, 0.0, %v467_v46 }
  0x3f   : > { %v468_v47 = vrot.slane %v5733_v45, 7  ;;  %7819 = vst [vmem:[#allocation4_spill] sm:$0xff] %v5746_v52 }
  0x41   : > { %v5743_v49 = vsel %vm7809_vm1, %v467_v46, %v468_v47 }
  0x42   : > { %7818 = vst [vmem:[#allocation3_spill] sm:$0xff] %v5743_v49 }
  0x43   : > { %4816 = vrot.lane.b32.xlu0 %v4790_v37, %s5498_s27  ;;  %4821 = vrot.lane.b32.xlu1 %v4795_v40, %s5494_s23  ;;  %v1760_v37 = vsel %vm1758_vm3, %v1759_v32, 0  ;;  %v4925_v40 = vpack.i.bf16 %v394_v12, %v393_v62  ;;  %vm2803_vm3 = vcmask 1045509  }
  0x44   : > { %v1762_v38 = vand.u32 %v4305_v30, %v1760_v37  ;;  %v5801_v30 = vld [vmem:[%s5585_s22 + $0x70] sm:$0xff] }
  0x46   : > { %4826 = vrot.lane.b32.xlu2 %v4800_v43, %s5496_s25  ;;  %1770 = vmatpush.bf16.msra.mxu0 %v1762_v38  ;;  %v4930_v43 = vpack.i.bf16 %v562_v33, %v613_v8 }
  0x47   : > { %4696 = vmatpush.bf16.msra.mxu2 %v1762_v38  ;;  %4697 = vmatpush.bf16.msra.mxu3 %v1762_v38 }
  0x4a   : > { %1771 = vmatpush.bf16.msra.mxu0 %v4655_v41 }
  0x4b   : > { %4831 = vrot.lane.b32.xlu0 %v4830_v54, %s5499_s28  ;;  %4836 = vrot.lane.b32.xlu1 %v4835_v55, %s5500_s29 }
  0x4c   : > { %4698 = vmatpush.bf16.msra.mxu2 %v4655_v41  ;;  %4699 = vmatpush.bf16.msra.mxu3 %v4655_v41  ;;  %v470_v41 = vrot.slane %v5801_v30, 7 }
  0x4e   : > { %4841 = vrot.lane.b32.xlu2 %v4840_v58, %s5501_s30 }
  0x53   : > { %4846 = vrot.lane.b32.xlu0 %v4845_v59, %s5495_s24  ;;  %4851 = vrot.lane.b32.xlu1 %v4850_v60, %s5497_s26  ;;  %v4950_v59 = vpack.i.bf16 %v5743_v49, %v5746_v52  ;;  %v5763_v60 = vpack.i.bf16 %v5733_v45, %v5730_v44 }
  0x56   : > { %4856 = vrot.lane.b32.xlu2 %v4830_v54, %s5498_s27  ;;  %v564_v54 = vrot.slane %v5733_v45, 1 }
  0x58   : > { %v5766_v61 = vsel %vm7812_vm0, %v563_v53, %v564_v54  ;;  %v5769_v62 = vsel %vm7812_vm0, %v564_v54, 0.0 }
  0x5b   : > { %4861 = vrot.lane.b32.xlu0 %v4835_v55, %s5494_s23  ;;  %4866 = vrot.lane.b32.xlu1 %v4840_v58, %s5496_s25  ;;  %v5756_v58 = vld [vmem:[%s5585_s22 + $0x88] sm:$0xff] }
  0x5c   : > { %v570_v1 = vrot.slane %v5756_v58, 1 }
  0x5e   : > { %4871 = vrot.lane.b32.xlu2 %v4870_v6, %s5499_s28  ;;  %v5784_v7 = vsel %vm7812_vm0, %v569_v63, %v570_v1 }
  0x5f   : > { %v4970_v18 = vpack.i.bf16 %v5784_v7, %v5718_v34 }
  0x63   : > { %4876 = vrot.lane.b32.xlu0 %v4875_v9, %s5500_s29  ;;  %4881 = vrot.lane.b32.xlu1 %v4880_v10, %s5501_s30 }
  0x66   : > { %4886 = vrot.lane.b32.xlu2 %v4885_v11, %s5495_s24 }
  0x6b   : > { %4891 = vrot.lane.b32.xlu0 %v4890_v16, %s5497_s26  ;;  %4896 = vrot.lane.b32.xlu1 %v4870_v6, %s5498_s27  ;;  %v4960_v6 = vpack.i.bf16 %v5769_v62, %v5766_v61 }
  0x6e   : > { %4901 = vrot.lane.b32.xlu2 %v4875_v9, %s5494_s23 }
  0x70   : > { %v5705_v26 = vpop.permute.xlu2 %4751 }
  0x71   : > { %v4754_v13 = vunpack.i.h.bf16 %v5705_v26  ;;  %v4753_v32 = vunpack.i.l.bf16 %v5705_v26  ;;  %v471_v26 = vrot.slane %v5804_v31, 7 }
  0x73   : > { %4906 = vrot.lane.b32.xlu0 %v4880_v10, %s5496_s25  ;;  %4911 = vrot.lane.b32.xlu1 %v4910_v21, %s5499_s28 }
  0x76   : > { %4916 = vrot.lane.b32.xlu2 %v4915_v29, %s5500_s29 }
  0x78   : > { %v5725_v42 = vpop.permute.xlu2 %4756 }
  0x79   : > { %v4759_v37 = vunpack.i.h.bf16 %v5725_v42  ;;  %v4758_v38 = vunpack.i.l.bf16 %v5725_v42 }
  0x7b   : > { %4921 = vrot.lane.b32.xlu0 %v4920_v39, %s5501_s30  ;;  %4926 = vrot.lane.b32.xlu1 %v4925_v40, %s5495_s24 }
  0x7e   : > { %4931 = vrot.lane.b32.xlu2 %v4930_v43, %s5497_s26 }
  0x80   : > { %v5738_v48 = vpop.permute.xlu2 %4766 }
  0x83   : > { %4936 = vrot.lane.b32.xlu0 %v4910_v21, %s5498_s27  ;;  %4941 = vrot.lane.b32.xlu1 %v4915_v29, %s5494_s23 }
  0x85   : > { %v4732_v55 = vpop.permute.xlu1 %4731  ;;  %v5750_v56 = vpop.permute.xlu0 %4726 }
  0x86   : > { %4946 = vrot.lane.b32.xlu2 %v4920_v39, %s5496_s25  ;;  %v4728_v5 = vunpack.i.l.bf16 %v5750_v56  ;;  %v4734_v21 = vunpack.i.h.bf16 %v4732_v55  ;;  %v4733_v24 = vunpack.i.l.bf16 %v4732_v55 }
  0x88   : > { %v5773_v4 = vpop.permute.xlu2 %4781  ;;  %v1412_v16 = vsel %vm7810_vm4, 0.0, %v4728_v5 }
  0x8b   : > { %4951 = vrot.lane.b32.xlu0 %v4950_v59, %s5499_s28  ;;  %4956 = vrot.lane.b32.xlu1 %v5763_v60, %s5500_s29 }
  0x8d   : > { %v5786_v8 = vpop.permute.xlu0 %4736  ;;  %v4747_v9 = vpop.permute.xlu1 %4746 }
  0x8e   : > { %v4738_v10 = vunpack.i.l.bf16 %v5786_v8  ;;  %v4749_v11 = vunpack.i.h.bf16 %v4747_v9  ;;  %v4748_v12 = vunpack.i.l.bf16 %v4747_v9  ;;  %4961 = vrot.lane.b32.xlu2 %v4960_v6, %s5501_s30 }
  0x90   : > { %v1444_v25 = vsel %vm1443_vm5, %v1412_v16, %v4738_v10  ;;  %v5798_v29 = vpop.permute.xlu2 %4796  ;;  %v5824_v10 = vsel %vm7809_vm1, %v470_v41, %v471_v26 }
  0x91   : > { %v1477_v27 = vsel %vm1475_vm6, %v1444_v25, %v4749_v11  ;;  %v1476_v28 = vsel %vm1475_vm6, %v1444_v25, %v4748_v12  ;;  %7820 = vst [vmem:[#allocation5_spill] sm:$0xff] %v5824_v10  ;;  %v5827_v11 = vsel %vm7809_vm1, 0.0, %v470_v41 }
  0x92   : > { %v1510_v33 = vsel %vm1508_vm7, %v1477_v27, %v4734_v21  ;;  %v1509_v34 = vsel %vm1508_vm7, %v1476_v28, %v4733_v24  ;;  %7821 = vst [vmem:[#allocation6_spill] sm:$0xff] %v5827_v11  ;;  %v5839_v21 = vpack.i.bf16 %v5824_v10, %v5827_v11  ;;  %v5842_v24 = vld [vmem:[%s5585_s22 + $0xb0] sm:$0xff]  ;;  %v5849_v28 = vpack.i.bf16 %v5804_v31, %v5801_v30 }
  0x93   : > { %4966 = vrot.lane.b32.xlu0 %v4965_v17, %s5495_s24  ;;  %4971 = vrot.lane.b32.xlu1 %v4970_v18, %s5497_s26  ;;  %v1542_v39 = vsel %vm1541_vm8, %v1509_v34, %v4753_v32  ;;  %v1543_v40 = vsel %vm1541_vm8, %v1510_v33, %v4754_v13  ;;  %v4768_v18 = vunpack.i.l.bf16 %v5738_v48  ;;  %v566_v32 = vrot.slane %v5801_v30, 1 }
  0x94   : > { %v1575_v55 = vsel %vm1574_vm9, %v1542_v39, %v4758_v38  ;;  %v1576_v63 = vsel %vm1574_vm9, %v1543_v40, %v4759_v37  ;;  %v567_v33 = vrot.slane %v5804_v31, 1  ;;  %v4729_v37 = vunpack.i.h.bf16 %v5750_v56 }
  0x95   : > { %v4742_v43 = vpop.permute.xlu0 %4741  ;;  %v4762_v46 = vpop.permute.xlu1 %4761  ;;  %v1414_v34 = vsel %vm7810_vm4, %v5599_v14, %v4768_v18  ;;  %v578_v38 = vrot.slane %v5842_v24, 1  ;;  %v4739_v40 = vunpack.i.h.bf16 %v5786_v8 }
  0x96   : > { %v4744_v47 = vunpack.i.h.bf16 %v4742_v43  ;;  %v4743_v53 = vunpack.i.l.bf16 %v4742_v43  ;;  %v4764_v42 = vunpack.i.h.bf16 %v4762_v46  ;;  %v4763_v54 = vunpack.i.l.bf16 %v4762_v46  ;;  %4976 = vrot.lane.b32.xlu2 %v4950_v59, %s5498_s27 }
  0x97   : > { %v5871_v56 = vsel %vm7812_vm0, %v566_v32, %v567_v33  ;;  %v5874_v46 = vsel %vm7812_vm0, %v567_v33, 0.0 }
  0x98   : > { %v1608_v5 = vsel %vm1607_vm10, %v1575_v55, %v4743_v53  ;;  %v1609_v9 = vsel %vm1607_vm10, %v1576_v63, %v4744_v47  ;;  %v5829_v12 = vpop.permute.xlu2 %4811  ;;  %v1413_v47 = vsel %vm7810_vm4, %v5602_v15, %v4729_v37  ;;  %v4784_v15 = vunpack.i.h.bf16 %v5773_v4 }
  0x99   : > { %v1641_v59 = vsel %vm1640_vm11, %v1608_v5, %v4763_v54  ;;  %v1642_v16 = vsel %vm1640_vm11, %v1609_v9, %v4764_v42  ;;  %v5889_v42 = vsel %vm7812_vm0, %v570_v1, 0.0  ;;  %v5892_v54 = vld [vmem:[%s5585_s22 + $0x90] sm:$0xff]  ;;  %v4783_v55 = vunpack.i.l.bf16 %v5773_v4  ;;  %v5898_v5 = vld [vmem:[%s5585_s22 + $0x98] sm:$0xff]  ;;  %v5901_v9 = vld [vmem:[%s5585_s22 + $0xc0] sm:$0xff] }
  0x9a   : > { %v1673_v17 = vpack.c.bf16 %v1642_v16, %v1641_v59  ;;  %v1445_v63 = vsel %vm1443_vm5, %v1413_v47, %v4739_v40  ;;  %v5910_v18 = vpack.i.bf16 %v5874_v46, %v5871_v56  ;;  %v476_v32 = vrot.slane %v5892_v54, 7 }
  0x9b   : > { %4981 = vrot.lane.b32.xlu0 %v5763_v60, %s5494_s23  ;;  %4986 = vrot.lane.b32.xlu1 %v4960_v6, %s5496_s25  ;;  %v5000_v60 = vpack.i.bf16 %v5842_v24, %v5756_v58  ;;  %v5855_v6 = vld [vmem:[%s5585_s22 + $0xb8] sm:$0xff]  ;;  %v477_v33 = vrot.slane %v5898_v5, 7 }
  0x9c   : > { %4306 = vmatmul.msk.bf16.vlgmr.msra.gmra.mxu0 %vm7811_vm12, %v1673_v17  ;;  %v579_v39 = vrot.slane %v5855_v6, 1  ;;  %v5005_v8 = vpack.i.bf16 %v5730_v44, %v5855_v6  ;;  %v5904_v44 = vld [vmem:[%s5585_s22 + $0xc8] sm:$0xff] }
  0x9d   : > { %v5845_v25 = vpop.permute.xlu0 %4771  ;;  %v4777_v27 = vpop.permute.xlu1 %4776  ;;  %v486_v37 = vrot.slane %v5904_v44, 7 }
  0x9e   : > { %v4773_v13 = vunpack.i.l.bf16 %v5845_v25  ;;  %4991 = vrot.lane.b32.xlu2 %v5839_v21, %s5499_s28  ;;  %v4779_v41 = vunpack.i.h.bf16 %v4777_v27  ;;  %v4778_v26 = vunpack.i.l.bf16 %v4777_v27  ;;  %v5884_v53 = vsel %vm7812_vm0, %v578_v38, %v579_v39 }
  0xa0   : > { %v5867_v43 = vpop.permute.xlu2 %4826  ;;  %v1446_v14 = vsel %vm1443_vm5, %v1414_v34, %v4773_v13  ;;  %v1478_v59 = vsel %vm1475_vm6, %v1445_v63, %v4778_v26  ;;  %v5015_v13 = vpack.i.bf16 %v5884_v53, %v5889_v42  ;;  %v485_v34 = vrot.slane %v5901_v9, 7 }
  0xa1   : > { %v1479_v16 = vsel %vm1475_vm6, %v1446_v14, %v4779_v41  ;;  %v1511_v38 = vsel %vm1508_vm7, %v1478_v59, %v4783_v55  ;;  %v4799_v63 = vunpack.i.h.bf16 %v5798_v29  ;;  %v5939_v55 = vsel %vm7809_vm1, 0.0, %v476_v32 }
  0xa2   : > { %v1512_v40 = vsel %vm1508_vm7, %v1479_v16, %v4784_v15  ;;  %v5936_v15 = vsel %vm7809_vm1, %v476_v32, %v477_v33  ;;  %7823 = vst [vmem:[#allocation8_spill] sm:$0xff] %v5939_v55  ;;  %v572_v33 = vrot.slane %v5892_v54, 1  ;;  %v573_v32 = vrot.slane %v5898_v5, 1 }
  0xa3   : > { %4996 = vrot.lane.b32.xlu0 %v5849_v28, %s5500_s29  ;;  %5001 = vrot.lane.b32.xlu1 %v5000_v60, %s5495_s24  ;;  %v5915_v60 = vsel %vm7812_vm0, %v579_v39, 0.0  ;;  %7822 = vst [vmem:[#allocation7_spill] sm:$0xff] %v5936_v15  ;;  %v4829_v52 = vunpack.i.h.bf16 %v5867_v43 }
  0xa4   : > { %v5971_v0 = vsel %vm7812_vm0, %v572_v33, %v573_v32  ;;  %v5992_v33 = vld [vmem:[%s5585_s22 + $0xa0] sm:$0xff] }
  0xa5   : > { %v4787_v1 = vpop.permute.xlu0 %4786  ;;  %v4792_v17 = vpop.permute.xlu1 %4791 }
  0xa6   : > { %v4789_v27 = vunpack.i.h.bf16 %v4787_v1  ;;  %v4788_v4 = vunpack.i.l.bf16 %v4787_v1  ;;  %5006 = vrot.lane.b32.xlu2 %v5005_v8, %s5495_s24  ;;  %v4794_v41 = vunpack.i.h.bf16 %v4792_v17  ;;  %v4793_v26 = vunpack.i.l.bf16 %v4792_v17 }
  0xa7   : > { %v5020_v8 = vpack.i.bf16 %v5766_v61, %v5915_v60  ;;  %v4798_v1 = vunpack.i.l.bf16 %v5798_v29  ;;  %v5944_v61 = vsel %vm7809_vm1, %v485_v34, %v486_v37  ;;  %v5947_v29 = vsel %vm7809_vm1, 0.0, %v485_v34 }
  0xa8   : > { %v1544_v14 = vsel %vm1541_vm8, %v1511_v38, %v4788_v4  ;;  %v1545_v39 = vsel %vm1541_vm8, %v1512_v40, %v4789_v27  ;;  %v5926_v47 = vpop.permute.xlu2 %4841  ;;  %7824 = vst [vmem:[#allocation9_spill] sm:$0xff] %v5944_v61  ;;  %v5956_v38 = vpack.i.bf16 %v5936_v15, %v5939_v55  ;;  %v5960_v37 = vpack.i.bf16 %v5944_v61, %v5947_v29 }
  0xa9   : > { %v1577_v59 = vsel %vm1574_vm9, %v1544_v14, %v4793_v26  ;;  %v1578_v16 = vsel %vm1574_vm9, %v1545_v39, %v4794_v41  ;;  %7825 = vst [vmem:[#allocation10_spill] sm:$0xff] %v5947_v29  ;;  %v4769_v41 = vunpack.i.h.bf16 %v5738_v48  ;;  %v581_v48 = vrot.slane %v5901_v9, 1 }
  0xaa   : > { %7826 = vst [vmem:[#allocation11_spill] sm:$0xff] %v5956_v38  ;;  %v1610_v34 = vsel %vm1607_vm10, %v1577_v59, %v4798_v1  ;;  %v1611_v40 = vsel %vm1607_vm10, %v1578_v16, %v4799_v63  ;;  %v5974_v1 = vsel %vm7812_vm0, %v573_v32, 0.0  ;;  %v582_v63 = vrot.slane %v5904_v44, 1  ;;  %v5998_v32 = vld [vmem:[%s5585_s22 + $0xd0] sm:$0xff] }
  0xab   : > { %5011 = vrot.lane.b32.xlu0 %v5910_v18, %s5501_s30  ;;  %5016 = vrot.lane.b32.xlu1 %v5015_v13, %s5497_s26  ;;  %7827 = vst [vmem:[#allocation12_spill] sm:$0xff] %v5960_v37  ;;  %v4774_v59 = vunpack.i.h.bf16 %v5845_v25  ;;  %v5985_v16 = vpack.i.bf16 %v5898_v5, %v5892_v54  ;;  %v5995_v25 = vld [vmem:[%s5585_s22 + $0xa8] sm:$0xff]  ;;  %v488_v61 = vrot.slane %v5998_v32, 7 }
  0xac   : > { %v6014_v15 = vsel %vm7812_vm0, %v581_v48, %v582_v63  ;;  %v6017_v29 = vsel %vm7812_vm0, %v582_v63, 0.0  ;;  %v480_v55 = vrot.slane %v5995_v25, 7 }
  0xad   : > { %v4802_v17 = vpop.permute.xlu0 %4801  ;;  %v5949_v27 = vpop.permute.xlu1 %4806  ;;  %7828 = vst [vmem:[#allocation13_spill] sm:$0xff] %v5985_v16 }
  0xae   : > { %v4804_v4 = vunpack.i.h.bf16 %v4802_v17  ;;  %v4803_v13 = vunpack.i.l.bf16 %v4802_v17  ;;  %5021 = vrot.lane.b32.xlu2 %v5020_v8, %s5497_s26  ;;  %v4808_v39 = vunpack.i.l.bf16 %v5949_v27 }
  0xb0   : > { %v1643_v26 = vsel %vm1640_vm11, %v1610_v34, %v4803_v13  ;;  %v1644_v14 = vsel %vm1640_vm11, %v1611_v40, %v4804_v4  ;;  %v5968_v8 = vpop.permute.xlu2 %4856  ;;  %v1415_v4 = vsel %vm7810_vm4, %v5614_v23, %v4769_v41  ;;  %v4813_v13 = vunpack.i.l.bf16 %v5829_v12  ;;  %v6011_v41 = vld [vmem:[%s5585_s22 + $0xd8] sm:$0xff] }
  0xb1   : > { %v1674_v17 = vpack.c.bf16 %v1644_v14, %v1643_v26  ;;  %v1416_v34 = vsel %vm7810_vm4, %v5611_v22, %v4808_v39  ;;  %v6004_v14 = vpack.i.bf16 %v5904_v44, %v5901_v9  ;;  %v6008_v23 = vpack.i.bf16 %v5974_v1, %v5971_v0 }
  0xb2   : > { %v1447_v22 = vsel %vm1443_vm5, %v1415_v4, %v4774_v59  ;;  %v479_v39 = vrot.slane %v5992_v33, 7  ;;  %v1448_v49 = vsel %vm1443_vm5, %v1416_v34, %v4813_v13  ;;  %v489_v48 = vrot.slane %v6011_v41, 7 }
  0xb3   : > { %5026 = vrot.lane.b32.xlu0 %v5956_v38, %s5498_s27  ;;  %5031 = vrot.lane.b32.xlu1 %v5960_v37, %s5498_s27  ;;  %7829 = vst [vmem:[#allocation14_spill] sm:$0xff] %v6004_v14  ;;  %v6033_v4 = vpack.i.bf16 %v6017_v29, %v6014_v15 }
  0xb4   : > { %4307 = vmatmul.msk.bf16.gmra.mxu0 %vm7811_vm12, %v1674_v17  ;;  %7830 = vst [vmem:[#allocation15_spill] sm:$0xff] %v6008_v23 }
  0xb5   : > { %v4817_v40 = vpop.permute.xlu0 %4816  ;;  %v4822_v26 = vpop.permute.xlu1 %4821  ;;  %7831 = vst [vmem:[#allocation16_spill] sm:$0xff] %v6033_v4 }
  0xb6   : > { %v4819_v17 = vunpack.i.h.bf16 %v4817_v40  ;;  %v4818_v10 = vunpack.i.l.bf16 %v4817_v40  ;;  %5036 = vrot.lane.b32.xlu2 %v5985_v16, %s5494_s23  ;;  %v4824_v40 = vunpack.i.h.bf16 %v4822_v26  ;;  %v4823_v11 = vunpack.i.l.bf16 %v4822_v26 }
  0xb7   : > { %v4828_v16 = vunpack.i.l.bf16 %v5867_v43  ;;  %v6050_v26 = vsel %vm7809_vm1, %v488_v61, %v489_v48  ;;  %v6053_v43 = vsel %vm7809_vm1, 0.0, %v488_v61  ;;  %v575_v48 = vrot.slane %v5992_v33, 1 }
  0xb8   : > { %v1480_v63 = vsel %vm1475_vm6, %v1447_v22, %v4818_v10  ;;  %v1481_v37 = vsel %vm1475_vm6, %v1448_v49, %v4819_v17  ;;  %v6029_v59 = vpop.permute.xlu2 %4871  ;;  %v6042_v10 = vsel %vm7809_vm1, %v479_v39, %v480_v55  ;;  %v6045_v49 = vsel %vm7809_vm1, 0.0, %v479_v39  ;;  %7834 = vst [vmem:[#allocation19_spill] sm:$0xff] %v6050_v26 }
  0xb9   : > { %7832 = vst [vmem:[#allocation17_spill] sm:$0xff] %v6042_v10  ;;  %v1513_v13 = vsel %vm1508_vm7, %v1480_v63, %v4823_v11  ;;  %v1514_v34 = vsel %vm1508_vm7, %v1481_v37, %v4824_v40  ;;  %v4844_v17 = vunpack.i.h.bf16 %v5926_v47  ;;  %v4843_v22 = vunpack.i.l.bf16 %v5926_v47 }
  0xba   : > { %7833 = vst [vmem:[#allocation18_spill] sm:$0xff] %v6045_v49  ;;  %v1546_v11 = vsel %vm1541_vm8, %v1513_v13, %v4828_v16  ;;  %v1547_v37 = vsel %vm1541_vm8, %v1514_v34, %v4829_v52  ;;  %v6063_v61 = vpack.i.bf16 %v6042_v10, %v6045_v49  ;;  %v6067_v47 = vpack.i.bf16 %v6050_v26, %v6053_v43 }
  0xbb   : > { %5041 = vrot.lane.b32.xlu0 %v6004_v14, %s5494_s23  ;;  %5046 = vrot.lane.b32.xlu1 %v6008_v23, %s5496_s25  ;;  %7835 = vst [vmem:[#allocation20_spill] sm:$0xff] %v6053_v43  ;;  %v576_v16 = vrot.slane %v5995_v25, 1  ;;  %v5085_v49 = vpack.i.bf16 %v5892_v54, %v5733_v45  ;;  %v474_v54 = vrot.slane %v5756_v58, 7 }
  0xbd   : > { %v4832_v14 = vpop.permute.xlu0 %4831  ;;  %v4837_v55 = vpop.permute.xlu1 %4836 }
  0xbe   : > { %v4834_v23 = vunpack.i.h.bf16 %v4832_v14  ;;  %v4833_v38 = vunpack.i.l.bf16 %v4832_v14  ;;  %v4839_v39 = vunpack.i.h.bf16 %v4837_v55  ;;  %v4838_v19 = vunpack.i.l.bf16 %v4837_v55  ;;  %5051 = vrot.lane.b32.xlu2 %v6033_v4, %s5496_s25 }
  0xbf   : > { %v5090_v4 = vpack.i.bf16 %v5971_v0, %v5769_v62  ;;  %v473_v62 = vrot.slane %v5753_v57, 7 }
  0xc0   : > { %v1579_v40 = vsel %vm1574_vm9, %v1546_v11, %v4833_v38  ;;  %v1580_v14 = vsel %vm1574_vm9, %v1547_v37, %v4834_v23  ;;  %v6073_v52 = vpop.permute.xlu2 %4886  ;;  %v6085_v23 = vpack.i.bf16 %v5995_v25, %v5992_v33  ;;  %v6088_v11 = vsel %vm7812_vm0, %v575_v48, %v576_v16 }
  0xc1   : > { %v1612_v63 = vsel %vm1607_vm10, %v1579_v40, %v4838_v19  ;;  %v1613_v13 = vsel %vm1607_vm10, %v1580_v14, %v4839_v39  ;;  %v6091_v19 = vsel %vm7812_vm0, %v576_v16, 0.0  ;;  %v4809_v40 = vunpack.i.h.bf16 %v5949_v27 }
  0xc2   : > { %v1645_v34 = vsel %vm1640_vm11, %v1612_v63, %v4843_v22  ;;  %v1646_v55 = vsel %vm1640_vm11, %v1613_v13, %v4844_v17  ;;  %7836 = vst [vmem:[#allocation21_spill] sm:$0xff] %v6091_v19  ;;  %v584_v22 = vrot.slane %v5998_v32, 1  ;;  %v585_v17 = vrot.slane %v6011_v41, 1 }
  0xc3   : > { %5056 = vrot.lane.b32.xlu0 %v6063_v61, %s5499_s28  ;;  %5061 = vrot.lane.b32.xlu1 %v6067_v47, %s5499_s28  ;;  %v1675_v38 = vpack.c.bf16 %v1646_v55, %v1645_v34  ;;  %v6106_v48 = vpack.i.bf16 %v6011_v41, %v5998_v32  ;;  %v6110_v16 = vpack.i.bf16 %v6091_v19, %v6088_v11  ;;  %v4814_v27 = vunpack.i.h.bf16 %v5829_v12 }
  0xc4   : > { %v6113_v63 = vsel %vm7812_vm0, %v584_v22, %v585_v17  ;;  %v6116_v13 = vsel %vm7812_vm0, %v585_v17, 0.0  ;;  %v4859_v12 = vunpack.i.h.bf16 %v5968_v8  ;;  %v4858_v17 = vunpack.i.l.bf16 %v5968_v8 }
  0xc5   : > { %v6095_v39 = vpop.permute.xlu0 %4846  ;;  %v6097_v37 = vpop.permute.xlu1 %4851  ;;  %4308 = vmatmul.msk.bf16.gmra.mxu0 %vm7811_vm12, %v1675_v38  ;;  %7837 = vst [vmem:[#allocation22_spill] sm:$0xff] %v6113_v63  ;;  %v1417_v38 = vsel %vm7810_vm4, %v5635_v36, %v4809_v40  ;;  %v6132_v22 = vpack.i.bf16 %v6116_v13, %v6113_v63  ;;  %v4874_v63 = vunpack.i.h.bf16 %v6029_v59  ;;  %v4873_v19 = vunpack.i.l.bf16 %v6029_v59 }
  0xc6   : > { %v4848_v14 = vunpack.i.l.bf16 %v6095_v39  ;;  %5066 = vrot.lane.b32.xlu2 %v6085_v23, %s5500_s29  ;;  %7838 = vst [vmem:[#allocation23_spill] sm:$0xff] %v6116_v13  ;;  %v4853_v34 = vunpack.i.l.bf16 %v6097_v37  ;;  %v1449_v10 = vsel %vm1443_vm5, %v1417_v38, %v4814_v27 }
  0xc7   : > { %v1482_v13 = vsel %vm1475_vm6, %v1449_v10, %v4858_v17 }
  0xc8   : > { %v6120_v55 = vpop.permute.xlu2 %4901  ;;  %v1418_v43 = vsel %vm7810_vm4, %v5632_v35, %v4848_v14 }
  0xc9   : > { %v1450_v36 = vsel %vm1443_vm5, %v1418_v43, %v4853_v34 }
  0xca   : > { %v1483_v8 = vsel %vm1475_vm6, %v1450_v36, %v4859_v12 }
  0xcb   : > { %5071 = vrot.lane.b32.xlu0 %v6106_v48, %s5500_s29  ;;  %5076 = vrot.lane.b32.xlu1 %v6110_v16, %s5501_s30 }
  0xcd   : > { %v4862_v40 = vpop.permute.xlu0 %4861  ;;  %v4867_v35 = vpop.permute.xlu1 %4866 }
  0xce   : > { %v4864_v14 = vunpack.i.h.bf16 %v4862_v40  ;;  %v4863_v26 = vunpack.i.l.bf16 %v4862_v40  ;;  %5081 = vrot.lane.b32.xlu2 %v6132_v22, %s5501_s30  ;;  %v4869_v27 = vunpack.i.h.bf16 %v4867_v35  ;;  %v4868_v38 = vunpack.i.l.bf16 %v4867_v35 }
  0xd0   : > { %v1515_v43 = vsel %vm1508_vm7, %v1482_v13, %v4863_v26  ;;  %v1516_v34 = vsel %vm1508_vm7, %v1483_v8, %v4864_v14  ;;  %v6148_v40 = vpop.permute.xlu2 %4916  ;;  %v6165_v14 = vsel %vm7809_vm1, %v473_v62, %v474_v54  ;;  %v6168_v8 = vsel %vm7809_vm1, 0.0, %v473_v62 }
  0xd1   : > { %v1548_v0 = vsel %vm1541_vm8, %v1515_v43, %v4868_v38  ;;  %v1549_v45 = vsel %vm1541_vm8, %v1516_v34, %v4869_v27  ;;  %v4849_v34 = vunpack.i.h.bf16 %v6095_v39  ;;  %v4854_v39 = vunpack.i.h.bf16 %v6097_v37 }
  0xd2   : > { %v1581_v59 = vsel %vm1574_vm9, %v1548_v0, %v4873_v19  ;;  %v4888_v19 = vunpack.i.l.bf16 %v6073_v52 }
  0xd3   : > { %5086 = vrot.lane.b32.xlu0 %v5085_v49, %s5495_s24  ;;  %5091 = vrot.lane.b32.xlu1 %v5090_v4, %s5497_s26  ;;  %v1582_v4 = vsel %vm1574_vm9, %v1549_v45, %v4874_v63  ;;  %v6181_v63 = vpack.i.bf16 %v6165_v14, %v6168_v8 }
  0xd4   : > { %v1420_v54 = vsel %vm7810_vm4, %v5654_v50, %v4888_v19 }
  0xd5   : > { %v4877_v10 = vpop.permute.xlu0 %4876  ;;  %v4882_v26 = vpop.permute.xlu1 %4881 }
  0xd6   : > { %v4879_v13 = vunpack.i.h.bf16 %v4877_v10  ;;  %v4878_v12 = vunpack.i.l.bf16 %v4877_v10  ;;  %v4884_v17 = vunpack.i.h.bf16 %v4882_v26  ;;  %v4883_v36 = vunpack.i.l.bf16 %v4882_v26  ;;  %5096 = vrot.lane.b32.xlu2 %v5839_v21, %s5498_s27 }
  0xd7   : > { %v1419_v10 = vsel %vm7810_vm4, %v5657_v51, %v4849_v34  ;;  %v4903_v51 = vunpack.i.l.bf16 %v6120_v55  ;;  %v4919_v34 = vunpack.i.h.bf16 %v6148_v40 }
  0xd8   : > { %v1614_v49 = vsel %vm1607_vm10, %v1581_v59, %v4878_v12  ;;  %v1615_v35 = vsel %vm1607_vm10, %v1582_v4, %v4879_v13  ;;  %v6170_v27 = vpop.permute.xlu2 %4931 }
  0xd9   : > { %v1647_v38 = vsel %vm1640_vm11, %v1614_v49, %v4883_v36  ;;  %v1648_v21 = vsel %vm1640_vm11, %v1615_v35, %v4884_v17  ;;  %v6217_v49 = vpack.i.bf16 %v5889_v42, %v5784_v7  ;;  %v4918_v7 = vunpack.i.l.bf16 %v6148_v40 }
  0xda   : > { %v1676_v43 = vpack.c.bf16 %v1648_v21, %v1647_v38  ;;  %v5140_v42 = vpack.i.bf16 %v5871_v56, %v6017_v29  ;;  %v4889_v29 = vunpack.i.h.bf16 %v6073_v52  ;;  %v6258_v52 = vld [vmem:[%s5585_s22 + $0xe8] sm:$0xff] }
  0xdb   : > { %5101 = vrot.lane.b32.xlu0 %v5849_v28, %s5494_s23  ;;  %5106 = vrot.lane.b32.xlu1 %v5910_v18, %s5496_s25  ;;  %v6194_v28 = vpack.i.bf16 %v5756_v58, %v5753_v57  ;;  %v5120_v18 = vpack.i.bf16 %v5901_v9, %v5898_v5  ;;  %v5125_v57 = vpack.i.bf16 %v5801_v30, %v5904_v44  ;;  %v4904_v5 = vunpack.i.h.bf16 %v6120_v55 }
  0xdc   : > { %4309 = vmatmul.msk.bf16.gmra.mxu0 %vm7811_vm12, %v1676_v43  ;;  %v1451_v58 = vsel %vm1443_vm5, %v1419_v10, %v4854_v39  ;;  %v5135_v30 = vpack.i.bf16 %v6014_v15, %v5974_v1 }
  0xdd   : > { %v6185_v0 = vpop.permute.xlu0 %4891  ;;  %v4897_v45 = vpop.permute.xlu1 %4896 }
  0xde   : > { %v4893_v62 = vunpack.i.l.bf16 %v6185_v0  ;;  %5111 = vrot.lane.b32.xlu2 %v6181_v63, %s5499_s28  ;;  %v4899_v26 = vunpack.i.h.bf16 %v4897_v45  ;;  %v4898_v13 = vunpack.i.l.bf16 %v4897_v45 }
  0xe0   : > { %v6201_v12 = vpop.permute.xlu2 %4946  ;;  %v1452_v50 = vsel %vm1443_vm5, %v1420_v54, %v4893_v62  ;;  %v1484_v37 = vsel %vm1475_vm6, %v1451_v58, %v4898_v13  ;;  %v4894_v58 = vunpack.i.h.bf16 %v6185_v0  ;;  %v482_v0 = vrot.slane %v5842_v24, 7 }
  0xe1   : > { %v1485_v9 = vsel %vm1475_vm6, %v1452_v50, %v4899_v26  ;;  %v1517_v44 = vsel %vm1508_vm7, %v1484_v37, %v4903_v51  ;;  %v1421_v51 = vsel %vm7810_vm4, %v5676_v3, %v4889_v29 }
  0xe2   : > { %v1518_v55 = vsel %vm1508_vm7, %v1485_v9, %v4904_v5  ;;  %v6255_v5 = vld [vmem:[%s5585_s22 + $0xe0] sm:$0xff]  ;;  %v1453_v3 = vsel %vm1443_vm5, %v1421_v51, %v4894_v58 }
  0xe3   : > { %5116 = vrot.lane.b32.xlu0 %v6194_v28, %s5500_s29  ;;  %5121 = vrot.lane.b32.xlu1 %v5120_v18, %s5495_s24 }
  0xe5   : > { %v4907_v17 = vpop.permute.xlu0 %4906  ;;  %v4912_v36 = vpop.permute.xlu1 %4911 }
  0xe6   : > { %v4909_v59 = vunpack.i.h.bf16 %v4907_v17  ;;  %v4908_v4 = vunpack.i.l.bf16 %v4907_v17  ;;  %5126 = vrot.lane.b32.xlu2 %v5125_v57, %s5495_s24  ;;  %v4914_v35 = vunpack.i.h.bf16 %v4912_v36  ;;  %v4913_v38 = vunpack.i.l.bf16 %v4912_v36 }
  0xe7   : > { %v4933_v57 = vunpack.i.l.bf16 %v6170_v27  ;;  %v483_v36 = vrot.slane %v5855_v6, 7 }
  0xe8   : > { %v1550_v21 = vsel %vm1541_vm8, %v1517_v44, %v4908_v4  ;;  %v1551_v43 = vsel %vm1541_vm8, %v1518_v55, %v4909_v59  ;;  %v6225_v19 = vpop.permute.xlu2 %4961  ;;  %v491_v59 = vrot.slane %v6255_v5, 7  ;;  %v492_v4 = vrot.slane %v6258_v52, 7 }
  0xe9   : > { %v1583_v15 = vsel %vm1574_vm9, %v1550_v21, %v4913_v38  ;;  %v1584_v1 = vsel %vm1574_vm9, %v1551_v43, %v4914_v35  ;;  %v4948_v21 = vunpack.i.l.bf16 %v6201_v12  ;;  %v6283_v43 = vsel %vm7809_vm1, %v482_v0, %v483_v36 }
  0xea   : > { %v1616_v40 = vsel %vm1607_vm10, %v1583_v15, %v4918_v7  ;;  %v1617_v39 = vsel %vm1607_vm10, %v1584_v1, %v4919_v34  ;;  %v6286_v34 = vsel %vm7809_vm1, 0.0, %v482_v0  ;;  %v6291_v15 = vsel %vm7809_vm1, %v491_v59, %v492_v4 }
  0xeb   : > { %5131 = vrot.lane.b32.xlu0 %v6217_v49, %s5501_s30  ;;  %5136 = vrot.lane.b32.xlu1 %v5135_v30, %s5497_s26  ;;  %v6304_v29 = vpack.i.bf16 %v6283_v43, %v6286_v34 }
  0xed   : > { %v4922_v45 = vpop.permute.xlu0 %4921  ;;  %v6236_v62 = vpop.permute.xlu1 %4926 }
  0xee   : > { %v4924_v54 = vunpack.i.h.bf16 %v4922_v45  ;;  %v4923_v18 = vunpack.i.l.bf16 %v4922_v45  ;;  %5141 = vrot.lane.b32.xlu2 %v5140_v42, %s5497_s26  ;;  %v4928_v26 = vunpack.i.l.bf16 %v6236_v62 }
  0xf0   : > { %v1649_v10 = vsel %vm1640_vm11, %v1616_v40, %v4923_v18  ;;  %v1650_v56 = vsel %vm1640_vm11, %v1617_v39, %v4924_v54  ;;  %v6245_v13 = vpop.permute.xlu2 %4976  ;;  %v1422_v9 = vsel %vm7810_vm4, %v5673_v2, %v4928_v26 }
  0xf1   : > { %v1677_v50 = vpack.c.bf16 %v1650_v56, %v1649_v10  ;;  %v1454_v30 = vsel %vm1443_vm5, %v1422_v9, %v4933_v57 }
  0xf3   : > { %5146 = vrot.lane.b32.xlu0 %v6063_v61, %s5498_s27  ;;  %5151 = vrot.lane.b32.xlu1 %v6067_v47, %s5498_s27 }
  0xf4   : > { %4310 = vmatmul.msk.bf16.gmra.mxu0 %vm7811_vm12, %v1677_v50 }
  0xf5   : > { %v4937_v61 = vpop.permute.xlu0 %4936  ;;  %v4942_v37 = vpop.permute.xlu1 %4941 }
  0xf6   : > { %v4939_v17 = vunpack.i.h.bf16 %v4937_v61  ;;  %v4938_v47 = vunpack.i.l.bf16 %v4937_v61  ;;  %5156 = vrot.lane.b32.xlu2 %v6085_v23, %s5494_s23  ;;  %v4944_v2 = vunpack.i.h.bf16 %v4942_v37  ;;  %v4943_v44 = vunpack.i.l.bf16 %v4942_v37 }
  0xf7   : > { %v4949_v23 = vunpack.i.h.bf16 %v6201_v12  ;;  %v6294_v12 = vsel %vm7809_vm1, 0.0, %v491_v59  ;;  %v6324_v37 = vpack.i.bf16 %v5855_v6, %v5842_v24  ;;  %v6337_v59 = vpack.i.bf16 %v6258_v52, %v6255_v5 }
  0xf8   : > { %v1486_v55 = vsel %vm1475_vm6, %v1453_v3, %v4938_v47  ;;  %v1487_v35 = vsel %vm1475_vm6, %v1454_v30, %v4939_v17  ;;  %v6274_v38 = vpop.permute.xlu2 %4991  ;;  %v587_v17 = vrot.slane %v6255_v5, 1  ;;  %v588_v47 = vrot.slane %v6258_v52, 1 }
  0xf9   : > { %v1519_v7 = vsel %vm1508_vm7, %v1486_v55, %v4943_v44  ;;  %v1520_v42 = vsel %vm1508_vm7, %v1487_v35, %v4944_v2  ;;  %v6341_v24 = vpack.i.bf16 %v5915_v60, %v5884_v53  ;;  %v4929_v53 = vunpack.i.h.bf16 %v6236_v62 }
  0xfa   : > { %v1552_v10 = vsel %vm1541_vm8, %v1519_v7, %v4948_v21  ;;  %v1553_v56 = vsel %vm1541_vm8, %v1520_v42, %v4949_v23  ;;  %v6344_v6 = vsel %vm7812_vm0, %v587_v17, %v588_v47  ;;  %v6347_v4 = vsel %vm7812_vm0, %v588_v47, 0.0  ;;  %v7839_v42 = vld [vmem:[#allocation2_spill] sm:$0xff] }
  0xfb   : > { %5161 = vrot.lane.b32.xlu0 %v6106_v48, %s5494_s23  ;;  %5166 = vrot.lane.b32.xlu1 %v6110_v16, %s5496_s25  ;;  %v4964_v48 = vunpack.i.h.bf16 %v6225_v19  ;;  %v4963_v16 = vunpack.i.l.bf16 %v6225_v19  ;;  %v6308_v19 = vpack.i.bf16 %v6291_v15, %v6294_v12  ;;  %v6357_v30 = vpack.i.bf16 %v6347_v4, %v6344_v6 }
  0xfc   : > { %v5205_v55 = vpack.i.bf16 %v5992_v33, %v5804_v31  ;;  %v5210_v35 = vpack.i.bf16 %v6088_v11, %v5874_v46  ;;  %v4934_v23 = vunpack.i.h.bf16 %v6170_v27  ;;  %v1423_v21 = vsel %vm7810_vm4, %v5699_v20, %v4929_v53 }
  0xfd   : > { %v4952_v1 = vpop.permute.xlu0 %4951  ;;  %v4957_v45 = vpop.permute.xlu1 %4956  ;;  %v4979_v31 = vunpack.i.h.bf16 %v6245_v13  ;;  %v5240_v47 = vpack.i.bf16 %v5998_v32, %v5995_v25 }
  0xfe   : > { %v4954_v54 = vunpack.i.h.bf16 %v4952_v1  ;;  %v4953_v18 = vunpack.i.l.bf16 %v4952_v1  ;;  %v4959_v40 = vunpack.i.h.bf16 %v4957_v45  ;;  %v4958_v39 = vunpack.i.l.bf16 %v4957_v45  ;;  %5171 = vrot.lane.b32.xlu2 %v6132_v22, %s5496_s25 }
  0xff   : > { %v1455_v46 = vsel %vm1443_vm5, %v1423_v21, %v4934_v23 }
 0x100   : > { %v1585_v26 = vsel %vm1574_vm9, %v1552_v10, %v4953_v18  ;;  %v1586_v50 = vsel %vm1574_vm9, %v1553_v56, %v4954_v54  ;;  %v6314_v51 = vpop.permute.xlu2 %5006  ;;  %v4993_v56 = vunpack.i.l.bf16 %v6274_v38 }
 0x101   : > { %v1618_v57 = vsel %vm1607_vm10, %v1585_v26, %v4958_v39  ;;  %v1619_v58 = vsel %vm1607_vm10, %v1586_v50, %v4959_v40  ;;  %v4994_v50 = vunpack.i.h.bf16 %v6274_v38 }
 0x102   : > { %v1651_v22 = vsel %vm1640_vm11, %v1618_v57, %v4963_v16  ;;  %v1652_v9 = vsel %vm1640_vm11, %v1619_v58, %v4964_v48  ;;  %v4978_v16 = vunpack.i.l.bf16 %v6245_v13 }
 0x103   : > { %5176 = vrot.lane.b32.xlu0 %v6304_v29, %s5499_s28  ;;  %5181 = vrot.lane.b32.xlu1 %v6308_v19, %s5499_s28  ;;  %v1678_v61 = vpack.c.bf16 %v1652_v9, %v1651_v22 }
 0x104   : > { %v1488_v45 = vsel %vm1475_vm6, %v1455_v46, %v4978_v16 }
 0x105   : > { %v6328_v0 = vpop.permute.xlu0 %4966  ;;  %v6330_v36 = vpop.permute.xlu1 %4971  ;;  %4311 = vmatmul.msk.bf16.gmra.mxu0 %vm7811_vm12, %v1678_v61 }
 0x106   : > { %5186 = vrot.lane.b32.xlu2 %v6324_v37, %s5500_s29  ;;  %v4968_v44 = vunpack.i.l.bf16 %v6328_v0  ;;  %v4973_v62 = vunpack.i.l.bf16 %v6330_v36  ;;  %v4969_v23 = vunpack.i.h.bf16 %v6328_v0  ;;  %v4974_v0 = vunpack.i.h.bf16 %v6330_v36 }
 0x108   : > { %v6349_v3 = vpop.permute.xlu2 %5021  ;;  %v1424_v48 = vsel %vm7810_vm4, %v7839_v42, %v4968_v44 }
 0x109   : > { %v1456_v20 = vsel %vm1443_vm5, %v1424_v48, %v4973_v62  ;;  %v5008_v62 = vunpack.i.l.bf16 %v6314_v51  ;;  %v7841_v48 = vld [vmem:[#allocation13_spill] sm:$0xff]  ;;  %v5024_v46 = vunpack.i.h.bf16 %v6349_v3 }
 0x10a   : > { %v1489_v18 = vsel %vm1475_vm6, %v1456_v20, %v4979_v31  ;;  %v5245_v31 = vpack.i.bf16 %v6255_v5, %v6011_v41  ;;  %v7842_v20 = vld [vmem:[#allocation4_spill] sm:$0xff] }
 0x10b   : > { %5191 = vrot.lane.b32.xlu0 %v6337_v59, %s5500_s29  ;;  %5196 = vrot.lane.b32.xlu1 %v6341_v24, %s5501_s30  ;;  %v1436_v41 = vsel %vm7810_vm4, %v6283_v43, %v5008_v62 }
 0x10d   : > { %v4982_v60 = vpop.permute.xlu0 %4981  ;;  %v4987_v2 = vpop.permute.xlu1 %4986 }
 0x10e   : > { %5201 = vrot.lane.b32.xlu2 %v6357_v30, %s5501_s30  ;;  %v4983_v33 = vunpack.i.l.bf16 %v4982_v60  ;;  %v4984_v11 = vunpack.i.h.bf16 %v4982_v60  ;;  %v4988_v54 = vunpack.i.l.bf16 %v4987_v2  ;;  %v4989_v13 = vunpack.i.h.bf16 %v4987_v2 }
 0x110   : > { %v6371_v7 = vpop.permute.xlu2 %5036  ;;  %v1521_v40 = vsel %vm1508_vm7, %v1488_v45, %v4983_v33  ;;  %v1522_v39 = vsel %vm1508_vm7, %v1489_v18, %v4984_v11  ;;  %v7843_v18 = vld [vmem:[#allocation21_spill] sm:$0xff] }
 0x111   : > { %v1554_v57 = vsel %vm1541_vm8, %v1521_v40, %v4988_v54  ;;  %v1555_v58 = vsel %vm1541_vm8, %v1522_v39, %v4989_v13  ;;  %v7844_v40 = vld [vmem:[#allocation22_spill] sm:$0xff] }
 0x112   : > { %v1587_v38 = vsel %vm1574_vm9, %v1554_v57, %v4993_v56  ;;  %v1588_v53 = vsel %vm1574_vm9, %v1555_v58, %v4994_v50  ;;  %v5255_v13 = vpack.i.bf16 %v7844_v40, %v7843_v18  ;;  %v5039_v58 = vunpack.i.h.bf16 %v6371_v7 }
 0x113   : > { %5206 = vrot.lane.b32.xlu0 %v5205_v55, %s5495_s24  ;;  %5211 = vrot.lane.b32.xlu1 %v5210_v35, %s5497_s26  ;;  %v5009_v35 = vunpack.i.h.bf16 %v6314_v51  ;;  %v1429_v51 = vsel %vm7810_vm4, %v6168_v8, %v4969_v23 }
 0x114   : > { %v1461_v8 = vsel %vm1443_vm5, %v1429_v51, %v4974_v0 }
 0x115   : > { %v4997_v27 = vpop.permute.xlu0 %4996  ;;  %v6381_v1 = vpop.permute.xlu1 %5001  ;;  %v1425_v11 = vsel %vm7810_vm4, %v7842_v20, %v5009_v35 }
 0x116   : > { %5216 = vrot.lane.b32.xlu2 %v6181_v63, %s5498_s27  ;;  %v6397_v63 = vld [vmem:[%s7775_s2] ss:$0 sm:$0xff]  ;;  %v4999_v22 = vunpack.i.h.bf16 %v4997_v27  ;;  %v4998_v9 = vunpack.i.l.bf16 %v4997_v27  ;;  %v5023_v27 = vunpack.i.l.bf16 %v6349_v3  ;;  %v6446_v3 = vsel %vm1443_vm5, %v1425_v11, %v5024_v46 }
 0x117   : > { %v5003_v43 = vunpack.i.l.bf16 %v6381_v1 }
 0x118   : > { %v6389_v10 = vpop.permute.xlu2 %5051  ;;  %v1620_v44 = vsel %vm1607_vm10, %v1587_v38, %v4998_v9  ;;  %v1621_v55 = vsel %vm1607_vm10, %v1588_v53, %v4999_v22  ;;  %v1468_v56 = vsel %vm1443_vm5, %v1436_v41, %v5023_v27  ;;  %v5038_v22 = vunpack.i.l.bf16 %v6371_v7 }
 0x119   : > { %v1773_v26 = vpop.f32.mrf.mxu0  ;;  %v5053_v35 = vunpack.i.l.bf16 %v6389_v10 }
 0x11a   : > { %v1774_v60 = vadd.f32 %v6397_v63, %v1773_v26  ;;  %v5004_v26 = vunpack.i.h.bf16 %v6381_v1 }
 0x11b   : > { %5221 = vrot.lane.b32.xlu0 %v6194_v28, %s5494_s23  ;;  %5226 = vrot.lane.b32.xlu1 %v6217_v49, %s5496_s25  ;;  %v7840_v49 = vld [vmem:[#allocation11_spill] sm:$0xff] }
 0x11c   : > { %v1853_v42 = vmax.f32 %v1774_v60, 0.0  ;;  %v1435_v7 = vsel %vm7810_vm4, %v6286_v34, %v5004_v26 }
 0x11d   : > { %v5012_v61 = vpop.permute.xlu0 %5011  ;;  %v6404_v17 = vpop.permute.xlu1 %5016 }
 0x11e   : > { %v5014_v28 = vunpack.i.h.bf16 %v5012_v61  ;;  %v5013_v2 = vunpack.i.l.bf16 %v5012_v61  ;;  %5231 = vrot.lane.b32.xlu2 %v7840_v49, %s5499_s28  ;;  %v1917_v5 = vrot.slane %v1853_v42, 2  ;;  %v1918_v36 = vrot.slane %v1853_v42, 4  ;;  %v7845_v61 = vld [vmem:[#allocation23_spill] sm:$0xff] }
 0x11f   : > { %v1919_v50 = vrot.slane %v1853_v42, 6  ;;  %v4322_v9 = vrot.slane %v1853_v42, 9  ;;  %v5260_v38 = vpack.i.bf16 %v6344_v6, %v7845_v61  ;;  %v5019_v60 = vunpack.i.h.bf16 %v6404_v17 }
 0x120   : > { %v6417_v21 = vpop.permute.xlu2 %5066  ;;  %v1653_v25 = vsel %vm1640_vm11, %v1620_v44, %v5013_v2  ;;  %v1654_v32 = vsel %vm1640_vm11, %v1621_v55, %v5014_v28  ;;  %v4324_v53 = vrot.slane %v1918_v36, 9  ;;  %v5018_v28 = vunpack.i.l.bf16 %v6404_v17  ;;  %v7846_v2 = vld [vmem:[#allocation15_spill] sm:$0xff] }
 0x121   : > { %v1679_v16 = vpack.c.bf16 %v1654_v32, %v1653_v25  ;;  %v1775_v33 = vpop.f32.mrf.mxu0  ;;  %v1430_v6 = vsel %vm7810_vm4, %v6165_v14, %v5003_v43  ;;  %v5054_v49 = vunpack.i.h.bf16 %v6389_v10  ;;  %v4325_v44 = vrot.slane %v1919_v50, 9  ;;  %v6483_v14 = vld [vmem:[%s5585_s22 + $0xf0] sm:$0xff] }
 0x122   : > { %v1776_v39 = vadd.f32 %v6397_v63, %v1775_v33  ;;  %v6473_v23 = vmax.f32 %v1853_v42, %v4322_v9  ;;  %v6477_v32 = vmax.f32 %v1918_v36, %v4324_v53  ;;  %v1462_v62 = vsel %vm1443_vm5, %v1430_v6, %v5018_v28 }
 0x123   : > { %5236 = vrot.lane.b32.xlu0 %v7841_v48, %s5500_s29  ;;  %5241 = vrot.lane.b32.xlu1 %v5240_v47, %s5495_s24  ;;  %v4323_v47 = vrot.slane %v1917_v5, 9  ;;  %v1467_v34 = vsel %vm1443_vm5, %v1435_v7, %v5019_v60  ;;  %v6486_v48 = vld [vmem:[%s5585_s22 + $0xf8] sm:$0xff]  ;;  %v6492_v46 = vmax.f32 %v1919_v50, %v4325_v44  ;;  %v5069_v41 = vunpack.i.h.bf16 %v6417_v21  ;;  %s5503_s22 = smov 16  }
 0x124   : > { %4312 = vmatmul.msk.bf16.gmra.mxu0 %vm7811_vm12, %v1679_v16  ;;  %v6463_v1 = vmax.f32 %v1776_v39, 0.0  ;;  %v494_v36 = vrot.slane %v6483_v14, 7  ;;  %v5068_v18 = vunpack.i.l.bf16 %v6417_v21 }
 0x125   : > { %v6435_v45 = vpop.permute.xlu0 %5026  ;;  %v6437_v54 = vpop.permute.xlu1 %5031  ;;  %v6475_v25 = vmax.f32 %v1917_v5, %v4323_v47 }
 0x126   : > { %5246 = vrot.lane.b32.xlu2 %v5245_v31, %s5495_s24  ;;  %v1920_v16 = vrot.slane %v6463_v1, 2  ;;  %v5029_v31 = vunpack.i.h.bf16 %v6435_v45  ;;  %v5028_v42 = vunpack.i.l.bf16 %v6435_v45  ;;  %v5034_v0 = vunpack.i.h.bf16 %v6437_v54 }
 0x127   : > { %v1921_v33 = vrot.slane %v6463_v1, 4  ;;  %v4326_v20 = vrot.slane %v6463_v1, 9  ;;  %v5033_v11 = vunpack.i.l.bf16 %v6437_v54  ;;  %v495_v45 = vrot.slane %v6486_v48, 7 }
 0x128   : > { %v6452_v57 = vpop.permute.xlu2 %5081  ;;  %v1922_v40 = vrot.slane %v6463_v1, 6  ;;  %v4327_v54 = vrot.slane %v1920_v16, 9  ;;  %v1495_v39 = vsel %vm1475_vm6, %v1462_v62, %v5029_v31  ;;  %v1501_v26 = vsel %vm1475_vm6, %v1468_v56, %v5034_v0 }
 0x129   : > { %v4328_v43 = vrot.slane %v1921_v33, 9  ;;  %v6513_v50 = vmax.f32 %v6463_v1, %v4326_v20  ;;  %v1500_v9 = vsel %vm1475_vm6, %v1467_v34, %v5033_v11  ;;  %v5084_v60 = vunpack.i.h.bf16 %v6452_v57 }
 0x12a   : > { %v5083_v56 = vunpack.i.l.bf16 %v6452_v57  ;;  %v6526_v7 = vmax.f32 %v1920_v16, %v4327_v54 }
 0x12b   : > { %5251 = vrot.lane.b32.xlu0 %v7846_v2, %s5501_s30  ;;  %5256 = vrot.lane.b32.xlu1 %v5255_v13, %s5497_s26  ;;  %v1494_v13 = vsel %vm1475_vm6, %v1461_v8, %v5028_v42  ;;  %v543_v8 = vsel %vm7809_vm1, 0.0, %v494_v36  ;;  %v1528_v2 = vsel %vm1508_vm7, %v1495_v39, %v5039_v58  ;;  %v6539_v58 = vmax.f32 %v1921_v33, %v4328_v43 }
 0x12c   : > { %v1527_v28 = vsel %vm1508_vm7, %v1494_v13, %v5038_v22  ;;  %v6537_v22 = vrot.slane %v1922_v40, 9 }
 0x12d   : > { %v5042_v55 = vpop.permute.xlu0 %5041  ;;  %v6470_v17 = vpop.permute.xlu1 %5046 }
 0x12e   : > { %5261 = vrot.lane.b32.xlu2 %v5260_v38, %s5497_s26  ;;  %v5043_v61 = vunpack.i.l.bf16 %v5042_v55  ;;  %v5049_v6 = vunpack.i.h.bf16 %v6470_v17  ;;  %v5048_v44 = vunpack.i.l.bf16 %v6470_v17 }
 0x130   : > { %v6497_v51 = vpop.permute.xlu2 %5096  ;;  %v1560_v33 = vsel %vm1541_vm8, %v1527_v28, %v5048_v44 }
 0x131   : > { %v1778_v27 = vpop.f32.mrf.mxu0  ;;  %v5099_v57 = vunpack.i.h.bf16 %v6497_v51 }
 0x132   : > { %v1779_v5 = vadd.f32 %v6397_v63, %v1778_v27 }
 0x133   : > { %5266 = vrot.lane.b32.xlu0 %v6304_v29, %s5498_s27  ;;  %5271 = vrot.lane.b32.xlu1 %v6308_v19, %s5498_s27  ;;  %v5044_v29 = vunpack.i.h.bf16 %v5042_v55  ;;  %v496_v19 = vsel %vm7809_vm1, %v494_v36, %v495_v45  ;;  %v1533_v55 = vsel %vm1508_vm7, %v1500_v9, %v5043_v61  ;;  %v590_v36 = vrot.slane %v6483_v14, 1 }
 0x134   : > { %v6516_v53 = vmax.f32 %v1779_v5, 0.0  ;;  %v6533_v31 = vpack.i.bf16 %v496_v19, %v543_v8  ;;  %v1561_v5 = vsel %vm1541_vm8, %v1528_v2, %v5049_v6  ;;  %v591_v45 = vrot.slane %v6486_v48, 1 }
 0x135   : > { %v5057_v38 = vpop.permute.xlu0 %5056  ;;  %v5062_v47 = vpop.permute.xlu1 %5061  ;;  %v1566_v39 = vsel %vm1541_vm8, %v1533_v55, %v5053_v35  ;;  %vm7814_vm1 = vcmask 1046534  }
 0x136   : > { %5276 = vrot.lane.b32.xlu2 %v6324_v37, %s5494_s23  ;;  %v1534_v37 = vsel %vm1508_vm7, %v1501_v26, %v5044_v29  ;;  %v1923_v16 = vrot.slane %v6516_v53, 2  ;;  %v1924_v42 = vrot.slane %v6516_v53, 4  ;;  %v5058_v17 = vunpack.i.l.bf16 %v5057_v38 }
 0x137   : > { %v1925_v0 = vrot.slane %v6516_v53, 6  ;;  %v5059_v20 = vunpack.i.h.bf16 %v5057_v38  ;;  %v5064_v11 = vunpack.i.h.bf16 %v5062_v47  ;;  %v4330_v54 = vrot.slane %v6516_v53, 9 }
 0x138   : > { %v6531_v62 = vpop.permute.xlu2 %5111  ;;  %v5063_v13 = vunpack.i.l.bf16 %v5062_v47  ;;  %v4331_v43 = vrot.slane %v1923_v16, 9  ;;  %v4332_v9 = vrot.slane %v1924_v42, 9  ;;  %v1593_v61 = vsel %vm1574_vm9, %v1560_v33, %v5058_v17 }
 0x139   : > { %v1780_v34 = vpop.f32.mrf.mxu0  ;;  %v4333_v29 = vrot.slane %v1925_v0, 9  ;;  %v1594_v19 = vsel %vm1574_vm9, %v1561_v5, %v5059_v20  ;;  %v1626_v44 = vsel %vm1607_vm10, %v1593_v61, %v5068_v18  ;;  %v592_v55 = vsel %vm7812_vm0, %v590_v36, %v591_v45 }
 0x13a   : > { %v1781_v27 = vadd.f32 %v6397_v63, %v1780_v34  ;;  %v1599_v2 = vsel %vm1574_vm9, %v1566_v39, %v5063_v13  ;;  %v624_v34 = vsel %vm7812_vm0, %v591_v45, 0.0  ;;  %v2502_v33 = vmax.f32 %v1923_v16, %v4331_v43  ;;  %v7847_v13 = vld [vmem:[#allocation12_spill] sm:$0xff]  ;;  %v7848_v43 = vld [vmem:[#allocation14_spill] sm:$0xff] }
 0x13b   : > { %5281 = vrot.lane.b32.xlu0 %v6337_v59, %s5494_s23  ;;  %5286 = vrot.lane.b32.xlu1 %v6341_v24, %s5496_s25  ;;  %v1567_v59 = vsel %vm1541_vm8, %v1534_v37, %v5054_v49  ;;  %v2501_v37 = vmax.f32 %v6516_v53, %v4330_v54  ;;  %v2503_v5 = vmax.f32 %v1924_v42, %v4332_v9 }
 0x13c   : > { %v1600_v47 = vsel %vm1574_vm9, %v1567_v59, %v5064_v11  ;;  %v6564_v8 = vmax.f32 %v1781_v27, 0.0  ;;  %v5098_v27 = vunpack.i.l.bf16 %v6497_v51  ;;  %v1627_v18 = vsel %vm1607_vm10, %v1594_v19, %v5069_v41 }
 0x13d   : > { %v5072_v24 = vpop.permute.xlu0 %5071  ;;  %v5077_v26 = vpop.permute.xlu1 %5076  ;;  %v2504_v53 = vmax.f32 %v1925_v0, %v4333_v29  ;;  %v2621_v21 = vmax.f32 %v6473_v23, %v2501_v37  ;;  %v6601_v41 = vpack.i.bf16 %v6486_v48, %v6483_v14  ;;  %v6607_v0 = vpack.i.bf16 %v624_v34, %v592_v55 }
 0x13e   : > { %v5074_v38 = vunpack.i.h.bf16 %v5072_v24  ;;  %5291 = vrot.lane.b32.xlu2 %v6357_v30, %s5496_s25  ;;  %v5073_v10 = vunpack.i.l.bf16 %v5072_v24  ;;  %v5079_v35 = vunpack.i.h.bf16 %v5077_v26  ;;  %v5078_v28 = vunpack.i.l.bf16 %v5077_v26 }
 0x13f   : > { %v4334_v36 = vrot.slane %v6564_v8, 9  ;;  %v1926_v16 = vrot.slane %v6564_v8, 2  ;;  %v6612_v26 = vmax.f32 %v1922_v40, %v6537_v22  ;;  %v6616_v23 = vsel %vm1475_vm6, %v6446_v3, %v5098_v27 }
 0x140   : > { %v1633_v49 = vsel %vm1607_vm10, %v1600_v47, %v5074_v38  ;;  %v6570_v6 = vpop.permute.xlu2 %5126  ;;  %v1632_v30 = vsel %vm1607_vm10, %v1599_v2, %v5073_v10  ;;  %v1659_v20 = vsel %vm1640_vm11, %v1626_v44, %v5078_v28  ;;  %v1660_v45 = vsel %vm1640_vm11, %v1627_v18, %v5079_v35  ;;  %v7849_v2 = vld [vmem:[#allocation16_spill] sm:$0xff] }
 0x141   : > { %v1666_v11 = vsel %vm1640_vm11, %v1633_v49, %v5084_v60  ;;  %v1665_v60 = vsel %vm1640_vm11, %v1632_v30, %v5083_v56  ;;  %v1682_v54 = vpack.c.bf16 %v1660_v45, %v1659_v20  ;;  %v2622_v56 = vmax.f32 %v6475_v25, %v2502_v33  ;;  %v7850_v20 = vld [vmem:[#allocation6_spill] sm:$0xff]  ;;  %v7852_v45 = vld [vmem:[#allocation9_spill] sm:$0xff] }
 0x142   : > { %v1783_v17 = vpop.f32.mrf.mxu0  ;;  %v1685_v39 = vpack.c.bf16 %v1666_v11, %v1665_v60  ;;  %v2623_v14 = vmax.f32 %v6477_v32, %v2503_v5  ;;  %v5114_v48 = vunpack.i.h.bf16 %v6531_v62  ;;  %v2505_v25 = vmax.f32 %v6564_v8, %v4334_v36 }
 0x143   : > { %5296 = vrot.lane.b32.xlu0 %v7847_v13, %s5499_s28  ;;  %5301 = vrot.lane.b32.xlu1 %v6533_v31, %s5499_s28  ;;  %v1784_v42 = vadd.f32 %v6397_v63, %v1783_v17  ;;  %v2624_v9 = vmax.f32 %v6492_v46, %v2504_v53  ;;  %v1927_v61 = vrot.slane %v6564_v8, 4  ;;  %v4335_v1 = vrot.slane %v1926_v16, 9  ;;  %v7851_v13 = vld [vmem:[#allocation3_spill] sm:$0xff] }
 0x144   : > { %4315 = vmatmul.msk.bf16.vlgmr.msra.gmra.mxu2 %vm7811_vm12, %v1682_v54  ;;  %4318 = vmatmul.msk.bf16.vlgmr.msra.gmra.mxu3 %vm7811_vm12, %v1685_v39  ;;  %v6629_v3 = vperm.slane %v2621_v21, 0  ;;  %v5113_v32 = vunpack.i.l.bf16 %v6531_v62  ;;  %v1928_v38 = vrot.slane %v6564_v8, 6  ;;  %v5129_v29 = vunpack.i.h.bf16 %v6570_v6 }
 0x145   : > { %v5087_v59 = vpop.permute.xlu0 %5086  ;;  %v6596_v24 = vpop.permute.xlu1 %5091  ;;  %v6625_v40 = vmax.f32 %v1784_v42, 0.0  ;;  %v6634_v19 = vperm.slane %v2622_v56, 0  ;;  %v6638_v46 = vperm.slane %v2623_v14, 0  ;;  %v2625_v10 = vmax.f32 %v6513_v50, %v2505_v25 }
 0x146   : > { %5306 = vrot.lane.b32.xlu2 %v7848_v43, %s5500_s29  ;;  %v5088_v47 = vunpack.i.l.bf16 %v5087_v59  ;;  %v5128_v49 = vunpack.i.l.bf16 %v6570_v6  ;;  %v5089_v35 = vunpack.i.h.bf16 %v5087_v59  ;;  %v6644_v44 = vperm.slane %v2624_v9, 0 }
 0x147   : > { %v4336_v55 = vrot.slane %v1927_v61, 9  ;;  %v2506_v34 = vmax.f32 %v1926_v16, %v4335_v1  ;;  %v1929_v37 = vrot.slane %v6625_v40, 2  ;;  %v6651_v11 = vsel %vm7810_vm4, %v7850_v20, %v5129_v29  ;;  %v7853_v16 = vld [vmem:[#allocation8_spill] sm:$0xff] }
 0x148   : > { %v6627_v22 = vpop.permute.xlu2 %5141  ;;  %v1930_v50 = vrot.slane %v6625_v40, 4  ;;  %v5093_v6 = vunpack.i.l.bf16 %v6596_v24  ;;  %v4337_v27 = vrot.slane %v1928_v38, 9  ;;  %v1931_v33 = vrot.slane %v6625_v40, 6 }
 0x149   : > { %v4338_v5 = vrot.slane %v6625_v40, 9  ;;  %v1426_v18 = vsel %vm7810_vm4, %v7851_v13, %v5088_v47  ;;  %v5094_v53 = vunpack.i.h.bf16 %v6596_v24  ;;  %v6662_v36 = vperm.slane %v2625_v10, 0 }
 0x14a   : > { %v1785_v28 = vpop.f32.mrf.mxu0  ;;  %v1438_v60 = vsel %vm7810_vm4, %v7852_v45, %v5128_v49  ;;  %v1431_v42 = vsel %vm7810_vm4, %v7853_v16, %v5089_v35  ;;  %v4339_v39 = vrot.slane %v1929_v37, 9  ;;  %v2507_v21 = vmax.f32 %v1927_v61, %v4336_v55 }
 0x14b   : > { %5311 = vrot.lane.b32.xlu0 %v6601_v41, %s5500_s29  ;;  %5316 = vrot.lane.b32.xlu1 %v7849_v2, %s5501_s30  ;;  %v1786_v54 = vadd.f32 %v6397_v63, %v1785_v28  ;;  %v2948_v24 = vsel %vm2883_vm13, %v6634_v19, %v6629_v3  ;;  %v4340_v56 = vrot.slane %v1930_v50, 9  ;;  %v1458_v14 = vsel %vm1443_vm5, %v1426_v18, %v5093_v6 }
 0x14c   : > { %v2626_v43 = vmax.f32 %v6526_v7, %v2506_v34  ;;  %v4341_v9 = vrot.slane %v1931_v33, 9  ;;  %v6679_v1 = vmax.f32 %v6625_v40, %v4338_v5  ;;  %v6682_v29 = vsel %vm1443_vm5, %v1431_v42, %v5094_v53 }
 0x14d   : > { %v5102_v30 = vpop.permute.xlu0 %5101  ;;  %v6647_v17 = vpop.permute.xlu1 %5106  ;;  %v5144_v47 = vunpack.i.h.bf16 %v6627_v22  ;;  %v5143_v10 = vunpack.i.l.bf16 %v6627_v22  ;;  %v6688_v49 = vmax.f32 %v1786_v54, 0.0  ;;  %v2949_v7 = vsel %vm7816_vm14, %v6638_v46, %v2948_v24 }
 0x14e   : > { %5321 = vrot.lane.b32.xlu2 %v6607_v0, %s5501_s30  ;;  %v5103_v25 = vunpack.i.l.bf16 %v5102_v30  ;;  %v5104_v61 = vunpack.i.h.bf16 %v5102_v30  ;;  %v1491_v40 = vsel %vm1475_vm6, %v1458_v14, %v5099_v57  ;;  %v5109_v35 = vunpack.i.h.bf16 %v6647_v17 }
 0x14f   : > { %v2627_v55 = vmax.f32 %v6539_v58, %v2507_v21  ;;  %vm7813_vm4 = vcmask 1047559   ;;  %v2950_v51 = vsel %vm2799_vm15, %v6644_v44, %v2949_v7  ;;  %v2884_v57 = vsel %vm2883_vm13, %v6638_v46, %v6634_v19 }
 0x150   : > { %v6671_v59 = vpop.permute.xlu2 %5156  ;;  %v1523_v34 = vsel %vm1508_vm7, %v6616_v23, %v5103_v25  ;;  %v6711_v30 = vmax.f32 %v1929_v37, %v4339_v39  ;;  %v2508_v58 = vmax.f32 %v1928_v38, %v4337_v27  ;;  %v2951_v23 = vsel %vm2801_vm2, %v6662_v36, %v2950_v51 }
 0x151   : > { %v6718_v20 = vmax.f32 %v1930_v50, %v4340_v56  ;;  %v6720_v6 = vmax.f32 %v1931_v33, %v4341_v9  ;;  %v1932_v5 = vrot.slane %v6688_v49, 2  ;;  %v1933_v13 = vrot.slane %v6688_v49, 4 }
 0x152   : > { %v6727_v37 = vsel %vm1443_vm5, %v1438_v60, %v5143_v10  ;;  %v6732_v18 = vperm.slane %v2627_v55, 0  ;;  %v2885_v50 = vsel %vm7816_vm14, %v6644_v44, %v2884_v57  ;;  %v1934_v60 = vrot.slane %v6688_v49, 6 }
 0x153   : > { %686 = vrot.lane.b32.xlu0 %v6258_v52, %s5495_s24  ;;  %794 = vrot.lane.b32.xlu1 %v6347_v4, %s5497_s26  ;;  %v5108_v52 = vunpack.i.l.bf16 %v6647_v17  ;;  %v6704_v4 = vperm.slane %v2626_v43, 0  ;;  %v1524_v17 = vsel %vm1508_vm7, %v1491_v40, %v5104_v61  ;;  %v2886_v45 = vsel %vm2799_vm15, %v6662_v36, %v2885_v50  ;;  %s5505_s24 = smov 64   ;;  %s5507_s26 = smov 80  }
 0x154   : > { %v1557_v33 = vsel %vm1541_vm8, %v1524_v17, %v5109_v35  ;;  %v4342_v16 = vrot.slane %v6688_v49, 9  ;;  %v2628_v54 = vmax.f32 %v6612_v26, %v2508_v58  ;;  %v4343_v39 = vrot.slane %v1932_v5, 9 }
 0x155   : > { %v5117_v28 = vpop.permute.xlu0 %5116  ;;  %v6699_v2 = vpop.permute.xlu1 %5121  ;;  %v1556_v8 = vsel %vm1541_vm8, %v1523_v34, %v5108_v52  ;;  %v4344_v21 = vrot.slane %v1933_v13, 9  ;;  %v1590_v25 = vsel %vm1574_vm9, %v1557_v33, %v5114_v48  ;;  %v2887_v9 = vsel %vm2801_vm2, %v6704_v4, %v2886_v45 }
 0x156   : > { %5326 = vrot.lane.b32.xlu2 %v6533_v31, %s5498_s27  ;;  %v2952_v31 = vsel %vm2803_vm3, %v6704_v4, %v2951_v23  ;;  %v5118_v42 = vunpack.i.l.bf16 %v5117_v28  ;;  %v5119_v24 = vunpack.i.h.bf16 %v5117_v28  ;;  %v1589_v14 = vsel %vm1574_vm9, %v1556_v8, %v5113_v32 }
 0x157   : > { %v2953_v26 = vsel %vm7814_vm1, %v6732_v18, %v2952_v31  ;;  %v2875_v62 = vperm.slane %v2628_v54, 0  ;;  %v7854_v55 = vmov 0.0   ;;  %v2888_v34 = vsel %vm2803_vm3, %v6732_v18, %v2887_v9 }
 0x158   : > { %v6730_v38 = vpop.permute.xlu2 %5171  ;;  %v1622_v40 = vsel %vm1607_vm10, %v1589_v14, %v5118_v42  ;;  %v1623_v48 = vsel %vm1607_vm10, %v1590_v25, %v5119_v24  ;;  %v2798_v23 = vsel %vm7816_vm14, %v6634_v19, %v6629_v3  ;;  %v2513_v31 = vmax.f32 %v6688_v49, %v4342_v16 }
 0x159   : > { %v1788_v27 = vpop.f32.mrf.mxu0  ;;  %v6772_v58 = vsel %vm7813_vm4, %v2875_v62, %v2953_v26  ;;  %v2889_v54 = vsel %vm7814_vm1, %v2875_v62, %v2888_v34  ;;  %v2514_v24 = vmax.f32 %v1932_v5, %v4343_v39  ;;  %v5159_v14 = vunpack.i.h.bf16 %v6671_v59 }
 0x15a   : > { %v1789_v53 = vadd.f32 %v6397_v63, %v1788_v27  ;;  %v5158_v3 = vunpack.i.l.bf16 %v6671_v59  ;;  %v4345_v5 = vrot.slane %v1934_v60, 9  ;;  %v2800_v39 = vsel %vm2799_vm15, %v6638_v46, %v2798_v23  ;;  %v7855_v23 = vld [vmem:[#allocation10_spill] sm:$0xff] }
 0x15b   : > { %5331 = vrot.lane.b32.xlu0 %v6601_v41, %s5494_s23  ;;  %5336 = vrot.lane.b32.xlu1 %v6607_v0, %s5496_s25  ;;  %v2802_v46 = vsel %vm2801_vm2, %v6644_v44, %v2800_v39  ;;  %s5504_s23 = smov 32   ;;  %s5506_s25 = smov 48  }
 0x15c   : > { %v1859_v56 = vmax.f32 %v1789_v53, 0.0  ;;  %v2804_v34 = vsel %vm2803_vm3, %v6662_v36, %v2802_v46  ;;  %v2516_v44 = vmax.f32 %v1934_v60, %v4345_v5 }
 0x15d   : > { %v5132_v41 = vpop.permute.xlu0 %5131  ;;  %v6757_v43 = vpop.permute.xlu1 %5136  ;;  %v2806_v49 = vsel %vm7814_vm1, %v6704_v4, %v2804_v34  ;;  %v5173_v4 = vunpack.i.l.bf16 %v6730_v38 }
 0x15e   : > { %v1935_v61 = vrot.slane %v1859_v56, 2  ;;  %v1936_v10 = vrot.slane %v1859_v56, 4  ;;  %v1937_v0 = vrot.slane %v1859_v56, 6  ;;  %v4346_v7 = vrot.slane %v1859_v56, 9  ;;  %1192 = vrot.lane.b32.xlu2 %v7854_v55, %s5499_s28 }
 0x15f   : > { %v5134_v32 = vunpack.i.h.bf16 %v5132_v41  ;;  %v5133_v35 = vunpack.i.l.bf16 %v5132_v41  ;;  %v5340_v41 = vpack.i.bf16 %v6772_v58, %v7854_v55 }
 0x160   : > { %v4347_v52 = vrot.slane %v1935_v61, 9  ;;  %v4348_v28 = vrot.slane %v1936_v10, 9  ;;  %v4349_v8 = vrot.slane %v1937_v0, 9  ;;  %v2517_v27 = vmax.f32 %v1859_v56, %v4346_v7  ;;  %v6777_v53 = vpop.permute.xlu2 %5186 }
 0x161   : > { %v1790_v51 = vpop.f32.mrf.mxu0  ;;  %v1655_v57 = vsel %vm1640_vm11, %v1622_v40, %v5133_v35  ;;  %v1656_v17 = vsel %vm1640_vm11, %v1623_v48, %v5134_v32  ;;  %v2515_v32 = vmax.f32 %v1933_v13, %v4344_v21  ;;  %v5124_v35 = vunpack.i.h.bf16 %v6699_v2 }
 0x162   : > { %v2518_v50 = vmax.f32 %v1935_v61, %v4347_v52  ;;  %v2519_v33 = vmax.f32 %v1936_v10, %v4348_v28  ;;  %v1791_v45 = vadd.f32 %v6397_v63, %v1790_v51  ;;  %v1680_v42 = vpack.c.bf16 %v1656_v17, %v1655_v57 }
 0x163   : > { %1285 = vrot.lane.b32.xlu0 %v7854_v55, %s5500_s29  ;;  %1378 = vrot.lane.b32.xlu1 %v7854_v55, %s5501_s30  ;;  %v2629_v26 = vmax.f32 %v6679_v1, %v2517_v27  ;;  %v6803_v61 = vsel %vm7812_vm0, %v2889_v54, 0.0  ;;  %v5123_v51 = vunpack.i.l.bf16 %v6699_v2  ;;  %v5139_v2 = vunpack.i.h.bf16 %v6757_v43  ;;  %s5508_s29 = smov 112   ;;  %s5509_s30 = smov 96  }
 0x164   : > { %v2630_v19 = vmax.f32 %v6711_v30, %v2518_v50  ;;  %v1860_v56 = vmax.f32 %v1791_v45, 0.0  ;;  %4313 = vmatmul.msk.bf16.gmra.mxu0 %vm7811_vm12, %v1680_v42  ;;  %v2520_v30 = vmax.f32 %v1937_v0, %v4349_v8  ;;  %v2631_v9 = vmax.f32 %v6718_v20, %v2519_v33 }
 0x165   : > { %v6790_v16 = vpop.permute.xlu0 %5146  ;;  %v6792_v25 = vpop.permute.xlu1 %5151  ;;  %v5345_v52 = vpack.i.bf16 %v6803_v61, %v7854_v55  ;;  %v2748_v13 = vperm.slane %v2629_v26, 0  ;;  %vm7856_vm12 = vcmask 23552   ;;  %v5138_v33 = vunpack.i.l.bf16 %v6757_v43  ;;  %v7857_v43 = vld [vmem:[#allocation7_spill] sm:$0xff] }
 0x166   : > { %v1938_v10 = vrot.slane %v1860_v56, 2  ;;  %v1939_v7 = vrot.slane %v1860_v56, 4  ;;  %v4350_v40 = vrot.slane %v1860_v56, 9  ;;  %v6808_v62 = vperm.slane %v2630_v19, 0  ;;  %5341 = vrot.lane.b32.xlu2 %v5340_v41, %s5503_s22 }
 0x167   : > { %v1940_v48 = vrot.slane %v1860_v56, 6  ;;  %v2632_v28 = vmax.f32 %v6720_v6, %v2520_v30  ;;  %v6816_v21 = vperm.slane %v2631_v9, 0  ;;  %v1437_v8 = vsel %vm7856_vm12, %v7855_v23, %v5124_v35 }
 0x168   : > { %v4351_v1 = vrot.slane %v1938_v10, 9  ;;  %v4352_v20 = vrot.slane %v1939_v7, 9  ;;  %v2521_v0 = vmax.f32 %v1860_v56, %v4350_v40  ;;  %v6826_v6 = vpop.permute.xlu2 %5201  ;;  %v2955_v36 = vsel %vm2883_vm13, %v6808_v62, %v2748_v13 }
 0x169   : > { %v4353_v27 = vrot.slane %v1940_v48, 9  ;;  %v2751_v60 = vperm.slane %v2632_v28, 0  ;;  %v2956_v19 = vsel %vm7816_vm14, %v6816_v21, %v2955_v36  ;;  %v2809_v56 = vsel %vm7816_vm14, %v6808_v62, %v2748_v13 }
 0x16a   : > { %v2522_v57 = vmax.f32 %v1938_v10, %v4351_v1  ;;  %v2633_v17 = vmax.f32 %v2513_v31, %v2521_v0  ;;  %v2523_v50 = vmax.f32 %v1939_v7, %v4352_v20  ;;  %v5149_v41 = vunpack.i.h.bf16 %v6790_v16 }
 0x16b   : > { %5346 = vrot.lane.b32.xlu0 %v5345_v52, %s5504_s23  ;;  %v2524_v5 = vmax.f32 %v1940_v48, %v4353_v27  ;;  %v1432_v26 = vsel %vm7856_vm12, %v7857_v43, %v5123_v51  ;;  %v2808_v9 = vsel %vm7813_vm4, %v6732_v18, %v2806_v49  ;;  %v2957_v35 = vsel %vm2799_vm15, %v2751_v60, %v2956_v19 }
 0x16c   : > { %v2634_v42 = vmax.f32 %v2514_v24, %v2522_v57  ;;  %v2752_v54 = vperm.slane %v2633_v17, 0  ;;  %v2635_v39 = vmax.f32 %v2515_v32, %v2523_v50  ;;  %v5174_v24 = vunpack.i.h.bf16 %v6730_v38 }
 0x16d   : > { %v5162_v31 = vpop.permute.xlu0 %5161  ;;  %v5167_v45 = vpop.permute.xlu1 %5166  ;;  %v2636_v7 = vmax.f32 %v2516_v44, %v2524_v5  ;;  %v2810_v48 = vsel %vm2799_vm15, %v6816_v21, %v2809_v56  ;;  %v1464_v32 = vsel %vm1443_vm5, %v1432_v26, %v5138_v33  ;;  %v1469_v46 = vsel %vm1443_vm5, %v1437_v8, %v5139_v2 }
 0x16e   : > { %v2753_v30 = vperm.slane %v2634_v42, 0  ;;  %v2754_v40 = vperm.slane %v2635_v39, 0  ;;  %v5148_v1 = vunpack.i.l.bf16 %v6790_v16  ;;  %v2958_v20 = vsel %vm2801_vm2, %v2752_v54, %v2957_v35 }
 0x16f   : > { %v5189_v0 = vunpack.i.h.bf16 %v6777_v53  ;;  %v1497_v18 = vsel %vm1475_vm6, %v1464_v32, %v5149_v41  ;;  %v5153_v52 = vunpack.i.l.bf16 %v6792_v25  ;;  %v5154_v13 = vunpack.i.h.bf16 %v6792_v25 }
 0x170   : > { %v2959_v28 = vsel %vm2803_vm3, %v2753_v30, %v2958_v20  ;;  %v5163_v34 = vunpack.i.l.bf16 %v5162_v31  ;;  %v2811_v57 = vsel %vm2801_vm2, %v2751_v60, %v2810_v48  ;;  %v5188_v17 = vunpack.i.l.bf16 %v6777_v53  ;;  %v6863_v33 = vpop.permute.xlu2 %5216 }
 0x171   : > { %v1793_v10 = vpop.f32.mrf.mxu0  ;;  %v2960_v51 = vsel %vm7814_vm1, %v2754_v40, %v2959_v28  ;;  %v5164_v16 = vunpack.i.h.bf16 %v5162_v31  ;;  %v2876_v8 = vperm.slane %v2636_v7, 0  ;;  %v2812_v27 = vsel %vm2803_vm3, %v2752_v54, %v2811_v57 }
 0x172   : > { %v1496_v50 = vsel %vm1475_vm6, %v6682_v29, %v5148_v1  ;;  %v5169_v36 = vunpack.i.h.bf16 %v5167_v45  ;;  %v5168_v2 = vunpack.i.l.bf16 %v5167_v45  ;;  %vm7858_vm12 = vcmask 1040384  }
 0x173   : > { %v6866_v25 = vsel %vm7858_vm12, 0.0, %v2808_v9  ;;  %v1502_v42 = vsel %vm1475_vm6, %v1469_v46, %v5153_v52  ;;  %v1530_v31 = vsel %vm1508_vm7, %v1497_v18, %v5159_v14  ;;  %v6873_v49 = vsel %vm7813_vm4, %v2876_v8, %v2960_v51 }
 0x174   : > { %v2890_v29 = vsel %vm2883_vm13, %v6816_v21, %v6808_v62  ;;  %v1503_v45 = vsel %vm1475_vm6, %v6727_v37, %v5154_v13  ;;  %v1535_v19 = vsel %vm1508_vm7, %v1502_v42, %v5163_v34  ;;  %v1794_v56 = vadd.f32 %v6397_v63, %v1793_v10 }
 0x175   : > { %v5177_v44 = vpop.permute.xlu0 %5176  ;;  %v5182_v23 = vpop.permute.xlu1 %5181  ;;  %v2813_v41 = vsel %vm7814_vm1, %v2753_v30, %v2812_v27  ;;  %v5203_v5 = vunpack.i.l.bf16 %v6826_v6  ;;  %v1536_v14 = vsel %vm1508_vm7, %v1503_v45, %v5164_v16  ;;  %v1529_v39 = vsel %vm1508_vm7, %v1496_v50, %v5158_v3 }
 0x176   : > { %v5178_v43 = vunpack.i.l.bf16 %v5177_v44  ;;  %v1562_v62 = vsel %vm1541_vm8, %v1529_v39, %v5168_v2  ;;  %v1563_v21 = vsel %vm1541_vm8, %v1530_v31, %v5169_v36  ;;  %v5355_v37 = vpack.i.bf16 %v6873_v49, %v6772_v58 }
 0x177   : > { %v2891_v26 = vsel %vm7816_vm14, %v2751_v60, %v2890_v29  ;;  %v5179_v10 = vunpack.i.h.bf16 %v5177_v44  ;;  %v1568_v7 = vsel %vm1541_vm8, %v1535_v19, %v5173_v4  ;;  %v2814_v35 = vsel %vm7813_vm4, %v2754_v40, %v2813_v41 }
 0x178   : > { %v2892_v59 = vsel %vm2799_vm15, %v2752_v54, %v2891_v26  ;;  %v6896_v48 = vmax.f32 %v1794_v56, 0.0  ;;  %v5183_v3 = vunpack.i.l.bf16 %v5182_v23  ;;  %5356 = vrot.lane.b32.xlu2 %v5355_v37, %s5505_s24  ;;  %v6900_v32 = vsel %vm7858_vm12, 0.0, %v2814_v35 }
 0x179   : > { %v1795_v9 = vpop.f32.mrf.mxu0  ;;  %v2893_v58 = vsel %vm2801_vm2, %v2753_v30, %v2892_v59  ;;  %v1595_v60 = vsel %vm1574_vm9, %v1562_v62, %v5178_v43  ;;  %v5184_v46 = vunpack.i.h.bf16 %v5182_v23  ;;  %v5350_v4 = vpack.i.bf16 %v6900_v32, %v6866_v25  ;;  %v6920_v23 = vpop.permute.xlu2 %5231 }
 0x17a   : > { %v2894_v1 = vsel %vm2803_vm3, %v2754_v40, %v2893_v58  ;;  %v1796_v52 = vadd.f32 %v6397_v63, %v1795_v9  ;;  %v1596_v34 = vsel %vm1574_vm9, %v1563_v21, %v5179_v10  ;;  %v1569_v40 = vsel %vm1541_vm8, %v1536_v14, %v5174_v24 }
 0x17b   : > { %v2895_v18 = vsel %vm7814_vm1, %v2876_v8, %v2894_v1  ;;  %5351 = vrot.lane.b32.xlu1 %v5350_v4, %s5506_s25  ;;  %v1601_v16 = vsel %vm1574_vm9, %v1568_v7, %v5183_v3  ;;  %v1628_v8 = vsel %vm1607_vm10, %v1595_v60, %v5188_v17  ;;  %v5204_v27 = vunpack.i.h.bf16 %v6826_v6 }
 0x17c   : > { %v6912_v30 = vsel %vm7812_vm0, %v2895_v18, 0.0  ;;  %v1602_v50 = vsel %vm1574_vm9, %v1569_v40, %v5184_v46  ;;  %v1941_v38 = vrot.slane %v6896_v48, 2  ;;  %v6929_v24 = vmax.f32 %v1796_v52, 0.0 }
 0x17d   : > { %v5192_v54 = vpop.permute.xlu0 %5191  ;;  %v5197_v20 = vpop.permute.xlu1 %5196  ;;  %v5360_v44 = vpack.i.bf16 %v6912_v30, %v6803_v61  ;;  %v1629_v6 = vsel %vm1607_vm10, %v1596_v34, %v5189_v0  ;;  %v1942_v45 = vrot.slane %v6896_v48, 4  ;;  %v1943_v19 = vrot.slane %v6896_v48, 6 }
 0x17e   : > { %v5194_v28 = vunpack.i.h.bf16 %v5192_v54  ;;  %v5193_v13 = vunpack.i.l.bf16 %v5192_v54  ;;  %v5199_v51 = vunpack.i.h.bf16 %v5197_v20  ;;  %v5198_v57 = vunpack.i.l.bf16 %v5197_v20 }
 0x17f   : > { %5361 = vrot.lane.b32.xlu0 %v5360_v44, %s5507_s26  ;;  %v4354_v56 = vrot.slane %v6896_v48, 9  ;;  %v1459_v53 = vsel %vm1443_vm5, %v6651_v11, %v5144_v47  ;;  %v5219_v0 = vunpack.i.h.bf16 %v6863_v33  ;;  %v5218_v43 = vunpack.i.l.bf16 %v6863_v33 }
 0x180   : > { %v1634_v36 = vsel %vm1607_vm10, %v1601_v16, %v5193_v13  ;;  %v1661_v2 = vsel %vm1640_vm11, %v1628_v8, %v5198_v57  ;;  %v1635_v61 = vsel %vm1607_vm10, %v1602_v50, %v5194_v28  ;;  %v1662_v31 = vsel %vm1640_vm11, %v1629_v6, %v5199_v51  ;;  %v7861_v57 = vld [vmem:[#allocation5_spill] sm:$0xff] }
 0x181   : > { %v1667_v29 = vsel %vm1640_vm11, %v1634_v36, %v5203_v5  ;;  %v1683_v41 = vpack.c.bf16 %v1662_v31, %v1661_v2  ;;  %v4355_v62 = vrot.slane %v1941_v38, 9  ;;  %v1944_v21 = vrot.slane %v6929_v24, 2  ;;  %v6960_v20 = vpop.permute.xlu2 %5246  ;;  %v6969_v16 = vld [vmem:[%s7775_s2] ss:$0 sm:$0xff] }
 0x182   : > { %v1798_v42 = vpop.f32.mrf.mxu0  ;;  %vm7859_vm12 = vcmask 220160   ;;  %v4356_v9 = vrot.slane %v1942_v45, 9  ;;  %v4357_v10 = vrot.slane %v1943_v19, 9  ;;  %v2525_v7 = vmax.f32 %v6896_v48, %v4354_v56 }
 0x183   : > { %v1799_v17 = vadd.f32 %v6397_v63, %v1798_v42  ;;  %v1668_v63 = vsel %vm1640_vm11, %v1635_v61, %v5204_v27  ;;  %4316 = vmatmul.msk.bf16.gmra.mxu2 %vm7859_vm12, %v1683_v41  ;;  %vm7860_vm0 = vmmov %vm7859_vm12  ;;  %v2526_v46 = vmax.f32 %v1941_v38, %v4355_v62  ;;  %v1945_v4 = vrot.slane %v6929_v24, 4 }
 0x184   : > { %v1686_v22 = vpack.c.bf16 %v1668_v63, %v1667_v29  ;;  %v1946_v1 = vrot.slane %v6929_v24, 6  ;;  %v4358_v54 = vrot.slane %v6929_v24, 9  ;;  %v4359_v52 = vrot.slane %v1944_v21, 9 }
 0x185   : > { %v1863_v14 = vmax.f32 %v1799_v17, 0.0  ;;  %v6947_v39 = vpop.permute.xlu0 %5206  ;;  %v6949_v5 = vpop.permute.xlu1 %5211  ;;  %v1492_v34 = vsel %vm1475_vm6, %v1459_v53, %v5218_v43  ;;  %v2527_v51 = vmax.f32 %v1942_v45, %v4356_v9  ;;  %v2528_v8 = vmax.f32 %v1943_v19, %v4357_v10 }
 0x186   : > { %4319 = vmatmul.msk.bf16.gmra.mxu3 %vm7860_vm0, %v1686_v22  ;;  %v5208_v35 = vunpack.i.l.bf16 %v6947_v39  ;;  %v5213_v13 = vunpack.i.l.bf16 %v6949_v5  ;;  %vm7862_vm0 = vcmask 23552   ;;  %v4360_v61 = vrot.slane %v1945_v4, 9 }
 0x187   : > { %v1947_v37 = vrot.slane %v1863_v14, 2  ;;  %v1948_v26 = vrot.slane %v1863_v14, 4  ;;  %v1949_v11 = vrot.slane %v1863_v14, 6  ;;  %v4362_v47 = vrot.slane %v1863_v14, 9 }
 0x188   : > { %v1428_v40 = vsel %vm7862_vm0, %v7861_v57, %v5208_v35  ;;  %v2529_v42 = vmax.f32 %v6929_v24, %v4358_v54  ;;  %v2530_v31 = vmax.f32 %v1944_v21, %v4359_v52  ;;  %v4361_v56 = vrot.slane %v1946_v1, 9 }
 0x189   : > { %v4363_v59 = vrot.slane %v1947_v37, 9  ;;  %v4364_v3 = vrot.slane %v1948_v26, 9  ;;  %v4365_v58 = vrot.slane %v1949_v11, 9  ;;  %v2533_v60 = vmax.f32 %v1863_v14, %v4362_v47 }
 0x18a   : > { %v1800_v18 = vpop.f32.mrf.mxu0  ;;  %v1460_v45 = vsel %vm1443_vm5, %v1428_v40, %v5213_v13  ;;  %v2531_v9 = vmax.f32 %v1945_v4, %v4360_v61  ;;  %v2532_v10 = vmax.f32 %v1946_v1, %v4361_v56  ;;  %vm7863_vm12 = vcmask 1040384  }
 0x18b   : > { %v2534_v48 = vmax.f32 %v1947_v37, %v4363_v59  ;;  %v2535_v28 = vmax.f32 %v1948_v26, %v4364_v3  ;;  %v1801_v44 = vadd.f32 %v6969_v16, %v1800_v18  ;;  %v2536_v27 = vmax.f32 %v1949_v11, %v4365_v58 }
 0x18c   : > { %v2637_v50 = vmax.f32 %v2525_v7, %v2533_v60  ;;  %v6975_v7 = vpop.permute.xlu2 %5261  ;;  %v1493_v60 = vsel %vm1475_vm6, %v1460_v45, %v5219_v0  ;;  %v5234_v0 = vunpack.i.h.bf16 %v6920_v23  ;;  %vm7864_vm0 = vcmask 220160  }
 0x18d   : > { %v2638_v36 = vmax.f32 %v2526_v46, %v2534_v48  ;;  %v5222_v2 = vpop.permute.xlu0 %5221  ;;  %v5227_v38 = vpop.permute.xlu1 %5226  ;;  %v2639_v6 = vmax.f32 %v2527_v51, %v2535_v28  ;;  %v1864_v17 = vmax.f32 %v1801_v44, 0.0  ;;  %v2640_v19 = vmax.f32 %v2528_v8, %v2536_v27 }
 0x18e   : > { %v2755_v43 = vperm.slane %v2637_v50, 0  ;;  %v5224_v62 = vunpack.i.h.bf16 %v5222_v2  ;;  %v5223_v22 = vunpack.i.l.bf16 %v5222_v2  ;;  %v5228_v24 = vunpack.i.l.bf16 %v5227_v38 }
 0x18f   : > { %v2756_v29 = vperm.slane %v2638_v36, 0  ;;  %v1950_v41 = vrot.slane %v1864_v17, 2  ;;  %v1951_v53 = vrot.slane %v1864_v17, 4  ;;  %v1952_v14 = vrot.slane %v1864_v17, 6 }
 0x190   : > { %v4366_v63 = vrot.slane %v1864_v17, 9  ;;  %v2757_v37 = vperm.slane %v2639_v6, 0  ;;  %v1525_v46 = vsel %vm1508_vm7, %v1492_v34, %v5223_v22  ;;  %v5229_v54 = vunpack.i.h.bf16 %v5227_v38 }
 0x191   : > { %v4367_v26 = vrot.slane %v1950_v41, 9  ;;  %v4368_v11 = vrot.slane %v1951_v53, 9  ;;  %v2962_v21 = vsel %vm2883_vm13, %v2756_v29, %v2755_v43  ;;  %v4369_v3 = vrot.slane %v1952_v14, 9 }
 0x192   : > { %v2537_v47 = vmax.f32 %v1864_v17, %v4366_v63  ;;  %v2815_v58 = vsel %vm7816_vm14, %v2756_v29, %v2755_v43  ;;  %v2758_v1 = vperm.slane %v2640_v19, 0  ;;  %v1526_v28 = vsel %vm1508_vm7, %v1493_v60, %v5224_v62 }
 0x193   : > { %v2538_v35 = vmax.f32 %v1950_v41, %v4367_v26  ;;  %v2539_v4 = vmax.f32 %v1951_v53, %v4368_v11  ;;  %v2963_v13 = vsel %vm7816_vm14, %v2757_v37, %v2962_v21  ;;  %v2540_v51 = vmax.f32 %v1952_v14, %v4369_v3 }
 0x194   : > { %v2641_v59 = vmax.f32 %v2529_v42, %v2537_v47  ;;  %v2816_v33 = vsel %vm2799_vm15, %v2757_v37, %v2815_v58  ;;  %v5233_v34 = vunpack.i.l.bf16 %v6920_v23  ;;  %v1558_v44 = vsel %vm1541_vm8, %v1525_v46, %v5228_v24 }
 0x195   : > { %v5237_v18 = vpop.permute.xlu0 %5236  ;;  %v6982_v52 = vpop.permute.xlu1 %5241  ;;  %v2642_v57 = vmax.f32 %v2530_v31, %v2538_v35  ;;  %v2643_v40 = vmax.f32 %v2531_v9, %v2539_v4  ;;  %v2896_v8 = vsel %vm2883_vm13, %v2757_v37, %v2756_v29  ;;  %v2644_v27 = vmax.f32 %v2532_v10, %v2540_v51 }
 0x196   : > { %v2759_v48 = vperm.slane %v2641_v59, 0  ;;  %v2964_v2 = vsel %vm2799_vm15, %v2758_v1, %v2963_v13  ;;  %v1559_v38 = vsel %vm1541_vm8, %v1526_v28, %v5229_v54  ;;  %v5238_v61 = vunpack.i.l.bf16 %v5237_v18  ;;  %v7009_v37 = vpop.permute.xlu2 %5276 }
 0x197   : > { %v2760_v50 = vperm.slane %v2642_v57, 0  ;;  %v2761_v36 = vperm.slane %v2643_v40, 0  ;;  %v2817_v6 = vsel %vm2801_vm2, %v2758_v1, %v2816_v33  ;;  %v2877_v17 = vperm.slane %v2644_v27, 0  ;;  %v7866_v40 = vld [vmem:[#allocation18_spill] sm:$0xff] }
 0x198   : > { %v2965_v42 = vsel %vm2801_vm2, %v2759_v48, %v2964_v2  ;;  %v2818_v23 = vsel %vm2803_vm3, %v2759_v48, %v2817_v6  ;;  %v2897_v45 = vsel %vm7816_vm14, %v2758_v1, %v2896_v8  ;;  %v5239_v29 = vunpack.i.h.bf16 %v5237_v18 }
 0x199   : > { %v2966_v31 = vsel %vm2803_vm3, %v2760_v50, %v2965_v42  ;;  %v2819_v41 = vsel %vm7814_vm1, %v2760_v50, %v2818_v23  ;;  %v2898_v53 = vsel %vm2799_vm15, %v2759_v48, %v2897_v45  ;;  %v1591_v14 = vsel %vm1574_vm9, %v1558_v44, %v5233_v34  ;;  %v7868_v44 = vld [vmem:[#allocation19_spill] sm:$0xff]  ;;  %v7870_v42 = vld [vmem:[#allocation17_spill] sm:$0xff] }
 0x19a   : > { %v2967_v56 = vsel %vm7814_vm1, %v2761_v36, %v2966_v31  ;;  %v2820_v62 = vsel %vm7813_vm4, %v2761_v36, %v2819_v41  ;;  %v2899_v22 = vsel %vm2801_vm2, %v2760_v50, %v2898_v53  ;;  %v1592_v26 = vsel %vm1574_vm9, %v1559_v38, %v5234_v0 }
 0x19b   : > { %v7005_v43 = vsel %vm7813_vm4, %v2877_v17, %v2967_v56  ;;  %v1624_v11 = vsel %vm1607_vm10, %v1591_v14, %v5238_v61  ;;  %v7016_v10 = vsel %vm7863_vm12, 0.0, %v2820_v62  ;;  %v2900_v21 = vsel %vm2803_vm3, %v2761_v36, %v2899_v22  ;;  %v7871_v62 = vld [vmem:[#allocation20_spill] sm:$0xff] }
 0x19c   : > { %v5370_v9 = vpack.i.bf16 %v7005_v43, %v6873_v49  ;;  %v1625_v35 = vsel %vm1607_vm10, %v1592_v26, %v5239_v29  ;;  %v5365_v59 = vpack.i.bf16 %v7016_v10, %v6900_v32  ;;  %v2901_v60 = vsel %vm7814_vm1, %v2877_v17, %v2900_v21 }
 0x19d   : > { %v5252_v63 = vpop.permute.xlu0 %5251  ;;  %v7002_v19 = vpop.permute.xlu1 %5256  ;;  %vm7865_vm12 = vcmask 1046528   ;;  %v5209_v48 = vunpack.i.h.bf16 %v6947_v39  ;;  %v5248_v51 = vunpack.i.l.bf16 %v6960_v20  ;;  %v5214_v57 = vunpack.i.h.bf16 %v6949_v5 }
 0x19e   : > { %v5254_v47 = vunpack.i.h.bf16 %v5252_v63  ;;  %v5253_v24 = vunpack.i.l.bf16 %v5252_v63  ;;  %5371 = vrot.lane.b32.xlu2 %v5370_v9, %s5508_s29  ;;  %5376 = vrot.lane.b32.xlu0 %v5370_v9, %s5503_s22  ;;  %v7030_v18 = vsel %vm7865_vm12, %v2901_v60, 0.0  ;;  %v5292_v4 = vpop.permute.xlu2 %5291  ;;  %v5263_v0 = vunpack.i.l.bf16 %v6975_v7 }
 0x19f   : > { %5366 = vrot.lane.b32.xlu1 %v5365_v59, %s5509_s30  ;;  %v5380_v1 = vpack.i.bf16 %v7030_v18, %v6912_v30  ;;  %v5243_v34 = vunpack.i.l.bf16 %v6982_v52  ;;  %v5258_v27 = vunpack.i.l.bf16 %v7002_v19  ;;  %v5244_v38 = vunpack.i.h.bf16 %v6982_v52 }
 0x1a0   : > { %v1657_v3 = vsel %vm1640_vm11, %v1624_v11, %v5253_v24  ;;  %v1658_v58 = vsel %vm1640_vm11, %v1625_v35, %v5254_v47  ;;  %v5279_v61 = vunpack.i.h.bf16 %v7009_v37  ;;  %v5259_v17 = vunpack.i.h.bf16 %v7002_v19 }
 0x1a1   : > { %v1681_v49 = vpack.c.bf16 %v1658_v58, %v1657_v3  ;;  %v5278_v45 = vunpack.i.l.bf16 %v7009_v37  ;;  %v5294_v26 = vunpack.i.h.bf16 %v5292_v4  ;;  %v5293_v47 = vunpack.i.l.bf16 %v5292_v4 }
 0x1a2   : > { %vm7875_vm4 = vcmask 23552  }
 0x1a3   : > { %4314 = vmatmul.msk.bf16.gmra.mxu0 %vm7864_vm0, %v1681_v49  ;;  %vm7867_vm0 = vcmask 23552   ;;  %vm7876_vm1 = vmmov %vm7875_vm4 }
 0x1a4   : > { %v1433_v33 = vsel %vm7867_vm0, %v7866_v40, %v5209_v48  ;;  %vm7869_vm12 = vmmov %vm7867_vm0  ;;  %v1434_v6 = vsel %vm7867_vm0, %v7870_v42, %v5243_v34 }
 0x1a5   : > { %v5267_v46 = vpop.permute.xlu0 %5266  ;;  %v5272_v54 = vpop.permute.xlu1 %5271  ;;  %v1440_v8 = vsel %vm7869_vm12, %v7868_v44, %v5248_v51  ;;  %v1465_v2 = vsel %vm1443_vm5, %v1433_v33, %v5214_v57  ;;  %v1466_v29 = vsel %vm1443_vm5, %v1434_v6, %v5258_v27  ;;  %vm7872_vm12 = vmmov %vm7867_vm0  ;;  %vm7873_vm0 = vcmask 220160  }
 0x1a6   : > { %v5307_v50 = vpop.permute.xlu2 %5306  ;;  %v5269_v39 = vunpack.i.h.bf16 %v5267_v46  ;;  %v5268_v36 = vunpack.i.l.bf16 %v5267_v46  ;;  %v1472_v5 = vsel %vm1443_vm5, %v1440_v8, %v5263_v0  ;;  %v5274_v56 = vunpack.i.h.bf16 %v5272_v54 }
 0x1a7   : > { %5381 = vrot.lane.b32.xlu1 %v5380_v1, %s5504_s23  ;;  %v5273_v41 = vunpack.i.l.bf16 %v5272_v54  ;;  %v1439_v22 = vsel %vm7872_vm12, %v7871_v62, %v5244_v38  ;;  %v5309_v54 = vunpack.i.h.bf16 %v5307_v50  ;;  %v5308_v4 = vunpack.i.l.bf16 %v5307_v50  ;;  %v4665_v50 = vld [vmem:[%s7776_s3 + $0x40] sm:$0xff]  ;;  %vm7874_vm12 = vmmov %vm7873_vm0 }
 0x1a8   : > { %v1498_v53 = vsel %vm1475_vm6, %v1465_v2, %v5268_v36  ;;  %v1499_v52 = vsel %vm1475_vm6, %v1466_v29, %v5269_v39  ;;  %v1471_v24 = vsel %vm1443_vm5, %v1439_v22, %v5259_v17  ;;  %v1505_v21 = vsel %vm1475_vm6, %v1472_v5, %v5274_v56  ;;  %3390 = vmatpush.bf16.msrb.mxu2 %v4665_v50  ;;  %v1803_v22 = vpop.f32.mrf.mxu0 }
 0x1a9   : > { %v1504_v35 = vsel %vm1475_vm6, %v1471_v24, %v5273_v41  ;;  %v1531_v59 = vsel %vm1508_vm7, %v1498_v53, %v5278_v45  ;;  %v1532_v3 = vsel %vm1508_vm7, %v1499_v52, %v5279_v61  ;;  %v5249_v52 = vunpack.i.h.bf16 %v6960_v20 }
 0x1aa   : > { %v5264_v62 = vunpack.i.h.bf16 %v6975_v7 }
 0x1ad   : > { %v5282_v28 = vpop.permute.xlu0 %5281  ;;  %v5287_v13 = vpop.permute.xlu1 %5286 }
 0x1ae   : > { %v5284_v14 = vunpack.i.h.bf16 %v5282_v28  ;;  %v5283_v63 = vunpack.i.l.bf16 %v5282_v28  ;;  %v5289_v11 = vunpack.i.h.bf16 %v5287_v13  ;;  %v5288_v19 = vunpack.i.l.bf16 %v5287_v13  ;;  %v5322_v1 = vpop.permute.xlu2 %5321 }
 0x1af   : > { %v5324_v13 = vunpack.i.h.bf16 %v5322_v1  ;;  %v5323_v51 = vunpack.i.l.bf16 %v5322_v1 }
 0x1b0   : > { %v1537_v58 = vsel %vm1508_vm7, %v1504_v35, %v5283_v63  ;;  %v1538_v49 = vsel %vm1508_vm7, %v1505_v21, %v5284_v14  ;;  %v1564_v48 = vsel %vm1541_vm8, %v1531_v59, %v5288_v19  ;;  %v1565_v28 = vsel %vm1541_vm8, %v1532_v3, %v5289_v11 }
 0x1b1   : > { %v1570_v0 = vsel %vm1541_vm8, %v1537_v58, %v5293_v47  ;;  %v1571_v34 = vsel %vm1541_vm8, %v1538_v49, %v5294_v26  ;;  %v1441_v11 = vsel %vm7876_vm1, %v6294_v12, %v5249_v52  ;;  %vm7877_vm1 = vmmov %vm7874_vm12 }
 0x1b2   : > { %v1473_v7 = vsel %vm1443_vm5, %v1441_v11, %v5264_v62 }
 0x1b5   : > { %v5297_v31 = vpop.permute.xlu0 %5296  ;;  %v5302_v23 = vpop.permute.xlu1 %5301 }
 0x1b6   : > { %v5299_v37 = vunpack.i.h.bf16 %v5297_v31  ;;  %v5298_v9 = vunpack.i.l.bf16 %v5297_v31  ;;  %v5304_v60 = vunpack.i.h.bf16 %v5302_v23  ;;  %v5303_v46 = vunpack.i.l.bf16 %v5302_v23  ;;  %v5327_v14 = vpop.permute.xlu2 %5326 }
 0x1b7   : > { %v5328_v19 = vunpack.i.l.bf16 %v5327_v14  ;;  %v5329_v24 = vunpack.i.h.bf16 %v5327_v14 }
 0x1b8   : > { %v1597_v57 = vsel %vm1574_vm9, %v1564_v48, %v5298_v9  ;;  %v1598_v40 = vsel %vm1574_vm9, %v1565_v28, %v5299_v37  ;;  %v1603_v39 = vsel %vm1574_vm9, %v1570_v0, %v5303_v46  ;;  %v1604_v36 = vsel %vm1574_vm9, %v1571_v34, %v5304_v60  ;;  %v1805_v46 = vpop.f32.mrf.mxu0 }
 0x1b9   : > { %v1630_v42 = vsel %vm1607_vm10, %v1597_v57, %v5308_v4  ;;  %v1631_v6 = vsel %vm1607_vm10, %v1598_v40, %v5309_v54  ;;  %v3259_v9 = vpack.c.bf16 %v7030_v18, %v6912_v30  ;;  %v4664_v30 = vld [vmem:[%s7776_s3 + $0x38] sm:$0xff]  ;;  %v1804_v60 = vadd.f32 %v6969_v16, %v1803_v22 }
 0x1ba   : > { %3354 = vmatpush.bf16.msra.mxu1 %v4664_v30 }
 0x1bb   : > { %v1865_v40 = vmax.f32 %v1804_v60, 0.0 }
 0x1bd   : > { %v5312_v33 = vpop.permute.xlu0 %5311  ;;  %v5317_v27 = vpop.permute.xlu1 %5316  ;;  %v1954_v50 = vrot.slane %v1865_v40, 4 }
 0x1be   : > { %v5314_v44 = vunpack.i.h.bf16 %v5312_v33  ;;  %v5313_v8 = vunpack.i.l.bf16 %v5312_v33  ;;  %v5319_v2 = vunpack.i.h.bf16 %v5317_v27  ;;  %v5318_v38 = vunpack.i.l.bf16 %v5317_v27  ;;  %v1193_v1 = vpop.permute.xlu2 %1192 }
 0x1bf   : > { %v1953_v27 = vrot.slane %v1865_v40, 2 }
 0x1c0   : > { %v1636_v5 = vsel %vm1607_vm10, %v1603_v39, %v5313_v8  ;;  %v1637_v61 = vsel %vm1607_vm10, %v1604_v36, %v5314_v44  ;;  %v1663_v17 = vsel %vm1640_vm11, %v1630_v42, %v5318_v38  ;;  %v1664_v31 = vsel %vm1640_vm11, %v1631_v6, %v5319_v2  ;;  %v4662_v8 = vld [vmem:[%s7776_s3 + $0x28] sm:$0xff]  ;;  %v4661_v38 = vld [vmem:[%s7776_s3 + $0x20] sm:$0xff] }
 0x1c1   : > { %v1669_v23 = vsel %vm1640_vm11, %v1636_v5, %v5323_v51  ;;  %v1670_v45 = vsel %vm1640_vm11, %v1637_v61, %v5324_v13  ;;  %v1684_v29 = vpack.c.bf16 %v1664_v31, %v1663_v17  ;;  %v4663_v13 = vld [vmem:[%s7776_s3 + $0x30] sm:$0xff]  ;;  %v1806_v39 = vadd.f32 %v6969_v16, %v1805_v46 }
 0x1c2   : > { %v1687_v56 = vpack.c.bf16 %v1670_v45, %v1669_v23  ;;  %3355 = vmatpush.bf16.msra.mxu1 %v4663_v13  ;;  %v1955_v5 = vrot.slane %v1865_v40, 6  ;;  %v4370_v61 = vrot.slane %v1865_v40, 9  ;;  %v4371_v6 = vrot.slane %v1953_v27, 9 }
 0x1c3   : > { %4317 = vmatmul.msk.bf16.gmra.mxu2 %vm7873_vm0, %v1684_v29  ;;  %vm3195_vm0 = vcmask 130048   ;;  %v4372_v17 = vrot.slane %v1954_v50, 9  ;;  %v1866_v31 = vmax.f32 %v1806_v39, 0.0 }
 0x1c4   : > { %4320 = vmatmul.msk.bf16.gmra.mxu3 %vm7874_vm12, %v1687_v56  ;;  %v2542_v22 = vmax.f32 %v1953_v27, %v4371_v6  ;;  %vm3213_vm12 = vcmask 392192  }
 0x1c5   : > { %v687_v41 = vpop.permute.xlu0 %686  ;;  %v795_v53 = vpop.permute.xlu1 %794  ;;  %v1956_v11 = vrot.slane %v1866_v31, 2 }
 0x1c6   : > { %v1442_v26 = vsel %vm7875_vm4, %v6291_v15, %v687_v41  ;;  %v1506_v15 = vsel %vm1475_vm6, %v1473_v7, %v5328_v19  ;;  %3356 = vmatpush.bf16.msra.mxu1 %v4662_v8  ;;  %v4373_v41 = vrot.slane %v1955_v5, 9  ;;  %v1957_v19 = vrot.slane %v1866_v31, 4 }
 0x1c7   : > { %v1474_v20 = vsel %vm1443_vm5, %v1442_v26, %v795_v53  ;;  %v2541_v53 = vmax.f32 %v1865_v40, %v4370_v61  ;;  %v2543_v26 = vmax.f32 %v1954_v50, %v4372_v17  ;;  %vm7878_vm4 = vcmask 1046534  }
 0x1c8   : > { %v1507_v12 = vsel %vm1475_vm6, %v1474_v20, %v5329_v24  ;;  %v2544_v7 = vmax.f32 %v1955_v5, %v4373_v41  ;;  %vm7879_vm5 = vcmask 1047559   ;;  %vm7880_vm6 = vmmov %vm7878_vm4 }
 0x1ca   : > { %3357 = vmatpush.bf16.msra.mxu1 %v4661_v38 }
 0x1cd   : > { %v5332_v63 = vpop.permute.xlu0 %5331  ;;  %v5337_v47 = vpop.permute.xlu1 %5336 }
 0x1ce   : > { %v5333_v37 = vunpack.i.l.bf16 %v5332_v63  ;;  %v5334_v21 = vunpack.i.h.bf16 %v5332_v63  ;;  %v5338_v35 = vunpack.i.l.bf16 %v5337_v47  ;;  %v5339_v3 = vunpack.i.h.bf16 %v5337_v47 }
 0x1d0   : > { %v1539_v59 = vsel %vm1508_vm7, %v1506_v15, %v5333_v37  ;;  %v1540_v58 = vsel %vm1508_vm7, %v1507_v12, %v5334_v21  ;;  %v4374_v15 = vrot.slane %v1866_v31, 9  ;;  %vm7881_vm7 = vcmask 1040384  }
 0x1d1   : > { %v1572_v49 = vsel %vm1541_vm8, %v1539_v59, %v5338_v35  ;;  %v1573_v4 = vsel %vm1541_vm8, %v1540_v58, %v5339_v3  ;;  %v1958_v59 = vrot.slane %v1866_v31, 6  ;;  %v4375_v3 = vrot.slane %v1956_v11, 9  ;;  %vm7882_vm8 = vmmov %vm7879_vm5 }
 0x1d2   : > { %v1605_v28 = vsel %vm1574_vm9, %v1572_v49, %v1193_v1  ;;  %v1606_v51 = vsel %vm1574_vm9, %v1573_v4, %v1193_v1  ;;  %v4376_v58 = vrot.slane %v1957_v19, 9  ;;  %v2545_v13 = vmax.f32 %v1866_v31, %v4374_v15  ;;  %vm7883_vm9 = vmmov %vm7878_vm4 }
 0x1d3   : > { %4486 = vmatmul.msk.bf16.vlgmr.msrb.gmra.mxu2 %vm3195_vm0, %v3259_v9 }
 0x1d4   : > { %v2547_v8 = vmax.f32 %v1957_v19, %v4376_v58  ;;  %v4658_v58 = vld [vmem:[%s7776_s3 + $0x8] sm:$0xff] }
 0x1d5   : > { %v1286_v54 = vpop.permute.xlu0 %1285  ;;  %v1379_v48 = vpop.permute.xlu1 %1378 }
 0x1d6   : > { %v1638_v57 = vsel %vm1607_vm10, %v1605_v28, %v1286_v54  ;;  %v1639_v33 = vsel %vm1607_vm10, %v1606_v51, %v1286_v54  ;;  %vm7884_vm10 = vcmask 1046528  }
 0x1d7   : > { %v1671_v0 = vsel %vm1640_vm11, %v1638_v57, %v1379_v48  ;;  %v1672_v34 = vsel %vm1640_vm11, %v1639_v33, %v1379_v48  ;;  %v4377_v33 = vrot.slane %v1958_v59, 9  ;;  %vm3204_vm11 = vcmask 261120  }
 0x1d8   : > { %v1688_v44 = vpack.c.bf16 %v1672_v34, %v1671_v0  ;;  %v2546_v34 = vmax.f32 %v1956_v11, %v4375_v3 }
 0x1da   : > { %4321 = vmatmul.msk.bf16.gmra.mxu3 %vm7877_vm1, %v1688_v44  ;;  %vm3222_vm1 = vcmask 523264  }
 0x1e1   : > { %v1808_v36 = vpop.f32.mrf.mxu0 }
 0x1e2   : > { %v1809_v2 = vadd.f32 %v6969_v16, %v1808_v36 }
 0x1e4   : > { %v1867_v42 = vmax.f32 %v1809_v2, 0.0 }
 0x1e6   : > { %v1959_v23 = vrot.slane %v1867_v42, 2  ;;  %v1960_v45 = vrot.slane %v1867_v42, 4  ;;  %v1961_v29 = vrot.slane %v1867_v42, 6  ;;  %v4378_v56 = vrot.slane %v1867_v42, 9 }
 0x1e8   : > { %v4379_v52 = vrot.slane %v1959_v23, 9  ;;  %v4380_v14 = vrot.slane %v1960_v45, 9  ;;  %v4381_v63 = vrot.slane %v1961_v29, 9  ;;  %v2549_v62 = vmax.f32 %v1867_v42, %v4378_v56 }
 0x1e9   : > { %v1810_v47 = vpop.f32.mrf.mxu0 }
 0x1ea   : > { %v2550_v24 = vmax.f32 %v1959_v23, %v4379_v52  ;;  %v2551_v37 = vmax.f32 %v1960_v45, %v4380_v14  ;;  %v2552_v9 = vmax.f32 %v1961_v29, %v4381_v63  ;;  %v2645_v20 = vmax.f32 %v2541_v53, %v2549_v62 }
 0x1eb   : > { %v1811_v21 = vadd.f32 %v6969_v16, %v1810_v47  ;;  %v2548_v23 = vmax.f32 %v1958_v59, %v4377_v33 }
 0x1ec   : > { %v2646_v35 = vmax.f32 %v2542_v22, %v2550_v24  ;;  %v2647_v12 = vmax.f32 %v2543_v26, %v2551_v37  ;;  %v2648_v49 = vmax.f32 %v2544_v7, %v2552_v9  ;;  %v2762_v60 = vperm.slane %v2645_v20, 0  ;;  %v4660_v9 = vld [vmem:[%s7776_s3 + $0x18] sm:$0xff] }
 0x1ed   : > { %v1868_v30 = vmax.f32 %v1811_v21, 0.0  ;;  %3358 = vmatpush.bf16.msra.mxu1 %v4660_v9 }
 0x1ee   : > { %v2763_v46 = vperm.slane %v2646_v35, 0  ;;  %v2764_v54 = vperm.slane %v2647_v12, 0  ;;  %v2765_v50 = vperm.slane %v2648_v49, 0  ;;  %v4659_v35 = vld [vmem:[%s7776_s3 + $0x10] sm:$0xff]  ;;  %v7174_v49 = vpop.permute.xlu0 %5346 }
 0x1ef   : > { %v1962_v4 = vrot.slane %v1868_v30, 2  ;;  %v1963_v1 = vrot.slane %v1868_v30, 4  ;;  %v1964_v48 = vrot.slane %v1868_v30, 6  ;;  %v4382_v28 = vrot.slane %v1868_v30, 9 }
 0x1f0   : > { %v2821_v51 = vsel %vm7816_vm14, %v2763_v46, %v2762_v60  ;;  %v2969_v0 = vsel %vm2883_vm13, %v2763_v46, %v2762_v60  ;;  %v2902_v61 = vsel %vm2883_vm13, %v2764_v54, %v2763_v46  ;;  %v1818_v60 = vpop.f32.mrf.mxu2 }
 0x1f1   : > { %v4383_v57 = vrot.slane %v1962_v4, 9  ;;  %v4384_v40 = vrot.slane %v1963_v1, 9  ;;  %v2553_v44 = vmax.f32 %v1868_v30, %v4382_v28  ;;  %v4385_v27 = vrot.slane %v1964_v48, 9  ;;  %3359 = vmatpush.bf16.msra.mxu1 %v4659_v35  ;;  %v5342_v30 = vpop.permute.xlu2 %5341 }
 0x1f2   : > { %v2822_v2 = vsel %vm2799_vm15, %v2764_v54, %v2821_v51  ;;  %v2970_v5 = vsel %vm7816_vm14, %v2764_v54, %v2969_v0  ;;  %v2903_v53 = vsel %vm7816_vm14, %v2765_v50, %v2902_v61  ;;  %v5344_v46 = vunpack.i.h.bf16 %v5342_v30 }
 0x1f3   : > { %v2554_v39 = vmax.f32 %v1962_v4, %v4383_v57  ;;  %v2555_v36 = vmax.f32 %v1963_v1, %v4384_v40  ;;  %v2649_v38 = vmax.f32 %v2545_v13, %v2553_v44  ;;  %v2823_v31 = vsel %vm2801_vm2, %v2765_v50, %v2822_v2  ;;  %v1833_v57 = vpop.f32.mrf.mxu3 }
 0x1f4   : > { %v2556_v45 = vmax.f32 %v1964_v48, %v4385_v27  ;;  %v2971_v41 = vsel %vm2799_vm15, %v2765_v50, %v2970_v5  ;;  %v5343_v54 = vunpack.i.l.bf16 %v5342_v30  ;;  %v5349_v1 = vunpack.i.h.bf16 %v7174_v49 }
 0x1f5   : > { %v2650_v42 = vmax.f32 %v2546_v34, %v2554_v39  ;;  %v2651_v6 = vmax.f32 %v2547_v8, %v2555_v36  ;;  %v2766_v17 = vperm.slane %v2649_v38, 0  ;;  %3360 = vmatpush.bf16.msra.mxu1 %v4658_v58  ;;  %v5348_v48 = vunpack.i.l.bf16 %v7174_v49  ;;  %v4672_v49 = vld [vmem:[%s7778_s5 + $0x30] sm:$0xff] }
 0x1f6   : > { %v2652_v14 = vmax.f32 %v2548_v23, %v2556_v45  ;;  %v3197_v51 = vsel %vm3195_vm0, %v6866_v25, %v5344_v46  ;;  %v3196_v40 = vsel %vm3195_vm0, 0.0, %v5343_v54  ;;  %v5362_v0 = vpop.permute.xlu0 %5361  ;;  %v1819_v34 = vadd.f32 %v6969_v16, %v1818_v60 }
 0x1f7   : > { %v2767_v29 = vperm.slane %v2650_v42, 0  ;;  %v2768_v56 = vperm.slane %v2651_v6, 0  ;;  %v2824_v52 = vsel %vm2803_vm3, %v2766_v17, %v2823_v31  ;;  %v2972_v63 = vsel %vm2801_vm2, %v2766_v17, %v2971_v41 }
 0x1f8   : > { %v2904_v62 = vsel %vm2799_vm15, %v2766_v17, %v2903_v53  ;;  %v2878_v47 = vperm.slane %v2652_v14, 0  ;;  %v3206_v33 = vsel %vm3204_vm11, %v3197_v51, %v5349_v1  ;;  %v3205_v44 = vsel %vm3204_vm11, %v3196_v40, %v5348_v48  ;;  %v1820_v38 = vpop.f32.mrf.mxu2 }
 0x1f9   : > { %v2825_v22 = vsel %vm7878_vm4, %v2767_v29, %v2824_v52  ;;  %v2973_v26 = vsel %vm2803_vm3, %v2767_v29, %v2972_v63  ;;  %v2905_v11 = vsel %vm2801_vm2, %v2767_v29, %v2904_v62  ;;  %v5357_v4 = vpop.permute.xlu2 %5356  ;;  %v1834_v27 = vadd.f32 %v6969_v16, %v1833_v57 }
 0x1fa   : > { %v2826_v19 = vsel %vm7879_vm5, %v2768_v56, %v2825_v22  ;;  %v2974_v24 = vsel %vm7880_vm6, %v2768_v56, %v2973_v26  ;;  %v2906_v37 = vsel %vm2803_vm3, %v2768_v56, %v2905_v11  ;;  %v5359_v50 = vunpack.i.h.bf16 %v5357_v4 }
 0x1fb   : > { %v7147_v20 = vsel %vm7881_vm7, 0.0, %v2826_v19  ;;  %v7152_v7 = vsel %vm7882_vm8, %v2878_v47, %v2974_v24  ;;  %v2907_v15 = vsel %vm7883_vm9, %v2878_v47, %v2906_v37  ;;  %v5358_v39 = vunpack.i.l.bf16 %v5357_v4  ;;  %v1835_v4 = vpop.f32.mrf.mxu3  ;;  %vm7885_vm7 = vmmov %vm7883_vm9 }
 0x1fc   : > { %v5385_v21 = vpack.i.bf16 %v7147_v20, %v7016_v10  ;;  %v5390_v12 = vpack.i.bf16 %v7152_v7, %v7005_v43  ;;  %v7161_v59 = vsel %vm7884_vm10, %v2907_v15, 0.0  ;;  %v4657_v43 = vld [vmem:[%s7776_s3] sm:$0xff]  ;;  %v5364_v36 = vunpack.i.h.bf16 %v5362_v0  ;;  %vm7886_vm9 = vmmov %vm7885_vm7 }
 0x1fd   : > { %v5395_v3 = vpack.i.bf16 %v7161_v59, %v7030_v18  ;;  %3361 = vmatpush.bf16.msra.mxu1 %v4657_v43  ;;  %v5352_v18 = vpop.permute.xlu1 %5351  ;;  %vm3231_vm4 = vcmask 654336   ;;  %v5363_v5 = vunpack.i.l.bf16 %v5362_v0  ;;  %v1871_v6 = vmax.f32 %v1819_v34, 0.0 }
 0x1fe   : > { %5386 = vrot.lane.b32.xlu2 %v5385_v21, %s5506_s25  ;;  %5391 = vrot.lane.b32.xlu0 %v5390_v12, %s5505_s24  ;;  %v5354_v28 = vunpack.i.h.bf16 %v5352_v18  ;;  %v5353_v13 = vunpack.i.l.bf16 %v5352_v18  ;;  %vm3240_vm5 = vcmask 785408   ;;  %v7191_v31 = vmax.f32 %v1834_v27, 0.0 }
 0x1ff   : > { %5396 = vrot.lane.b32.xlu1 %v5395_v3, %s5507_s26  ;;  %vm7815_vm6 = vcmask 916480   ;;  %v1821_v45 = vadd.f32 %v6969_v16, %v1820_v38  ;;  %v1971_v63 = vrot.slane %v1871_v6, 2  ;;  %v1972_v26 = vrot.slane %v1871_v6, 4 }
 0x200   : > { %v3215_v8 = vsel %vm3213_vm12, %v3206_v33, %v5354_v28  ;;  %v3214_v25 = vsel %vm3213_vm12, %v3205_v44, %v5353_v13  ;;  %v1973_v11 = vrot.slane %v1871_v6, 6  ;;  %v4394_v47 = vrot.slane %v1871_v6, 9 }
 0x201   : > { %v3224_v61 = vsel %vm3222_vm1, %v3215_v8, %v5359_v50  ;;  %v5372_v42 = vpop.permute.xlu2 %5371  ;;  %v3223_v17 = vsel %vm3222_vm1, %v3214_v25, %v5358_v39  ;;  %v1989_v24 = vrot.slane %v7191_v31, 2  ;;  %v7201_v37 = vmax.f32 %v1821_v45, 0.0 }
 0x202   : > { %v3233_v29 = vsel %vm3231_vm4, %v3224_v61, %v5364_v36  ;;  %v5374_v56 = vunpack.i.h.bf16 %v5372_v42  ;;  %v3232_v53 = vsel %vm3231_vm4, %v3223_v17, %v5363_v5  ;;  %v5373_v52 = vunpack.i.l.bf16 %v5372_v42 }
 0x203   : > { %v4395_v35 = vrot.slane %v1971_v63, 9  ;;  %v1990_v12 = vrot.slane %v7191_v31, 4  ;;  %v1991_v3 = vrot.slane %v7191_v31, 6  ;;  %v4396_v58 = vrot.slane %v1972_v26, 9 }
 0x204   : > { %v4418_v43 = vrot.slane %v7191_v31, 9  ;;  %v4397_v60 = vrot.slane %v1973_v11, 9  ;;  %v2565_v18 = vmax.f32 %v1871_v6, %v4394_v47  ;;  %v4419_v46 = vrot.slane %v1989_v24, 9 }
 0x205   : > { %v1974_v54 = vrot.slane %v7201_v37, 2  ;;  %v2566_v57 = vmax.f32 %v1971_v63, %v4395_v35  ;;  %v7210_v40 = vrot.slane %v1990_v12, 9  ;;  %v7214_v33 = vrot.slane %v1991_v3, 9 }
 0x206   : > { %v1975_v0 = vrot.slane %v7201_v37, 4  ;;  %v2567_v50 = vmax.f32 %v1972_v26, %v4396_v58  ;;  %v4398_v25 = vrot.slane %v7201_v37, 9  ;;  %v1836_v36 = vadd.f32 %v6969_v16, %v1835_v4 }
 0x207   : > { %v4399_v39 = vrot.slane %v1974_v54, 9  ;;  %v2568_v6 = vmax.f32 %v1973_v11, %v4397_v60  ;;  %v7220_v17 = vmax.f32 %v7191_v31, %v4418_v43  ;;  %vm7887_vm10 = vcmask 1040384  }
 0x208   : > { %v7227_v63 = vmax.f32 %v1836_v36, 0.0 }
 0x211   : > { %v5367_v2 = vpop.permute.xlu1 %5366 }
 0x212   : > { %v5369_v23 = vunpack.i.h.bf16 %v5367_v2  ;;  %v5368_v41 = vunpack.i.l.bf16 %v5367_v2 }
 0x214   : > { %v3242_v14 = vsel %vm3240_vm5, %v3233_v29, %v5369_v23  ;;  %v3241_v62 = vsel %vm3240_vm5, %v3232_v53, %v5368_v41  ;;  %v7222_v23 = vmax.f32 %v1989_v24, %v4419_v46  ;;  %v1976_v29 = vrot.slane %v7201_v37, 6 }
 0x215   : > { %v3251_v22 = vsel %vm7815_vm6, %v3242_v14, %v5374_v56  ;;  %v3250_v19 = vsel %vm7815_vm6, %v3241_v62, %v5373_v52  ;;  %v4400_v56 = vrot.slane %v1975_v0, 9  ;;  %v2569_v52 = vmax.f32 %v7201_v37, %v4398_v25  ;;  %v1823_v37 = vpop.f32.mrf.mxu2  ;;  %vm7889_vm6 = vmmov %vm7886_vm9 }
 0x216   : > { %v3258_v9 = vpack.c.bf16 %v3251_v22, %v3250_v19  ;;  %v2570_v14 = vmax.f32 %v1974_v54, %v4399_v39  ;;  %v1838_v22 = vpop.f32.mrf.mxu3  ;;  %v4401_v43 = vrot.slane %v1976_v29, 9 }
 0x217   : > { %v2571_v35 = vmax.f32 %v1975_v0, %v4400_v56  ;;  %v1839_v60 = vadd.f32 %v6969_v16, %v1838_v22 }
 0x218   : > { %3362 = vmatmul.bf16.vlgmr.msra.gmra.mxu1 %v3258_v9 }
 0x219   : > { %v7237_v25 = vmax.f32 %v1839_v60, 0.0 }
 0x220   : > { %v1813_v21 = vpop.f32.mrf.mxu0 }
 0x221   : > { %v1814_v15 = vadd.f32 %v6969_v16, %v1813_v21 }
 0x223   : > { %v1869_v30 = vmax.f32 %v1814_v15, 0.0 }
 0x225   : > { %v1965_v1 = vrot.slane %v1869_v30, 2  ;;  %v1966_v28 = vrot.slane %v1869_v30, 4  ;;  %v1967_v13 = vrot.slane %v1869_v30, 6  ;;  %v4386_v51 = vrot.slane %v1869_v30, 9 }
 0x227   : > { %v4387_v34 = vrot.slane %v1965_v1, 9  ;;  %v4388_v44 = vrot.slane %v1966_v28, 9  ;;  %v4389_v8 = vrot.slane %v1967_v13, 9  ;;  %v2557_v27 = vmax.f32 %v1869_v30, %v4386_v51 }
 0x228   : > { %v1815_v2 = vpop.f32.mrf.mxu0 }
 0x229   : > { %v2558_v38 = vmax.f32 %v1965_v1, %v4387_v34  ;;  %v2559_v5 = vmax.f32 %v1966_v28, %v4388_v44  ;;  %v2560_v61 = vmax.f32 %v1967_v13, %v4389_v8  ;;  %v2653_v42 = vmax.f32 %v2557_v27, %v2565_v18 }
 0x22a   : > { %v1816_v45 = vadd.f32 %v6969_v16, %v1815_v2  ;;  %v1992_v44 = vrot.slane %v7227_v63, 2  ;;  %v1824_v8 = vadd.f32 %v6969_v16, %v1823_v37 }
 0x22b   : > { %v2654_v41 = vmax.f32 %v2558_v38, %v2566_v57  ;;  %v2655_v53 = vmax.f32 %v2559_v5, %v2567_v50  ;;  %v2656_v26 = vmax.f32 %v2560_v61, %v2568_v6  ;;  %v2769_v11 = vperm.slane %v2653_v42, 0 }
 0x22c   : > { %v1870_v62 = vmax.f32 %v1816_v45, 0.0  ;;  %v2572_v50 = vmax.f32 %v1976_v29, %v4401_v43  ;;  %v1993_v29 = vrot.slane %v7227_v63, 4 }
 0x22d   : > { %v2770_v19 = vperm.slane %v2654_v41, 0  ;;  %v2771_v47 = vperm.slane %v2655_v53, 0  ;;  %v2772_v4 = vperm.slane %v2656_v26, 0  ;;  %v1994_v53 = vrot.slane %v7227_v63, 6 }
 0x22e   : > { %v1968_v24 = vrot.slane %v1870_v62, 2  ;;  %v1969_v9 = vrot.slane %v1870_v62, 4  ;;  %v1970_v21 = vrot.slane %v1870_v62, 6  ;;  %v4390_v15 = vrot.slane %v1870_v62, 9 }
 0x22f   : > { %v2827_v58 = vsel %vm7816_vm14, %v2770_v19, %v2769_v11  ;;  %v2976_v30 = vsel %vm2883_vm13, %v2770_v19, %v2769_v11  ;;  %v2908_v13 = vsel %vm2883_vm13, %v2771_v47, %v2770_v19 }
 0x230   : > { %v4391_v18 = vrot.slane %v1968_v24, 9  ;;  %v4392_v46 = vrot.slane %v1969_v9, 9  ;;  %v2561_v54 = vmax.f32 %v1870_v62, %v4390_v15  ;;  %v2828_v1 = vsel %vm2799_vm15, %v2771_v47, %v2827_v58  ;;  %v1825_v15 = vpop.f32.mrf.mxu2 }
 0x231   : > { %v4393_v28 = vrot.slane %v1970_v21, 9  ;;  %v2977_v34 = vsel %vm7816_vm14, %v2771_v47, %v2976_v30  ;;  %v2829_v38 = vsel %vm2801_vm2, %v2772_v4, %v2828_v1  ;;  %v2909_v42 = vsel %vm7816_vm14, %v2772_v4, %v2908_v13 }
 0x232   : > { %v2562_v51 = vmax.f32 %v1968_v24, %v4391_v18  ;;  %v2657_v57 = vmax.f32 %v2561_v54, %v2569_v52  ;;  %v2563_v0 = vmax.f32 %v1969_v9, %v4392_v46  ;;  %v2978_v61 = vsel %vm2799_vm15, %v2772_v4, %v2977_v34 }
 0x233   : > { %v2564_v27 = vmax.f32 %v1970_v21, %v4393_v28  ;;  %v7246_v52 = vmax.f32 %v1824_v8, 0.0  ;;  %v1995_v47 = vrot.slane %v7237_v25, 2  ;;  %v4422_v46 = vrot.slane %v7227_v63, 9 }
 0x234   : > { %v2773_v39 = vperm.slane %v2657_v57, 0  ;;  %v2658_v36 = vmax.f32 %v2562_v51, %v2570_v14  ;;  %v2659_v2 = vmax.f32 %v2563_v0, %v2571_v35  ;;  %v1840_v14 = vpop.f32.mrf.mxu3  ;;  %v1996_v54 = vrot.slane %v7237_v25, 4 }
 0x235   : > { %v2660_v5 = vmax.f32 %v2564_v27, %v2572_v50  ;;  %v1841_v35 = vadd.f32 %v6969_v16, %v1840_v14  ;;  %v1997_v4 = vrot.slane %v7237_v25, 6  ;;  %v4423_v28 = vrot.slane %v1992_v44, 9 }
 0x236   : > { %v2774_v6 = vperm.slane %v2658_v36, 0  ;;  %v2775_v45 = vperm.slane %v2659_v2, 0  ;;  %v2830_v56 = vsel %vm2803_vm3, %v2773_v39, %v2829_v38  ;;  %v2979_v41 = vsel %vm2801_vm2, %v2773_v39, %v2978_v61 }
 0x237   : > { %v2910_v62 = vsel %vm2799_vm15, %v2773_v39, %v2909_v42  ;;  %v2879_v26 = vperm.slane %v2660_v5, 0  ;;  %v1977_v13 = vrot.slane %v7246_v52, 2  ;;  %v4426_v51 = vrot.slane %v7237_v25, 9 }
 0x238   : > { %v2831_v22 = vsel %vm7885_vm7, %v2774_v6, %v2830_v56  ;;  %v2980_v11 = vsel %vm2803_vm3, %v2774_v6, %v2979_v41  ;;  %v2911_v19 = vsel %vm2801_vm2, %v2774_v6, %v2910_v62  ;;  %vm7888_vm7 = vmmov %vm7882_vm8  ;;  %v1826_v57 = vadd.f32 %v6969_v16, %v1825_v15 }
 0x239   : > { %v2832_v24 = vsel %vm7882_vm8, %v2775_v45, %v2831_v22  ;;  %v2981_v9 = vsel %vm7886_vm9, %v2775_v45, %v2980_v11  ;;  %v2912_v21 = vsel %vm2803_vm3, %v2775_v45, %v2911_v19  ;;  %vm7890_vm8 = vcmask 1046528   ;;  %vm7891_vm9 = vmmov %vm7888_vm7 }
 0x23a   : > { %v7258_v58 = vsel %vm7887_vm10, 0.0, %v2832_v24  ;;  %v7261_v43 = vsel %vm7888_vm7, %v2879_v26, %v2981_v9  ;;  %v2913_v30 = vsel %vm7889_vm6, %v2879_v26, %v2912_v21  ;;  %v4425_v0 = vrot.slane %v1994_v53, 9  ;;  %vm7892_vm7 = vmmov %vm7889_vm6 }
 0x23b   : > { %v5400_v37 = vpack.i.bf16 %v7258_v58, %v7147_v20  ;;  %v5405_v60 = vpack.i.bf16 %v7261_v43, %v7152_v7  ;;  %v7269_v18 = vsel %vm7890_vm8, %v2913_v30, 0.0  ;;  %v4424_v7 = vrot.slane %v1993_v29, 9  ;;  %vm7893_vm8 = vmmov %vm7889_vm6 }
 0x23c   : > { %v3261_v1 = vpack.c.bf16 %v7269_v18, %v7161_v59  ;;  %v4427_v34 = vrot.slane %v1995_v47, 9  ;;  %v7281_v8 = vmax.f32 %v1841_v35, 0.0  ;;  %v2591_v27 = vmax.f32 %v1990_v12, %v7210_v40 }
 0x23d   : > { %5401 = vrot.lane.b32.xlu2 %v5400_v37, %s5509_s30  ;;  %5406 = vrot.lane.b32.xlu0 %v5405_v60, %s5508_s29  ;;  %v1978_v50 = vrot.slane %v7246_v52, 4  ;;  %v1979_v16 = vrot.slane %v7246_v52, 6  ;;  %v4402_v39 = vrot.slane %v7246_v52, 9  ;;  %v2592_v36 = vmax.f32 %v1991_v3, %v7214_v33 }
 0x23e   : > { %5411 = vrot.lane.b32.xlu1 %v5405_v60, %s5503_s22  ;;  %4487 = vmatmul.msk.bf16.gmra.mxu2 %vm3195_vm0, %v3261_v1  ;;  %v7295_v2 = vmax.f32 %v7227_v63, %v4422_v46  ;;  %v4428_v38 = vrot.slane %v1996_v54, 9  ;;  %v4429_v5 = vrot.slane %v1997_v4, 9  ;;  %v7297_v61 = vmax.f32 %v1992_v44, %v4423_v28 }
 0x23f   : > { %v4403_v42 = vrot.slane %v1977_v13, 9  ;;  %v2597_v12 = vmax.f32 %v7237_v25, %v4426_v51  ;;  %v7300_v40 = vmax.f32 %v1826_v57, 0.0  ;;  %v7302_v6 = vmax.f32 %v1993_v29, %v4424_v7 }
 0x240   : > { %v2598_v45 = vmax.f32 %v1995_v47, %v4427_v34  ;;  %v1998_v56 = vrot.slane %v7281_v8, 2  ;;  %v7305_v41 = vmax.f32 %v1994_v53, %v4425_v0  ;;  %v4404_v31 = vrot.slane %v1978_v50, 9 }
 0x241   : > { %v4405_v3 = vrot.slane %v1979_v16, 9  ;;  %v7308_v33 = vmax.f32 %v7246_v52, %v4402_v39  ;;  %v5435_v63 = vpack.i.bf16 %v7269_v18, %v7161_v59  ;;  %v2599_v44 = vmax.f32 %v1996_v54, %v4428_v38 }
 0x242   : > { %v2600_v14 = vmax.f32 %v1997_v4, %v4429_v5  ;;  %v1999_v25 = vrot.slane %v7281_v8, 4  ;;  %v4430_v29 = vrot.slane %v7281_v8, 9  ;;  %v2574_v62 = vmax.f32 %v1977_v13, %v4403_v42 }
 0x243   : > { %v2669_v22 = vmax.f32 %v7220_v17, %v2597_v12  ;;  %v1980_v53 = vrot.slane %v7300_v40, 2  ;;  %v1981_v26 = vrot.slane %v7300_v40, 4  ;;  %v2670_v52 = vmax.f32 %v7222_v23, %v2598_v45  ;;  %v7327_v17 = vld [vmem:[%s7775_s2] ss:$0 sm:$0xff] }
 0x244   : > { %v4406_v11 = vrot.slane %v7300_v40, 9  ;;  %v2000_v59 = vrot.slane %v7281_v8, 6  ;;  %v4431_v19 = vrot.slane %v1998_v56, 9  ;;  %v2575_v24 = vmax.f32 %v1978_v50, %v4404_v31 }
 0x245   : > { %5436 = vrot.lane.b32.xlu2 %v5435_v63, %s5504_s23  ;;  %v7321_v9 = vmax.f32 %v1979_v16, %v4405_v3  ;;  %v1982_v21 = vrot.slane %v7300_v40, 6  ;;  %v2671_v35 = vmax.f32 %v2591_v27, %v2599_v44  ;;  %v2672_v23 = vmax.f32 %v2592_v36, %v2600_v14 }
 0x246   : > { %v1828_v47 = vpop.f32.mrf.mxu2  ;;  %v4432_v30 = vrot.slane %v1999_v25, 9  ;;  %v2601_v37 = vmax.f32 %v7281_v8, %v4430_v29  ;;  %v2783_v60 = vperm.slane %v2669_v22, 0  ;;  %v4407_v46 = vrot.slane %v1980_v53, 9 }
 0x247   : > { %v1829_v15 = vadd.f32 %v7327_v17, %v1828_v47  ;;  %v4408_v54 = vrot.slane %v1981_v26, 9  ;;  %v2784_v1 = vperm.slane %v2670_v52, 0  ;;  %v7332_v28 = vmax.f32 %v7300_v40, %v4406_v11 }
 0x248   : > { %v4433_v13 = vrot.slane %v2000_v59, 9  ;;  %v2602_v51 = vmax.f32 %v1998_v56, %v4431_v19  ;;  %v2785_v50 = vperm.slane %v2671_v35, 0  ;;  %v7334_v27 = vperm.slane %v2672_v23, 0  ;;  %v1843_v19 = vpop.f32.mrf.mxu3 }
 0x249   : > { %v1875_v4 = vmax.f32 %v1829_v15, 0.0  ;;  %v2603_v16 = vmax.f32 %v1999_v25, %v4432_v30  ;;  %v2673_v8 = vmax.f32 %v7295_v2, %v2601_v37  ;;  %v2839_v42 = vsel %vm7816_vm14, %v2784_v1, %v2783_v60 }
 0x24a   : > { %v2578_v12 = vmax.f32 %v1980_v53, %v4407_v46  ;;  %v4409_v45 = vrot.slane %v1982_v21, 9  ;;  %v2604_v56 = vmax.f32 %v2000_v59, %v4433_v13  ;;  %v2674_v44 = vmax.f32 %v7297_v61, %v2602_v51 }
 0x24b   : > { %v1983_v57 = vrot.slane %v1875_v4, 2  ;;  %v1984_v7 = vrot.slane %v1875_v4, 4  ;;  %v1985_v0 = vrot.slane %v1875_v4, 6  ;;  %v4410_v34 = vrot.slane %v1875_v4, 9 }
 0x24c   : > { %v2990_v14 = vsel %vm2883_vm13, %v2784_v1, %v2783_v60  ;;  %v2787_v25 = vperm.slane %v2673_v8, 0  ;;  %v2579_v29 = vmax.f32 %v1981_v26, %v4408_v54  ;;  %v2675_v53 = vmax.f32 %v7302_v6, %v2603_v16 }
 0x24d   : > { %v4411_v39 = vrot.slane %v1983_v57, 9  ;;  %v4412_v36 = vrot.slane %v1984_v7, 9  ;;  %v4413_v38 = vrot.slane %v1985_v0, 9  ;;  %v2581_v5 = vmax.f32 %v1875_v4, %v4410_v34 }
 0x24e   : > { %v1830_v40 = vpop.f32.mrf.mxu2  ;;  %v2580_v59 = vmax.f32 %v1982_v21, %v4409_v45  ;;  %v2676_v15 = vmax.f32 %v7305_v41, %v2604_v56  ;;  %v7345_v23 = vperm.slane %v2674_v44, 0  ;;  %v2840_v30 = vsel %vm2799_vm15, %v2785_v50, %v2839_v42 }
 0x24f   : > { %v2582_v31 = vmax.f32 %v1983_v57, %v4411_v39  ;;  %v2583_v3 = vmax.f32 %v1984_v7, %v4412_v36  ;;  %v2661_v63 = vmax.f32 %v7308_v33, %v2581_v5  ;;  %v1831_v2 = vadd.f32 %v7327_v17, %v1830_v40 }
 0x250   : > { %v2584_v22 = vmax.f32 %v1985_v0, %v4413_v38  ;;  %v2920_v33 = vsel %vm2883_vm13, %v2785_v50, %v2784_v1  ;;  %v7350_v46 = vperm.slane %v2675_v53, 0  ;;  %v7355_v51 = vperm.slane %v2676_v15, 0 }
 0x251   : > { %v2662_v52 = vmax.f32 %v2574_v62, %v2582_v31  ;;  %v2663_v11 = vmax.f32 %v2575_v24, %v2583_v3  ;;  %v1876_v47 = vmax.f32 %v1831_v2, 0.0  ;;  %v2776_v35 = vperm.slane %v2661_v63, 0  ;;  %v1845_v3 = vpop.f32.mrf.mxu3 }
 0x252   : > { %v2664_v24 = vmax.f32 %v7321_v9, %v2584_v22  ;;  %v2921_v41 = vsel %vm7816_vm14, %v7334_v27, %v2920_v33  ;;  %v2841_v57 = vsel %vm2801_vm2, %v7334_v27, %v2840_v30  ;;  %v2991_v9 = vsel %vm7816_vm14, %v2785_v50, %v2990_v14 }
 0x253   : > { %v2777_v61 = vperm.slane %v2662_v52, 0  ;;  %v2778_v37 = vperm.slane %v2663_v11, 0  ;;  %v1986_v26 = vrot.slane %v1876_v47, 2  ;;  %v1987_v60 = vrot.slane %v1876_v47, 4 }
 0x254   : > { %v4414_v62 = vrot.slane %v1876_v47, 9  ;;  %v2922_v1 = vsel %vm2799_vm15, %v2787_v25, %v2921_v41  ;;  %v1988_v13 = vrot.slane %v1876_v47, 6  ;;  %v2779_v8 = vperm.slane %v2664_v24, 0 }
 0x255   : > { %v2833_v6 = vsel %vm7816_vm14, %v2777_v61, %v2776_v35  ;;  %v4415_v21 = vrot.slane %v1986_v26, 9  ;;  %v4416_v54 = vrot.slane %v1987_v60, 9  ;;  %v1844_v39 = vadd.f32 %v7327_v17, %v1843_v19 }
 0x256   : > { %v2585_v4 = vmax.f32 %v1876_v47, %v4414_v62  ;;  %v2834_v16 = vsel %vm2799_vm15, %v2778_v37, %v2833_v6  ;;  %v2923_v36 = vsel %vm2801_vm2, %v7345_v23, %v2922_v1  ;;  %v2842_v38 = vsel %vm2803_vm3, %v2787_v25, %v2841_v57 }
 0x257   : > { %v2586_v7 = vmax.f32 %v1986_v26, %v4415_v21  ;;  %v2587_v34 = vmax.f32 %v1987_v60, %v4416_v54  ;;  %v2983_v40 = vsel %vm2883_vm13, %v2777_v61, %v2776_v35  ;;  %v2914_v50 = vsel %vm2883_vm13, %v2778_v37, %v2777_v61 }
 0x258   : > { %v2665_v0 = vmax.f32 %v7332_v28, %v2585_v4  ;;  %v2835_v28 = vsel %vm2801_vm2, %v2779_v8, %v2834_v16  ;;  %v4417_v56 = vrot.slane %v1988_v13, 9  ;;  %v2992_v31 = vsel %vm2799_vm15, %v7334_v27, %v2991_v9 }
 0x259   : > { %v2666_v42 = vmax.f32 %v2578_v12, %v2586_v7  ;;  %v2667_v45 = vmax.f32 %v2579_v29, %v2587_v34  ;;  %v2924_v14 = vsel %vm2803_vm3, %v7350_v46, %v2923_v36  ;;  %v2993_v12 = vsel %vm2801_vm2, %v2787_v25, %v2992_v31 }
 0x25a   : > { %v2780_v5 = vperm.slane %v2665_v0, 0  ;;  %v2588_v22 = vmax.f32 %v1988_v13, %v4417_v56  ;;  %v2984_v52 = vsel %vm7816_vm14, %v2778_v37, %v2983_v40  ;;  %v2915_v29 = vsel %vm7816_vm14, %v2779_v8, %v2914_v50 }
 0x25b   : > { %v2781_v63 = vperm.slane %v2666_v42, 0  ;;  %v2782_v2 = vperm.slane %v2667_v45, 0  ;;  %v7377_v11 = vmax.f32 %v1844_v39, 0.0  ;;  %v2985_v27 = vsel %vm2799_vm15, %v2779_v8, %v2984_v52 }
 0x25c   : > { %v2836_v44 = vsel %vm2803_vm3, %v2780_v5, %v2835_v28  ;;  %v2916_v19 = vsel %vm2799_vm15, %v2780_v5, %v2915_v29  ;;  %v2668_v15 = vmax.f32 %v2580_v59, %v2588_v22  ;;  %v2986_v33 = vsel %vm2801_vm2, %v2780_v5, %v2985_v27 }
 0x25d   : > { %v2837_v53 = vsel %vm7889_vm6, %v2781_v63, %v2836_v44  ;;  %v2917_v25 = vsel %vm2801_vm2, %v2781_v63, %v2916_v19  ;;  %v2987_v61 = vsel %vm2803_vm3, %v2781_v63, %v2986_v33  ;;  %v2843_v37 = vsel %vm7892_vm7, %v7345_v23, %v2842_v38  ;;  %vm7895_vm7 = vmmov %vm7891_vm9  ;;  %v1848_v57 = vpop.f32.mrf.mxu3 }
 0x25e   : > { %v2838_v47 = vsel %vm7891_vm9, %v2782_v2, %v2837_v53  ;;  %v2918_v30 = vsel %vm2803_vm3, %v2782_v2, %v2917_v25  ;;  %v2880_v60 = vperm.slane %v2668_v15, 0  ;;  %v2988_v59 = vsel %vm7893_vm8, %v2782_v2, %v2987_v61 }
 0x25f   : > { %v7386_v35 = vsel %vm7887_vm10, 0.0, %v2838_v47  ;;  %v2925_v62 = vsel %vm7889_vm6, %v7355_v51, %v2924_v14  ;;  %v2001_v24 = vrot.slane %v7377_v11, 2  ;;  %v2002_v6 = vrot.slane %v7377_v11, 4  ;;  %vm7894_vm10 = vmmov %vm7889_vm6 }
 0x260   : > { %v5415_v26 = vpack.i.bf16 %v7386_v35, %v7258_v58  ;;  %v1846_v41 = vadd.f32 %v7327_v17, %v1845_v3  ;;  %v2994_v21 = vsel %vm2803_vm3, %v7345_v23, %v2993_v12  ;;  %v2989_v54 = vsel %vm7891_vm9, %v2880_v60, %v2988_v59  ;;  %vm7898_vm9 = vmmov %vm7894_vm10 }
 0x261   : > { %v2919_v4 = vsel %vm7894_vm10, %v2880_v60, %v2918_v30  ;;  %v2844_v1 = vsel %vm7895_vm7, %v7350_v46, %v2843_v37  ;;  %v2003_v13 = vrot.slane %v7377_v11, 6  ;;  %v5425_v9 = vpack.i.bf16 %v2989_v54, %v7261_v43 }
 0x262   : > { %5416 = vrot.lane.b32.xlu0 %v5415_v26, %s5506_s25  ;;  %vm7896_vm8 = vcmask 1046528   ;;  %v1849_v23 = vadd.f32 %v7327_v17, %v1848_v57  ;;  %v2995_v8 = vsel %vm7898_vm9, %v7350_v46, %v2994_v21  ;;  %v4434_v39 = vrot.slane %v7377_v11, 9 }
 0x263   : > { %v7410_v7 = vsel %vm7896_vm8, %v2919_v4, 0.0  ;;  %vm7897_vm6 = vmmov %vm7896_vm8  ;;  %v4435_v43 = vrot.slane %v2001_v24, 9  ;;  %v4436_v36 = vrot.slane %v2002_v6, 9  ;;  %v1882_v38 = vmax.f32 %v1846_v41, 0.0  ;;  %5426 = vrot.lane.b32.xlu1 %v5425_v9, %s5505_s24 }
 0x264   : > { %v7413_v0 = vsel %vm7897_vm6, %v2925_v62, 0.0  ;;  %v5440_v16 = vpack.i.bf16 %v7410_v7, %v7269_v18  ;;  %v1883_v5 = vmax.f32 %v1849_v23, 0.0  ;;  %vm7899_vm10 = vcmask 1040384   ;;  %vm7900_vm8 = vmmov %vm7898_vm9 }
 0x265   : > { %v3263_v34 = vpack.c.bf16 %v7413_v0, %v7410_v7  ;;  %v7427_v42 = vsel %vm7899_vm10, 0.0, %v2844_v1  ;;  %v4437_v40 = vrot.slane %v2003_v13, 9  ;;  %v7433_v46 = vsel %vm7895_vm7, %v7355_v51, %v2995_v8  ;;  %v1850_v51 = vpop.f32.mrf.mxu3  ;;  %vm7901_vm6 = vmmov %vm7900_vm8 }
 0x266   : > { %5441 = vrot.lane.b32.xlu2 %v5440_v16, %s5507_s26  ;;  %v5420_v18 = vpack.i.bf16 %v7427_v42, %v7386_v35  ;;  %v2007_v50 = vrot.slane %v1883_v5, 2  ;;  %v2008_v45 = vrot.slane %v1883_v5, 4  ;;  %v2009_v28 = vrot.slane %v1883_v5, 6  ;;  %vm7902_vm9 = vmmov %vm7895_vm7 }
 0x267   : > { %4488 = vmatmul.msk.bf16.gmra.mxu2 %vm3195_vm0, %v3263_v34  ;;  %v4442_v56 = vrot.slane %v1883_v5, 9  ;;  %v2605_v31 = vmax.f32 %v7377_v11, %v4434_v39  ;;  %v2606_v3 = vmax.f32 %v2001_v24, %v4435_v43  ;;  %v2607_v63 = vmax.f32 %v2002_v6, %v4436_v36  ;;  %vm7903_vm10 = vmmov %vm7895_vm7 }
 0x268   : > { %v2004_v44 = vrot.slane %v1882_v38, 2  ;;  %v4443_v14 = vrot.slane %v2007_v50, 9  ;;  %v4444_v12 = vrot.slane %v2008_v45, 9  ;;  %v4445_v2 = vrot.slane %v2009_v28, 9 }
 0x269   : > { %v2613_v22 = vmax.f32 %v1883_v5, %v4442_v56  ;;  %v2005_v52 = vrot.slane %v1882_v38, 4  ;;  %v2006_v29 = vrot.slane %v1882_v38, 6  ;;  %v4438_v53 = vrot.slane %v1882_v38, 9 }
 0x26a   : > { %5421 = vrot.lane.b32.xlu0 %v5420_v18, %s5509_s30  ;;  %v5430_v27 = vpack.i.bf16 %v7433_v46, %v2989_v54  ;;  %v2614_v19 = vmax.f32 %v2007_v50, %v4443_v14  ;;  %v2615_v47 = vmax.f32 %v2008_v45, %v4444_v12  ;;  %v1851_v11 = vadd.f32 %v7327_v17, %v1850_v51 }
 0x26b   : > { %v2677_v15 = vmax.f32 %v2605_v31, %v2613_v22  ;;  %v2608_v33 = vmax.f32 %v2003_v13, %v4437_v40  ;;  %v2616_v25 = vmax.f32 %v2009_v28, %v4445_v2  ;;  %v4439_v37 = vrot.slane %v2004_v44, 9 }
 0x26c   : > { %5431 = vrot.lane.b32.xlu1 %v5430_v27, %s5508_s29  ;;  %v2678_v61 = vmax.f32 %v2606_v3, %v2614_v19  ;;  %v2679_v30 = vmax.f32 %v2607_v63, %v2615_v47  ;;  %v4440_v26 = vrot.slane %v2005_v52, 9  ;;  %v4441_v60 = vrot.slane %v2006_v29, 9 }
 0x26d   : > { %v1884_v59 = vmax.f32 %v1851_v11, 0.0  ;;  %v2609_v62 = vmax.f32 %v1882_v38, %v4438_v53  ;;  %v2790_v24 = vperm.slane %v2677_v15, 0  ;;  %v5450_v41 = vpack.i.bf16 %v7413_v0, %v7410_v7 }
 0x26e   : > { %5446 = vrot.lane.b32.xlu2 %v5430_v27, %s5503_s22  ;;  %v2791_v6 = vperm.slane %v2678_v61, 0  ;;  %v2680_v1 = vmax.f32 %v2608_v33, %v2616_v25  ;;  %v2792_v13 = vperm.slane %v2679_v30, 0  ;;  %v2610_v39 = vmax.f32 %v2004_v44, %v4439_v37 }
 0x26f   : > { %v2010_v21 = vrot.slane %v1884_v59, 2  ;;  %v2011_v17 = vrot.slane %v1884_v59, 4  ;;  %v2012_v54 = vrot.slane %v1884_v59, 6  ;;  %v4446_v4 = vrot.slane %v1884_v59, 9 }
 0x270   : > { %v2845_v57 = vsel %vm7816_vm14, %v2791_v6, %v2790_v24  ;;  %v3084_v9 = vsel %vm2883_vm13, %v2791_v6, %v2790_v24  ;;  %v2611_v43 = vmax.f32 %v2005_v52, %v4440_v26  ;;  %v2612_v36 = vmax.f32 %v2006_v29, %v4441_v60 }
 0x271   : > { %v4447_v23 = vrot.slane %v2010_v21, 9  ;;  %v4448_v34 = vrot.slane %v2011_v17, 9  ;;  %v4449_v16 = vrot.slane %v2012_v54, 9  ;;  %v2617_v8 = vmax.f32 %v1884_v59, %v4446_v4  ;;  %v5387_v4 = vpop.permute.xlu2 %5386 }
 0x272   : > { %5451 = vrot.lane.b32.xlu0 %v5450_v41, %s5504_s23  ;;  %v2793_v18 = vperm.slane %v2680_v1, 0  ;;  %v3085_v50 = vsel %vm7816_vm14, %v2792_v13, %v3084_v9  ;;  %v2846_v45 = vsel %vm2799_vm15, %v2792_v13, %v2845_v57  ;;  %v2926_v14 = vsel %vm2883_vm13, %v2792_v13, %v2791_v6  ;;  %v5377_v41 = vpop.permute.xlu0 %5376 }
 0x273   : > { %v2618_v7 = vmax.f32 %v2010_v21, %v4447_v23  ;;  %v2619_v38 = vmax.f32 %v2011_v17, %v4448_v34  ;;  %v2681_v5 = vmax.f32 %v2609_v62, %v2617_v8  ;;  %v2620_v40 = vmax.f32 %v2012_v54, %v4449_v16  ;;  %v5382_v21 = vpop.permute.xlu1 %5381  ;;  %v3392_v17 = vpop.f32.mrf.mxu2 }
 0x274   : > { %v3086_v63 = vsel %vm2799_vm15, %v2793_v18, %v3085_v50  ;;  %v2847_v22 = vsel %vm2801_vm2, %v2793_v18, %v2846_v45  ;;  %v2927_v29 = vsel %vm7816_vm14, %v2793_v18, %v2926_v14  ;;  %vm7904_vm7 = vcmask 1040384   ;;  %vm7905_vm14 = vmmov %vm7901_vm6 }
 0x275   : > { %v2682_v28 = vmax.f32 %v2610_v39, %v2618_v7  ;;  %v2794_v56 = vperm.slane %v2681_v5, 0  ;;  %v2683_v31 = vmax.f32 %v2611_v43, %v2619_v38  ;;  %v2684_v3 = vmax.f32 %v2612_v36, %v2620_v40 }
 0x276   : > { %v3164_v24 = vperm.slane %v7854_v55, 0  ;;  %v5379_v13 = vunpack.i.h.bf16 %v5377_v41  ;;  %v5378_v57 = vunpack.i.l.bf16 %v5377_v41  ;;  %v5384_v23 = vunpack.i.h.bf16 %v5382_v21 }
 0x277   : > { %v2795_v44 = vperm.slane %v2682_v28, 0  ;;  %v2796_v12 = vperm.slane %v2683_v31, 0  ;;  %v3087_v2 = vsel %vm2801_vm2, %v2794_v56, %v3086_v63  ;;  %v2848_v52 = vsel %vm2803_vm3, %v2794_v56, %v2847_v22 }
 0x278   : > { %v2882_v53 = vperm.slane %v2684_v3, 0  ;;  %v2928_v19 = vsel %vm2799_vm15, %v2794_v56, %v2927_v29  ;;  %v5383_v34 = vunpack.i.l.bf16 %v5382_v21  ;;  %v5389_v16 = vunpack.i.h.bf16 %v5387_v4 }
 0x279   : > { %v3088_v51 = vsel %vm2803_vm3, %v2795_v44, %v3087_v2  ;;  %v2849_v27 = vsel %vm7900_vm8, %v2795_v44, %v2848_v52  ;;  %v2929_v11 = vsel %vm2801_vm2, %v2795_v44, %v2928_v19  ;;  %vm7906_vm8 = vcmask 1046528  }
 0x27a   : > { %v3089_v47 = vsel %vm7901_vm6, %v2796_v12, %v3088_v51  ;;  %v2850_v15 = vsel %vm7902_vm9, %v2796_v12, %v2849_v27  ;;  %v2930_v61 = vsel %vm2803_vm3, %v2796_v12, %v2929_v11  ;;  %v5388_v8 = vunpack.i.l.bf16 %v5387_v4 }
 0x27b   : > { %v3090_v33 = vsel %vm7903_vm10, %v2882_v53, %v3089_v47  ;;  %v2866_v25 = vsel %vm7904_vm7, 0.0, %v2850_v15  ;;  %v2931_v26 = vsel %vm7905_vm14, %v2882_v53, %v2930_v61  ;;  %v3199_v43 = vsel %vm3195_vm0, %v7016_v10, %v5379_v13  ;;  %v5397_v5 = vpop.permute.xlu1 %5396  ;;  %v3394_v3 = vpop.f32.mrf.mxu2 }
 0x27c   : > { %v5460_v30 = vpack.i.bf16 %v3090_v33, %v7433_v46  ;;  %v5455_v37 = vpack.i.bf16 %v2866_v25, %v7427_v42  ;;  %v2947_v60 = vsel %vm7906_vm8, %v2931_v26, 0.0  ;;  %v5475_v46 = vpack.i.bf16 %v3164_v24, %v3090_v33 }
 0x27d   : > { %v3265_v59 = vpack.c.bf16 0.0, %v2947_v60  ;;  %v5465_v62 = vpack.i.bf16 %v2947_v60, %v7413_v0  ;;  %v5470_v6 = vpack.i.bf16 0.0, %v2866_v25  ;;  %v7481_v0 = vld [vmem:[%s7777_s4] ss:$0 sm:$0xff]  ;;  %v3198_v36 = vsel %vm3195_vm0, %v6900_v32, %v5378_v57 }
 0x27e   : > { %5461 = vrot.lane.b32.xlu2 %v5460_v30, %s5505_s24  ;;  %5456 = vrot.lane.b32.xlu1 %v5455_v37, %s5506_s25  ;;  %v3208_v40 = vsel %vm3204_vm11, %v3199_v43, %v5384_v23  ;;  %v3207_v18 = vsel %vm3204_vm11, %v3198_v36, %v5383_v34  ;;  %v5399_v10 = vunpack.i.h.bf16 %v5397_v5  ;;  %v5398_v63 = vunpack.i.l.bf16 %v5397_v5 }
 0x27f   : > { %4489 = vmatmul.msk.bf16.gmra.mxu2 %vm3195_vm0, %v3265_v59  ;;  %5466 = vrot.lane.b32.xlu0 %v5465_v62, %s5507_s26  ;;  %v3216_v45 = vsel %vm3213_vm12, %v3207_v18, %v5388_v8  ;;  %v3217_v28 = vsel %vm3213_vm12, %v3208_v40, %v5389_v16  ;;  %vm7907_vm14 = vcmask 916480   ;;  %vm3680_vm3 = vcmask 1042432   ;;  %s382_s26 = scalar_lea.vmem %s7784_s11, %s7930_s18 }
 0x280   : > { %vm7908_vm2 = vmmov %vm7907_vm14  ;;  %vm7909_vm6 = vcmask 1042434  }
 0x281   : > { %vm7910_vm9 = vmmov %vm7909_vm6 }
 0x282   : > { %vm7911_vm10 = vmmov %vm7909_vm6 }
 0x283   : > { %vm7912_vm8 = vmmov %vm7908_vm2 }
 0x286   : > { %5476 = vrot.lane.b32.xlu2 %v5475_v46, %s5508_s29  ;;  %5471 = vrot.lane.b32.xlu1 %v5470_v6, %s5509_s30 }
 0x28e   : > { %3706 = vrot.lane.b32.xlu1 %v7854_v55, %s5505_s24  ;;  %3769 = vrot.lane.b32.xlu2 %v3164_v24, %s5509_s30  ;;  %v5392_v55 = vpop.permute.xlu0 %5391 }
 0x28f   : > { %v5394_v7 = vunpack.i.h.bf16 %v5392_v55  ;;  %v5393_v38 = vunpack.i.l.bf16 %v5392_v55 }
 0x291   : > { %v3225_v44 = vsel %vm3222_vm1, %v3216_v45, %v5393_v38  ;;  %v3226_v12 = vsel %vm3222_vm1, %v3217_v28, %v5394_v7 }
 0x292   : > { %v3234_v27 = vsel %vm3231_vm4, %v3225_v44, %v5398_v63  ;;  %v3235_v19 = vsel %vm3231_vm4, %v3226_v12, %v5399_v10 }
 0x295   : > { %v3363_v54 = vpop.f32.mrf.mxu1 }
 0x296   : > { %v3364_v1 = vadd.f32 %v7481_v0, %v3363_v54 }
 0x297   : > { %v5402_v56 = vpop.permute.xlu2 %5401 }
 0x298   : > { %v3393_v9 = vadd.f32 %v3392_v17, %v3364_v1  ;;  %v5404_v52 = vunpack.i.h.bf16 %v5402_v56  ;;  %v5403_v29 = vunpack.i.l.bf16 %v5402_v56 }
 0x29a   : > { %v3412_v39 = vmax.f32 %v3393_v9, 0.0  ;;  %v3243_v60 = vsel %vm3240_vm5, %v3234_v27, %v5403_v29  ;;  %v3244_v59 = vsel %vm3240_vm5, %v3235_v19, %v5404_v52 }
 0x29c   : > { %v3428_v14 = vrot.slane %v3412_v39, 2  ;;  %v3429_v32 = vrot.slane %v3412_v39, 4  ;;  %v4490_v22 = vrot.slane %v3412_v39, 9  ;;  %v3430_v53 = vrot.slane %v3412_v39, 6 }
 0x29d   : > { %v3365_v50 = vpop.f32.mrf.mxu1 }
 0x29e   : > { %v3366_v31 = vadd.f32 %v7481_v0, %v3365_v50  ;;  %v4491_v47 = vrot.slane %v3428_v14, 9  ;;  %v4492_v15 = vrot.slane %v3429_v32, 9  ;;  %v4493_v37 = vrot.slane %v3430_v53, 9 }
 0x29f   : > { %v3572_v26 = vmax.f32 %v3412_v39, %v4490_v22 }
 0x2a0   : > { %v3395_v2 = vadd.f32 %v3394_v3, %v3366_v31  ;;  %v3573_v21 = vmax.f32 %v3428_v14, %v4491_v47  ;;  %v3574_v17 = vmax.f32 %v3429_v32, %v4492_v15  ;;  %v3575_v9 = vmax.f32 %v3430_v53, %v4493_v37  ;;  %v5437_v32 = vpop.permute.xlu2 %5436 }
 0x2a1   : > { %v5439_v22 = vunpack.i.h.bf16 %v5437_v32  ;;  %v5438_v52 = vunpack.i.l.bf16 %v5437_v32 }
 0x2a2   : > { %v3413_v51 = vmax.f32 %v3395_v2, 0.0 }
 0x2a4   : > { %v3431_v11 = vrot.slane %v3413_v51, 2  ;;  %v4494_v33 = vrot.slane %v3413_v51, 9  ;;  %v3432_v25 = vrot.slane %v3413_v51, 4  ;;  %v3433_v61 = vrot.slane %v3413_v51, 6 }
 0x2a6   : > { %v4495_v46 = vrot.slane %v3431_v11, 9  ;;  %v4496_v6 = vrot.slane %v3432_v25, 9  ;;  %v4497_v41 = vrot.slane %v3433_v61, 9  ;;  %v3576_v54 = vmax.f32 %v3413_v51, %v4494_v33 }
 0x2a8   : > { %v3577_v4 = vmax.f32 %v3431_v11, %v4495_v46  ;;  %v3578_v1 = vmax.f32 %v3432_v25, %v4496_v6  ;;  %v3579_v23 = vmax.f32 %v3433_v61, %v4497_v41  ;;  %v3604_v34 = vmax.f32 %v3572_v26, %v3576_v54 }
 0x2aa   : > { %v3605_v55 = vmax.f32 %v3573_v21, %v3577_v4  ;;  %v3606_v16 = vmax.f32 %v3574_v17, %v3578_v1  ;;  %v3607_v39 = vmax.f32 %v3575_v9, %v3579_v23  ;;  %v3632_v43 = vperm.slane %v3604_v34, 0 }
 0x2ac   : > { %v3633_v36 = vperm.slane %v3605_v55, 0  ;;  %v3634_v7 = vperm.slane %v3606_v16, 0  ;;  %v3664_v38 = vperm.slane %v3607_v39, 0 }
 0x2ae   : > { %v3685_v5 = vsel %vm2883_vm13, %v3633_v36, %v3632_v43  ;;  %v3668_v40 = vsel %vm2883_vm13, %v3634_v7, %v3633_v36  ;;  %v3644_v56 = vsel %vm7911_vm10, %v3633_v36, %v3632_v43 }
 0x2af   : > { %v5407_v30 = vpop.permute.xlu0 %5406  ;;  %v3686_v18 = vsel %vm7909_vm6, %v3634_v7, %v3685_v5  ;;  %v3669_v50 = vsel %vm7910_vm9, %v3664_v38, %v3668_v40  ;;  %v3645_v31 = vsel %vm2799_vm15, %v3634_v7, %v3644_v56  ;;  %vm7919_vm9 = vmmov %vm7904_vm7 }
 0x2b0   : > { %v5409_v62 = vunpack.i.h.bf16 %v5407_v30  ;;  %v5408_v24 = vunpack.i.l.bf16 %v5407_v30  ;;  %v7506_v45 = vsel %vm2799_vm15, %v3664_v38, %v3686_v18  ;;  %v3681_v28 = vsel %vm3680_vm3, %v3669_v50, 0.0  ;;  %v5412_v10 = vpop.permute.xlu1 %5411 }
 0x2b1   : > { %3694 = vrot.lane.b32.xlu2 %v7506_v45, %s5504_s23  ;;  %3742 = vrot.lane.b32.xlu0 %v3681_v28, %s5504_s23  ;;  %v7516_v3 = vsel %vm7904_vm7, 0.0, %v3645_v31  ;;  %v5414_v63 = vunpack.i.h.bf16 %v5412_v10  ;;  %v5413_v14 = vunpack.i.l.bf16 %v5412_v10 }
 0x2b2   : > { %v3252_v13 = vsel %vm7907_vm14, %v3243_v60, %v5408_v24  ;;  %v3253_v57 = vsel %vm7908_vm2, %v3244_v59, %v5409_v62  ;;  %vm7913_vm14 = vmmov %vm7908_vm2 }
 0x2b3   : > { %v3260_v8 = vpack.c.bf16 %v3253_v57, %v3252_v13  ;;  %v3201_v44 = vsel %vm3195_vm0, %v7258_v58, %v5414_v63  ;;  %v3200_v12 = vsel %vm3195_vm0, %v7147_v20, %v5413_v14 }
 0x2b4   : > { %v3209_v51 = vsel %vm3204_vm11, %v3200_v12, %v5438_v52  ;;  %v3210_v27 = vsel %vm3204_vm11, %v3201_v44, %v5439_v22 }
 0x2b5   : > { %3367 = vmatmul.bf16.gmra.mxu1 %v3260_v8 }
 0x2b9   : > { %3708 = vrot.lane.b32.xlu0 %v3681_v28, %s5505_s24 }
 0x2c0   : > { %v5442_v58 = vpop.permute.xlu2 %5441 }
 0x2c1   : > { %3722 = vrot.lane.b32.xlu0 %v7516_v3, %s5509_s30  ;;  %v5444_v61 = vunpack.i.h.bf16 %v5442_v58  ;;  %v5443_v30 = vunpack.i.l.bf16 %v5442_v58 }
 0x2c8   : > { %v5447_v1 = vpop.permute.xlu2 %5446 }
 0x2c9   : > { %v5449_v9 = vunpack.i.h.bf16 %v5447_v1  ;;  %v5448_v23 = vunpack.i.l.bf16 %v5447_v1 }
 0x2cb   : > { %v3203_v43 = vsel %vm3195_vm0, %v7427_v42, %v5449_v9  ;;  %v3202_v36 = vsel %vm3195_vm0, %v7386_v35, %v5448_v23  ;;  %vm7914_vm0 = vmmov %vm7908_vm2 }
 0x2d4   : > { %v5417_v2 = vpop.permute.xlu0 %5416 }
 0x2d5   : > { %v5419_v29 = vunpack.i.h.bf16 %v5417_v2  ;;  %v5418_v53 = vunpack.i.l.bf16 %v5417_v2  ;;  %v5427_v19 = vpop.permute.xlu1 %5426 }
 0x2d6   : > { %v5429_v11 = vunpack.i.h.bf16 %v5427_v19  ;;  %v5428_v33 = vunpack.i.l.bf16 %v5427_v19  ;;  %v3397_v19 = vpop.f32.mrf.mxu2 }
 0x2d7   : > { %v3218_v47 = vsel %vm3213_vm12, %v3209_v51, %v5418_v53  ;;  %v3219_v15 = vsel %vm3213_vm12, %v3210_v27, %v5419_v29 }
 0x2d8   : > { %v3227_v25 = vsel %vm3222_vm1, %v3218_v47, %v5428_v33  ;;  %v3228_v20 = vsel %vm3222_vm1, %v3219_v15, %v5429_v11  ;;  %v5462_v57 = vpop.permute.xlu2 %5461 }
 0x2d9   : > { %v3236_v59 = vsel %vm3231_vm4, %v3227_v25, %v5443_v30  ;;  %v3237_v62 = vsel %vm3231_vm4, %v3228_v20, %v5444_v61  ;;  %v5464_v50 = vunpack.i.h.bf16 %v5462_v57  ;;  %v5463_v28 = vunpack.i.l.bf16 %v5462_v57 }
 0x2dc   : > { %v5422_v37 = vpop.permute.xlu0 %5421 }
 0x2dd   : > { %v5424_v26 = vunpack.i.h.bf16 %v5422_v37  ;;  %v5423_v60 = vunpack.i.l.bf16 %v5422_v37 }
 0x2de   : > { %v5432_v24 = vpop.permute.xlu1 %5431  ;;  %v3399_v20 = vpop.f32.mrf.mxu2 }
 0x2df   : > { %v3245_v46 = vsel %vm3240_vm5, %v3236_v59, %v5423_v60  ;;  %v3246_v6 = vsel %vm3240_vm5, %v3237_v62, %v5424_v26  ;;  %v5434_v41 = vunpack.i.h.bf16 %v5432_v24  ;;  %v5433_v21 = vunpack.i.l.bf16 %v5432_v24 }
 0x2e0   : > { %v5477_v10 = vpop.permute.xlu2 %5476 }
 0x2e1   : > { %v3254_v17 = vsel %vm7912_vm8, %v3245_v46, %v5433_v21  ;;  %v3255_v54 = vsel %vm7913_vm14, %v3246_v6, %v5434_v41  ;;  %v5479_v44 = vunpack.i.h.bf16 %v5477_v10  ;;  %v5478_v12 = vunpack.i.l.bf16 %v5477_v10  ;;  %vm7923_vm14 = vmmov %vm7919_vm9 }
 0x2e2   : > { %v3262_v4 = vpack.c.bf16 %v3255_v54, %v3254_v17 }
 0x2e4   : > { %3372 = vmatmul.bf16.gmra.mxu1 %v3262_v4  ;;  %v5452_v13 = vpop.permute.xlu0 %5451 }
 0x2e5   : > { %v5454_v34 = vunpack.i.h.bf16 %v5452_v13  ;;  %v5453_v55 = vunpack.i.l.bf16 %v5452_v13 }
 0x2e7   : > { %v3212_v7 = vsel %vm3204_vm11, %v3203_v43, %v5454_v34  ;;  %v3211_v38 = vsel %vm3204_vm11, %v3202_v36, %v5453_v55 }
 0x2f0   : > { %v5457_v16 = vpop.permute.xlu1 %5456 }
 0x2f1   : > { %v5459_v8 = vunpack.i.h.bf16 %v5457_v16  ;;  %v5458_v39 = vunpack.i.l.bf16 %v5457_v16  ;;  %v5467_v5 = vpop.permute.xlu0 %5466 }
 0x2f2   : > { %v5469_v56 = vunpack.i.h.bf16 %v5467_v5  ;;  %v5468_v31 = vunpack.i.l.bf16 %v5467_v5 }
 0x2f3   : > { %v3221_v40 = vsel %vm3213_vm12, %v3212_v7, %v5459_v8  ;;  %v3220_v18 = vsel %vm3213_vm12, %v3211_v38, %v5458_v39  ;;  %vm7915_vm12 = vmmov %vm7914_vm0 }
 0x2f4   : > { %v3229_v63 = vsel %vm3222_vm1, %v3220_v18, %v5463_v28  ;;  %v3230_v42 = vsel %vm3222_vm1, %v3221_v40, %v5464_v50 }
 0x2f5   : > { %v3238_v2 = vsel %vm3231_vm4, %v3229_v63, %v5468_v31  ;;  %v3239_v22 = vsel %vm3231_vm4, %v3230_v42, %v5469_v56  ;;  %vm7916_vm4 = vmmov %vm7909_vm6 }
 0x2f6   : > { %vm7917_vm2 = vmmov %vm7916_vm4 }
 0x2f7   : > { %vm7918_vm6 = vmmov %vm7917_vm2 }
 0x2f8   : > { %v5472_v14 = vpop.permute.xlu1 %5471  ;;  %vm7920_vm10 = vmmov %vm7917_vm2 }
 0x2f9   : > { %v5474_v35 = vunpack.i.h.bf16 %v5472_v14  ;;  %v5473_v32 = vunpack.i.l.bf16 %v5472_v14  ;;  %vm7921_vm7 = vmmov %vm7917_vm2 }
 0x2fa   : > { %vm7922_vm8 = vmmov %vm7917_vm2 }
 0x2fb   : > { %v3247_v52 = vsel %vm3240_vm5, %v3238_v2, %v5473_v32  ;;  %v3248_v29 = vsel %vm3240_vm5, %v3239_v22, %v5474_v35  ;;  %v3402_v32 = vpop.f32.mrf.mxu2 }
 0x2fc   : > { %v3256_v53 = vsel %vm7914_vm0, %v3247_v52, %v5478_v12  ;;  %v3257_v51 = vsel %vm7915_vm12, %v3248_v29, %v5479_v44  ;;  %vm7924_vm0 = vmmov %vm7917_vm2 }
 0x2fd   : > { %v3264_v27 = vpack.c.bf16 %v3257_v51, %v3256_v53  ;;  %vm7925_vm12 = vmmov %vm7924_vm0 }
 0x2ff   : > { %3377 = vmatmul.bf16.gmra.mxu1 %v3264_v27 }
 0x303   : > { %v3404_v53 = vpop.f32.mrf.mxu2 }
 0x332   : > { %v3368_v47 = vpop.f32.mrf.mxu1 }
 0x333   : > { %v3369_v15 = vadd.f32 %v7481_v0, %v3368_v47 }
 0x335   : > { %v3398_v11 = vadd.f32 %v3397_v19, %v3369_v15 }
 0x337   : > { %v3414_v33 = vmax.f32 %v3398_v11, 0.0 }
 0x339   : > { %v3434_v61 = vrot.slane %v3414_v33, 2  ;;  %v3435_v30 = vrot.slane %v3414_v33, 4  ;;  %v3436_v37 = vrot.slane %v3414_v33, 6  ;;  %v4498_v60 = vrot.slane %v3414_v33, 9 }
 0x33a   : > { %v3370_v58 = vpop.f32.mrf.mxu1 }
 0x33b   : > { %v3371_v25 = vadd.f32 %v7481_v0, %v3370_v58  ;;  %v4499_v62 = vrot.slane %v3434_v61, 9  ;;  %v4500_v24 = vrot.slane %v3435_v30, 9  ;;  %v4501_v46 = vrot.slane %v3436_v37, 9 }
 0x33c   : > { %v3580_v54 = vmax.f32 %v3414_v33, %v4498_v60 }
 0x33d   : > { %v3400_v26 = vadd.f32 %v3399_v20, %v3371_v25  ;;  %v3581_v9 = vmax.f32 %v3434_v61, %v4499_v62  ;;  %v3582_v23 = vmax.f32 %v3435_v30, %v4500_v24  ;;  %v3583_v34 = vmax.f32 %v3436_v37, %v4501_v46 }
 0x33f   : > { %v3415_v59 = vmax.f32 %v3400_v26, 0.0 }
 0x341   : > { %v3437_v6 = vrot.slane %v3415_v59, 2  ;;  %v3438_v41 = vrot.slane %v3415_v59, 4  ;;  %v4502_v21 = vrot.slane %v3415_v59, 9  ;;  %v3439_v17 = vrot.slane %v3415_v59, 6 }
 0x343   : > { %v4503_v4 = vrot.slane %v3437_v6, 9  ;;  %v4504_v1 = vrot.slane %v3438_v41, 9  ;;  %v4505_v13 = vrot.slane %v3439_v17, 9  ;;  %v3584_v57 = vmax.f32 %v3415_v59, %v4502_v21 }
 0x345   : > { %v3585_v55 = vmax.f32 %v3437_v6, %v4503_v4  ;;  %v3586_v16 = vmax.f32 %v3438_v41, %v4504_v1  ;;  %v3587_v8 = vmax.f32 %v3439_v17, %v4505_v13  ;;  %v3608_v39 = vmax.f32 %v3580_v54, %v3584_v57 }
 0x347   : > { %v3609_v43 = vmax.f32 %v3581_v9, %v3585_v55  ;;  %v3610_v36 = vmax.f32 %v3582_v23, %v3586_v16  ;;  %v3611_v7 = vmax.f32 %v3583_v34, %v3587_v8  ;;  %v3635_v18 = vperm.slane %v3608_v39, 0  ;;  %v4683_v16 = vld [vmem:[%s7778_s5 + $0x88] sm:$0xff] }
 0x348   : > { %4031 = vmatpush.bf16.msra.mxu2 %v4683_v16 }
 0x349   : > { %v3636_v38 = vperm.slane %v3609_v43, 0  ;;  %v3637_v5 = vperm.slane %v3610_v36, 0  ;;  %v3665_v40 = vperm.slane %v3611_v7, 0 }
 0x34b   : > { %v3670_v50 = vsel %vm2883_vm13, %v3637_v5, %v3636_v38  ;;  %v3646_v28 = vsel %vm7916_vm4, %v3636_v38, %v3635_v18  ;;  %v3688_v56 = vsel %vm2883_vm13, %v3636_v38, %v3635_v18  ;;  %vm7926_vm4 = vmmov %vm7919_vm9 }
 0x34c   : > { %v3671_v31 = vsel %vm7917_vm2, %v3665_v40, %v3670_v50  ;;  %v3647_v10 = vsel %vm2799_vm15, %v3637_v5, %v3646_v28  ;;  %v3689_v63 = vsel %vm7918_vm6, %v3637_v5, %v3688_v56  ;;  %v4682_v5 = vld [vmem:[%s7778_s5 + $0x80] sm:$0xff]  ;;  %v3407_v28 = vpop.f32.mrf.mxu2  ;;  %vm7927_vm2 = vmmov %vm7924_vm0 }
 0x34d   : > { %v3682_v42 = vsel %vm3680_vm3, %v3671_v31, 0.0  ;;  %v7562_v14 = vsel %vm7919_vm9, 0.0, %v3647_v10  ;;  %v7565_v35 = vsel %vm2799_vm15, %v3665_v40, %v3689_v63  ;;  %4032 = vmatpush.bf16.msra.mxu2 %v4682_v5 }
 0x34e   : > { %3744 = vrot.lane.b32.xlu1 %v3682_v42, %s5504_s23  ;;  %3820 = vst [vmem:[#allocation1 + $0x10] ss:$2 sm:$0xff] %v3682_v42  ;;  %3754 = vrot.lane.b32.xlu2 %v7562_v14, %s5505_s24 }
 0x34f   : > { %3696 = vrot.lane.b32.xlu0 %v7565_v35, %s5504_s23 }
 0x356   : > { %3710 = vrot.lane.b32.xlu1 %v3682_v42, %s5505_s24  ;;  %3763 = vrot.lane.b32.xlu2 %v7565_v35, %s5509_s30 }
 0x361   : > { %v3373_v44 = vpop.f32.mrf.mxu1 }
 0x362   : > { %v3374_v12 = vadd.f32 %v7481_v0, %v3373_v44  ;;  %v3409_v44 = vpop.f32.mrf.mxu2 }
 0x364   : > { %v3403_v2 = vadd.f32 %v3402_v32, %v3374_v12 }
 0x366   : > { %v3416_v22 = vmax.f32 %v3403_v2, 0.0 }
 0x368   : > { %v3440_v51 = vrot.slane %v3416_v22, 2  ;;  %v3441_v27 = vrot.slane %v3416_v22, 4  ;;  %v3442_v19 = vrot.slane %v3416_v22, 6  ;;  %v4506_v15 = vrot.slane %v3416_v22, 9 }
 0x369   : > { %v3375_v52 = vpop.f32.mrf.mxu1 }
 0x36a   : > { %v3376_v29 = vadd.f32 %v7481_v0, %v3375_v52  ;;  %v4507_v33 = vrot.slane %v3440_v51, 9  ;;  %v4508_v58 = vrot.slane %v3441_v27, 9  ;;  %v4509_v25 = vrot.slane %v3442_v19, 9 }
 0x36b   : > { %v3588_v26 = vmax.f32 %v3416_v22, %v4506_v15 }
 0x36c   : > { %v3405_v47 = vadd.f32 %v3404_v53, %v3376_v29  ;;  %v3589_v46 = vmax.f32 %v3440_v51, %v4507_v33  ;;  %v3590_v6 = vmax.f32 %v3441_v27, %v4508_v58  ;;  %v3591_v41 = vmax.f32 %v3442_v19, %v4509_v25 }
 0x36e   : > { %v3417_v11 = vmax.f32 %v3405_v47, 0.0 }
 0x370   : > { %v3443_v20 = vrot.slane %v3417_v11, 2  ;;  %v4510_v61 = vrot.slane %v3417_v11, 9  ;;  %v3444_v30 = vrot.slane %v3417_v11, 4  ;;  %v3445_v37 = vrot.slane %v3417_v11, 6 }
 0x372   : > { %v4511_v60 = vrot.slane %v3443_v20, 9  ;;  %v4512_v59 = vrot.slane %v3444_v30, 9  ;;  %v4513_v62 = vrot.slane %v3445_v37, 9  ;;  %v3592_v24 = vmax.f32 %v3417_v11, %v4510_v61 }
 0x374   : > { %v3593_v21 = vmax.f32 %v3443_v20, %v4511_v60  ;;  %v3594_v17 = vmax.f32 %v3444_v30, %v4512_v59  ;;  %v3595_v54 = vmax.f32 %v3445_v37, %v4513_v62  ;;  %v3612_v4 = vmax.f32 %v3588_v26, %v3592_v24 }
 0x376   : > { %v3613_v1 = vmax.f32 %v3589_v46, %v3593_v21  ;;  %v3614_v13 = vmax.f32 %v3590_v6, %v3594_v17  ;;  %v3615_v57 = vmax.f32 %v3591_v41, %v3595_v54  ;;  %v3638_v9 = vperm.slane %v3612_v4, 0 }
 0x378   : > { %v3639_v23 = vperm.slane %v3613_v1, 0  ;;  %v3640_v34 = vperm.slane %v3614_v13, 0  ;;  %v3666_v55 = vperm.slane %v3615_v57, 0  ;;  %v7608_v1 = vpop.permute.xlu2 %3769 }
 0x37a   : > { %v3691_v8 = vsel %vm2883_vm13, %v3639_v23, %v3638_v9  ;;  %v3672_v39 = vsel %vm2883_vm13, %v3640_v34, %v3639_v23  ;;  %v3648_v43 = vsel %vm7920_vm10, %v3639_v23, %v3638_v9 }
 0x37b   : > { %v3692_v36 = vsel %vm7921_vm7, %v3640_v34, %v3691_v8  ;;  %v3673_v7 = vsel %vm7922_vm8, %v3666_v55, %v3672_v39  ;;  %v3649_v38 = vsel %vm2799_vm15, %v3640_v34, %v3648_v43  ;;  %v3743_v8 = vpop.permute.xlu0 %3742 }
 0x37c   : > { %v7590_v40 = vsel %vm2799_vm15, %v3666_v55, %v3692_v36  ;;  %v3683_v18 = vsel %vm3680_vm3, %v3673_v7, 0.0  ;;  %v7594_v50 = vsel %vm7923_vm14, 0.0, %v3649_v38  ;;  %v3378_v56 = vpop.f32.mrf.mxu1 }
 0x37d   : > { %3698 = vrot.lane.b32.xlu1 %v7590_v40, %s5504_s23  ;;  %3822 = vst [vmem:[#allocation1 + $0x11] ss:$2 sm:$0xff] %v3683_v18  ;;  %3746 = vrot.lane.b32.xlu2 %v3683_v18, %s5504_s23  ;;  %v3379_v31 = vadd.f32 %v7481_v0, %v3378_v56  ;;  %v3707_v56 = vpop.permute.xlu1 %3706 }
 0x37e   : > { %3756 = vrot.lane.b32.xlu0 %v7594_v50, %s5505_s24 }
 0x37f   : > { %v3408_v10 = vadd.f32 %v3407_v28, %v3379_v31  ;;  %v3787_v31 = vsel %vm3204_vm11, %v7506_v45, %v3743_v8  ;;  %v4673_v45 = vld [vmem:[%s7778_s5 + $0x38] sm:$0xff] }
 0x380   : > { %v7620_v43 = vpop.permute.xlu2 %3694  ;;  %3997 = vmatpush.bf16.msrb.mxu3 %v4673_v45  ;;  %v5482_v45 = vld [vmem:[%s7779_s6] ss:$0 sm:$0xff] }
 0x381   : > { %v3418_v63 = vmax.f32 %v3408_v10, 0.0 }
 0x383   : > { %v3446_v12 = vrot.slane %v3418_v63, 2  ;;  %v3447_v2 = vrot.slane %v3418_v63, 4  ;;  %v3448_v22 = vrot.slane %v3418_v63, 6  ;;  %v4514_v29 = vrot.slane %v3418_v63, 9 }
 0x384   : > { %v3380_v42 = vpop.f32.mrf.mxu1  ;;  %v3833_v7 = vld.sshfl [vmem:[#allocation1 + $0x10] sm:$0xff pattern:$0x75316420]  ;;  %3998 = vmatpush.bf16.msrb.mxu3 %v4672_v49  ;;  %v4685_v49 = vld [vmem:[%s7780_s7 + $0x8] sm:$0xff] }
 0x385   : > { %3712 = vrot.lane.b32.xlu2 %v3683_v18, %s5505_s24  ;;  %v3381_v32 = vadd.f32 %v7481_v0, %v3380_v42  ;;  %v4515_v51 = vrot.slane %v3446_v12, 9  ;;  %v4516_v27 = vrot.slane %v3447_v2, 9  ;;  %v4517_v19 = vrot.slane %v3448_v22, 9  ;;  %v7626_v18 = vpop.permute.xlu0 %3708 }
 0x386   : > { %3765 = vrot.lane.b32.xlu0 %v7590_v40, %s5509_s30  ;;  %v3596_v0 = vmax.f32 %v3418_v63, %v4514_v29  ;;  %v4670_v29 = vld [vmem:[%s7778_s5 + $0x20] sm:$0xff] }
 0x387   : > { %v3410_v52 = vadd.f32 %v3409_v44, %v3381_v32  ;;  %v3597_v30 = vmax.f32 %v3446_v12, %v4515_v51  ;;  %v3598_v37 = vmax.f32 %v3447_v2, %v4516_v27  ;;  %v3599_v26 = vmax.f32 %v3448_v22, %v4517_v19  ;;  %v4668_v51 = vld [vmem:[%s7778_s5 + $0x10] sm:$0xff] }
 0x388   : > { %v3775_v32 = vsel %vm3204_vm11, 0.0, %v5348_v48  ;;  %v4671_v48 = vld [vmem:[%s7778_s5 + $0x28] sm:$0xff] }
 0x389   : > { %v3419_v53 = vmax.f32 %v3410_v52, 0.0  ;;  %v3779_v12 = vsel %vm3222_vm1, %v3775_v32, %v3707_v56  ;;  %3999 = vmatpush.bf16.msrb.mxu3 %v4671_v48 }
 0x38b   : > { %v3449_v47 = vrot.slane %v3419_v53, 2  ;;  %v4518_v15 = vrot.slane %v3419_v53, 9  ;;  %v3450_v11 = vrot.slane %v3419_v53, 4  ;;  %v3451_v33 = vrot.slane %v3419_v53, 6 }
 0x38d   : > { %3726 = vrot.lane.b32.xlu2 %v7594_v50, %s5509_s30  ;;  %v4519_v58 = vrot.slane %v3449_v47, 9  ;;  %v4520_v25 = vrot.slane %v3450_v11, 9  ;;  %v3600_v20 = vmax.f32 %v3419_v53, %v4518_v15  ;;  %v4521_v61 = vrot.slane %v3451_v33, 9  ;;  %v3723_v10 = vpop.permute.xlu0 %3722  ;;  %4000 = vmatpush.bf16.msrb.mxu3 %v4670_v29  ;;  %v4669_v53 = vld [vmem:[%s7778_s5 + $0x18] sm:$0xff] }
 0x38e   : > { %v3783_v22 = vsel %vm3240_vm5, %v3779_v12, %v3723_v10 }
 0x38f   : > { %v3601_v60 = vmax.f32 %v3449_v47, %v4519_v58  ;;  %v3602_v59 = vmax.f32 %v3450_v11, %v4520_v25  ;;  %v3616_v62 = vmax.f32 %v3596_v0, %v3600_v20  ;;  %v3603_v24 = vmax.f32 %v3451_v33, %v4521_v61  ;;  %v4667_v47 = vld [vmem:[%s7778_s5 + $0x8] sm:$0xff]  ;;  %v4666_v11 = vld [vmem:[%s7778_s5] sm:$0xff]  ;;  %v4681_v0 = vld [vmem:[%s7778_s5 + $0x78] sm:$0xff] }
 0x390   : > { %v4680_v25 = vld [vmem:[%s7778_s5 + $0x70] sm:$0xff] }
 0x391   : > { %v3617_v46 = vmax.f32 %v3597_v30, %v3601_v60  ;;  %v3618_v6 = vmax.f32 %v3598_v37, %v3602_v59  ;;  %v3619_v41 = vmax.f32 %v3599_v26, %v3603_v24  ;;  %v3641_v21 = vperm.slane %v3616_v62, 0  ;;  %4001 = vmatpush.bf16.msrb.mxu3 %v4669_v53  ;;  %v4679_v30 = vld [vmem:[%s7778_s5 + $0x68] sm:$0xff]  ;;  %v4678_v37 = vld [vmem:[%s7778_s5 + $0x60] sm:$0xff]  ;;  %v4677_v62 = vld [vmem:[%s7778_s5 + $0x58] sm:$0xff] }
 0x393   : > { %v3642_v17 = vperm.slane %v3617_v46, 0  ;;  %v3643_v54 = vperm.slane %v3618_v6, 0  ;;  %v3667_v4 = vperm.slane %v3619_v41, 0  ;;  %v4676_v6 = vld [vmem:[%s7778_s5 + $0x50] sm:$0xff] }
 0x395   : > { %v3650_v13 = vsel %vm7924_vm0, %v3642_v17, %v3641_v21  ;;  %v3674_v57 = vsel %vm2883_vm13, %v3643_v54, %v3642_v17  ;;  %v3734_v16 = vsel %vm2883_vm13, %v3642_v17, %v3641_v21  ;;  %4002 = vmatpush.bf16.msrb.mxu3 %v4668_v51 }
 0x396   : > { %v3651_v9 = vsel %vm2799_vm15, %v3643_v54, %v3650_v13  ;;  %v3675_v23 = vsel %vm7925_vm12, %v3667_v4, %v3674_v57  ;;  %v3735_v39 = vsel %vm7927_vm2, %v3643_v54, %v3734_v16 }
 0x397   : > { %v3659_v34 = vsel %vm7926_vm4, 0.0, %v3651_v9  ;;  %v3684_v55 = vsel %vm3680_vm3, %v3675_v23, 0.0  ;;  %v3736_v36 = vsel %vm2799_vm15, %v3667_v4, %v3735_v39  ;;  %vm3811_vm3 = vcmask 1043456  }
 0x398   : > { %3758 = vrot.lane.b32.xlu1 %v3659_v34, %s5505_s24  ;;  %3828 = vst [vmem:[#allocation1 + $0x30] ss:$2 sm:$0xff] %v3684_v55  ;;  %3748 = vrot.lane.b32.xlu0 %v3684_v55, %s5504_s23 }
 0x399   : > { %4003 = vmatpush.bf16.msrb.mxu3 %v4667_v47 }
 0x39d   : > { %4004 = vmatpush.bf16.msrb.mxu3 %v4666_v11 }
 0x39f   : > { %v3836_v38 = vld.sshfl [vmem:[#allocation1 + $0x30] sm:$0xff pattern:$0x75316420] }
 0x3a0   : > { %3767 = vrot.lane.b32.xlu1 %v3736_v36, %s5509_s30  ;;  %3728 = vrot.lane.b32.xlu0 %v3659_v34, %s5509_s30  ;;  %v3845_v5 = vpack.c.bf16 %v3836_v38, %v3833_v7  ;;  %v4675_v34 = vld [vmem:[%s7778_s5 + $0x48] sm:$0xff] }
 0x3a1   : > { %4011 = vmatpush.bf16.msra.mxu3 %v4681_v0 }
 0x3a2   : > { %4594 = vmatmul.msk.bf16.vlgmr.msra.gmra.mxu2 %vm3204_vm11, %v3845_v5 }
 0x3a5   : > { %4012 = vmatpush.bf16.msra.mxu3 %v4680_v25 }
 0x3a8   : > { %v3755_v28 = vpop.permute.xlu2 %3754  ;;  %3724 = vrot.lane.b32.xlu1 %v7562_v14, %s5509_s30 }
 0x3a9   : > { %v3791_v63 = vsel %vm3222_vm1, %v3787_v31, %v3755_v28  ;;  %4013 = vmatpush.bf16.msra.mxu3 %v4679_v30  ;;  %v3776_v28 = vsel %vm3204_vm11, %v7516_v3, %v7620_v43 }
 0x3ad   : > { %4014 = vmatpush.bf16.msra.mxu3 %v4678_v37 }
 0x3b0   : > { %v3764_v42 = vpop.permute.xlu2 %3763 }
 0x3b1   : > { %v3795_v44 = vsel %vm3240_vm5, %v3791_v63, %v3764_v42  ;;  %4015 = vmatpush.bf16.msra.mxu3 %v4677_v62 }
 0x3b2   : > { %v3807_v2 = vrot.slane %v3795_v44, 4 }
 0x3b4   : > { %v3812_v52 = vsel %vm3811_vm3, %v3783_v22, %v3807_v2 }
 0x3b5   : > { %3816 = vst [vmem:[#allocation1] ss:$2 sm:$0xff] %v3812_v52  ;;  %4016 = vmatpush.bf16.msra.mxu3 %v4676_v6  ;;  %v4686_v52 = vld [vmem:[%s7780_s7 + $0x10] sm:$0xff] }
 0x3b9   : > { %4017 = vmatpush.bf16.msra.mxu3 %v4675_v34 }
 0x3c0   : > { %v3745_v27 = vpop.permute.xlu1 %3744 }
 0x3c1   : > { %v3697_v19 = vpop.permute.xlu0 %3696  ;;  %v3788_v39 = vsel %vm3204_vm11, %v7565_v35, %v3745_v27  ;;  %v3780_v35 = vsel %vm3222_vm1, %v3776_v28, %v7626_v18  ;;  %v4687_v18 = vld [vmem:[%s7780_s7 + $0x18] sm:$0xff]  ;;  %v4684_v27 = vld [vmem:[%s7780_s7] sm:$0xff] }
 0x3c8   : > { %v3711_v33 = vpop.permute.xlu1 %3710 }
 0x3d7   : > { %v3747_v58 = vpop.permute.xlu2 %3746 }
 0x3d8   : > { %v3789_v17 = vsel %vm3204_vm11, %v7590_v40, %v3747_v58 }
 0x3df   : > { %v3713_v26 = vpop.permute.xlu2 %3712 }
 0x3e7   : > { %v3727_v54 = vpop.permute.xlu2 %3726 }
 0x3ef   : > { %v3699_v20 = vpop.permute.xlu1 %3698 }
 0x3f0   : > { %v3757_v15 = vpop.permute.xlu0 %3756  ;;  %v3778_v41 = vsel %vm3204_vm11, %v7594_v50, %v3699_v20  ;;  %v3777_v50 = vsel %vm3204_vm11, %v7562_v14, %v3697_v19  ;;  %v4674_v14 = vld [vmem:[%s7778_s5 + $0x40] sm:$0xff] }
 0x3f1   : > { %v3782_v9 = vsel %vm3222_vm1, %v3778_v41, %v3713_v26  ;;  %v3781_v55 = vsel %vm3222_vm1, %v3777_v50, %v3711_v33  ;;  %v3792_v7 = vsel %vm3222_vm1, %v3788_v39, %v3757_v15  ;;  %4018 = vmatpush.bf16.msra.mxu3 %v4674_v14  ;;  %v4692_v14 = vld [vmem:[%s7782_s9 + $0x20] sm:$0xff] }
 0x3f8   : > { %v3766_v61 = vpop.permute.xlu0 %3765 }
 0x3f9   : > { %v3796_v5 = vsel %vm3240_vm5, %v3792_v7, %v3766_v61 }
 0x40a   : > { %v3759_v60 = vpop.permute.xlu1 %3758  ;;  %v3749_v59 = vpop.permute.xlu0 %3748 }
 0x40b   : > { %v3790_v24 = vsel %vm3204_vm11, %v3736_v36, %v3749_v59  ;;  %v3793_v4 = vsel %vm3222_vm1, %v3789_v17, %v3759_v60  ;;  %v3785_v36 = vsel %vm3240_vm5, %v3781_v55, %v3727_v54  ;;  %vm4103_vm11 = vcmask 519168  }
 0x40c   : > { %v3794_v46 = vsel %vm3222_vm1, %v3790_v24, %v3707_v56  ;;  %v3808_v56 = vrot.slane %v3796_v5, 4 }
 0x40d   : > { %v3798_v21 = vsel %vm3240_vm5, %v3794_v46, %v7608_v1  ;;  %v4695_v46 = vld [vmem:[%s7782_s9 + $0x38] sm:$0xff] }
 0x40e   : > { %v3810_v13 = vrot.slane %v3798_v21, 4  ;;  %4229 = vmatpush.bf16.msrb.mxu1 %v4695_v46  ;;  %v4694_v21 = vld [vmem:[%s7782_s9 + $0x30] sm:$0xff] }
 0x412   : > { %v3768_v57 = vpop.permute.xlu1 %3767  ;;  %v3729_v23 = vpop.permute.xlu0 %3728  ;;  %4230 = vmatpush.bf16.msrb.mxu1 %v4694_v21 }
 0x413   : > { %v3797_v1 = vsel %vm3240_vm5, %v3793_v4, %v3768_v57  ;;  %v3786_v40 = vsel %vm3240_vm5, %v3782_v9, %v3729_v23 }
 0x414   : > { %v3809_v16 = vrot.slane %v3797_v1, 4  ;;  %v3815_v8 = vsel %vm3811_vm3, %v3786_v40, %v3810_v13  ;;  %v4693_v1 = vld [vmem:[%s7782_s9 + $0x28] sm:$0xff] }
 0x415   : > { %3826 = vst [vmem:[#allocation1 + $0x21] ss:$2 sm:$0xff] %v3815_v8 }
 0x416   : > { %v3814_v38 = vsel %vm3811_vm3, %v3785_v36, %v3809_v16  ;;  %4231 = vmatpush.bf16.msrb.mxu1 %v4693_v1 }
 0x417   : > { %3824 = vst [vmem:[#allocation1 + $0x20] ss:$2 sm:$0xff] %v3814_v38 }
 0x41a   : > { %v3725_v31 = vpop.permute.xlu1 %3724  ;;  %4232 = vmatpush.bf16.msrb.mxu1 %v4692_v14 }
 0x41b   : > { %v3784_v10 = vsel %vm3240_vm5, %v3780_v35, %v3725_v31  ;;  %vm7928_vm5 = vmmov %vm7924_vm0 }
 0x41c   : > { %v3813_v63 = vsel %vm3811_vm3, %v3784_v10, %v3808_v56  ;;  %v4691_v10 = vld [vmem:[%s7782_s9 + $0x18] sm:$0xff] }
 0x41d   : > { %3818 = vst [vmem:[#allocation1 + $0x1] ss:$2 sm:$0xff] %v3813_v63 }
 0x41e   : > { %v3834_v32 = vld.sshfl [vmem:[#allocation1 + $0x20] sm:$0xff pattern:$0x75316420]  ;;  %v3835_v2 = vld.sshfl [vmem:[#allocation1 + $0x28] sm:$0xff pattern:$0x75316420]  ;;  %4233 = vmatpush.bf16.msrb.mxu1 %v4691_v10 }
 0x424   : > { %v3831_v42 = vld.sshfl [vmem:[#allocation1] sm:$0xff pattern:$0x75316420]  ;;  %v3832_v12 = vld.sshfl [vmem:[#allocation1 + $0x8] sm:$0xff pattern:$0x75316420] }
 0x425   : > { %v3843_v44 = vpack.c.bf16 %v3834_v32, %v3831_v42  ;;  %v3844_v22 = vpack.c.bf16 %v3835_v2, %v3832_v12  ;;  %v4034_v53 = vpop.f32.mrf.mxu2 }
 0x427   : > { %4005 = vmatmul.bf16.vlgmr.msrb.gmra.mxu3 %v3843_v44  ;;  %v4690_v44 = vld [vmem:[%s7782_s9 + $0x10] sm:$0xff] }
 0x428   : > { %4153 = vmatpush.bf16.msrb.mxu3 %v4687_v18  ;;  %4234 = vmatpush.bf16.msrb.mxu1 %v4690_v44  ;;  %v4688_v18 = vld [vmem:[%s7782_s9] sm:$0xff] }
 0x42c   : > { %4154 = vmatpush.bf16.msrb.mxu3 %v4686_v52 }
 0x42d   : > { %v4036_v37 = vpop.f32.mrf.mxu2 }
 0x430   : > { %4155 = vmatpush.bf16.msrb.mxu3 %v4685_v49  ;;  %v4121_v49 = vld [vmem:[%s7781_s8] sm:$0x1] }
 0x434   : > { %4156 = vmatpush.bf16.msrb.mxu3 %v4684_v27 }
 0x437   : > { %4019 = vmatmul.bf16.vlgmr.msra.gmra.mxu3 %v3844_v22  ;;  %v4689_v22 = vld [vmem:[%s7782_s9 + $0x8] sm:$0xff] }
 0x438   : > { %4235 = vmatpush.bf16.msrb.mxu1 %v4689_v22 }
 0x43c   : > { %4236 = vmatpush.bf16.msrb.mxu1 %v4688_v18 }
 0x4aa   : > { %v4006_v3 = vpop.f32.mrf.mxu3 }
 0x4ab   : > { %v4007_v48 = vadd.f32 %v5482_v45, %v4006_v3 }
 0x4b2   : > { %v4008_v43 = vpop.f32.mrf.mxu3 }
 0x4b3   : > { %v4009_v0 = vadd.f32 %v5482_v45, %v4008_v43 }
 0x4ba   : > { %v4020_v29 = vpop.f32.mrf.mxu3 }
 0x4bb   : > { %v4021_v51 = vadd.f32 %v4020_v29, %v4007_v48 }
 0x4bd   : > { %v4035_v19 = vadd.f32 %v4034_v53, %v4021_v51 }
 0x4bf   : > { %v4039_v47 = vmax.f32 %v4035_v19, 0.0  ;;  %v4180_v19 = vld [vmem:[%s7783_s10] sm:$0x1] }
 0x4c1   : > { %v4043_v15 = vrot.slane %v4039_v47, 2  ;;  %v4044_v11 = vrot.slane %v4039_v47, 4  ;;  %v4045_v33 = vrot.slane %v4039_v47, 6  ;;  %v4595_v26 = vrot.slane %v4039_v47, 9 }
 0x4c2   : > { %v4022_v58 = vpop.f32.mrf.mxu3 }
 0x4c3   : > { %v4596_v25 = vrot.slane %v4043_v15, 9  ;;  %v4597_v20 = vrot.slane %v4044_v11, 9  ;;  %v4598_v61 = vrot.slane %v4045_v33, 9  ;;  %v4023_v30 = vadd.f32 %v4022_v58, %v4009_v0 }
 0x4c4   : > { %v4079_v41 = vmax.f32 %v4039_v47, %v4595_v26 }
 0x4c5   : > { %v4037_v60 = vadd.f32 %v4036_v37, %v4023_v30  ;;  %v4080_v59 = vmax.f32 %v4043_v15, %v4596_v25  ;;  %v4081_v62 = vmax.f32 %v4044_v11, %v4597_v20  ;;  %v4082_v24 = vmax.f32 %v4045_v33, %v4598_v61 }
 0x4c7   : > { %v4040_v6 = vmax.f32 %v4037_v60, 0.0  ;;  %v4087_v57 = vmax.f32 %v4079_v41, %v4081_v62  ;;  %v4088_v9 = vmax.f32 %v4080_v59, %v4082_v24 }
 0x4c9   : > { %v4046_v17 = vrot.slane %v4040_v6, 2  ;;  %v4047_v54 = vrot.slane %v4040_v6, 4  ;;  %v4048_v4 = vrot.slane %v4040_v6, 6  ;;  %v4599_v13 = vrot.slane %v4040_v6, 9 }
 0x4ca   : > { %v4095_v39 = vperm.slane %v4087_v57, 0  ;;  %v4096_v36 = vperm.slane %v4088_v9, 0 }
 0x4cb   : > { %v4600_v23 = vrot.slane %v4046_v17, 9  ;;  %v4601_v34 = vrot.slane %v4047_v54, 9  ;;  %v4602_v50 = vrot.slane %v4048_v4, 9  ;;  %v4083_v40 = vmax.f32 %v4040_v6, %v4599_v13 }
 0x4cc   : > { %v4099_v35 = vsel %vm2883_vm13, %v4096_v36, %v4095_v39  ;;  %vm4242_vm13 = vcmask 65536  }
 0x4cd   : > { %v4084_v55 = vmax.f32 %v4046_v17, %v4600_v23  ;;  %v4085_v16 = vmax.f32 %v4047_v54, %v4601_v34  ;;  %v4086_v8 = vmax.f32 %v4048_v4, %v4602_v50 }
 0x4cf   : > { %v4089_v7 = vmax.f32 %v4083_v40, %v4085_v16  ;;  %v4090_v38 = vmax.f32 %v4084_v55, %v4086_v8 }
 0x4d1   : > { %v4097_v5 = vperm.slane %v4089_v7, 0  ;;  %v4098_v28 = vperm.slane %v4090_v38, 0 }
 0x4d3   : > { %v4100_v56 = vsel %vm7928_vm5, %v4097_v5, %v4099_v35 }
 0x4d4   : > { %v4101_v31 = vsel %vm2799_vm15, %v4098_v28, %v4100_v56 }
 0x4d5   : > { %v4104_v63 = vsel %vm4103_vm11, %v4101_v31, 0.0 }
 0x4d6   : > { %v4105_v42 = vrot.slane %v4104_v63, 4 }
 0x4d8   : > { %v4106_v32 = vadd.f32 %v4105_v42, %v4104_v63 }
 0x4da   : > { %v4107_v12 = vrot.slane %v4106_v32, 2 }
 0x4dc   : > { %v4108_v2 = vadd.f32 %v4107_v12, %v4106_v32 }
 0x4de   : > { %v4109_v3 = vrot.slane %v4108_v2, 1 }
 0x4e0   : > { %v4110_v43 = vadd.f32 %v4109_v3, %v4108_v2 }
 0x4e2   : > { %v4111_v52 = vmul.f32 0.25, %v4110_v43 }
 0x4e4   : > { %v4112_v45 = vpack.c.bf16 %v4111_v52, %v4111_v52 }
 0x4e6   : > { %4619 = vmatmul.msk.bf16.vlgmr.msrb.gmra.mxu3 %vm3222_vm1, %v4112_v45 }
 0x569   : > { %v4158_v48 = vpop.f32.mrf.mxu3 }
 0x56a   : > { %v4159_v29 = vadd.f32 %v4158_v48, %v4121_v49 }
 0x56c   : > { %v4162_v53 = vmax.f32 %v4159_v29, 0.0 }
 0x56e   : > { %v4163_v51 = vpack.c.bf16 %v4162_v53, %v4162_v53 }
 0x570   : > { %4237 = vmatmul.bf16.vlgmr.msrb.gmra.mxu1 %v4163_v51 }
 0x571   : > { %v4160_v27 = vpop.f32.mrf.mxu3 }
 0x5ed   : > { %v4238_v47 = vpop.f32.mrf.mxu1 }
 0x5ee   : > { %v4239_v15 = vadd.f32 %v4238_v47, %v4180_v19 }
 0x5f0   : > { %4243 = vst.msk [vmem:[%s382_s26] sm:$0x1] %vm4242_vm13, %v4239_v15 }
 0x5f5   : > { %v4240_v11 = vpop.f32.mrf.mxu1 }
 0x5f6 PF: > { %s21_s17 = sadd.s32 1, %s5491_s17  }
 0x5f7   : > { %p18_p4 = scmp.ge.s32.totalorder %s21_s17, 4  }
 0x5f9   :  { %20 = sbr.rel (!%p18_p4) target bundleno = 1 (0x1), region = 101 }

</bundles_post_ra>
